<compile_context>
chip_gen: v5e
topology: v5e:2x2
jax: 0.10.0
libtpu: 0.0.40
codegen_flags: <defaults>
</compile_context>

<pallas_src>
import functools

import jax
import jax.numpy as jnp
from jax import lax
from jax.experimental import pallas as pl
from jax.experimental.pallas import tpu as pltpu

_VMEM = pl.BlockSpec(memory_space=pltpu.MemorySpace.VMEM)
_BN_EPS = 1e-5


# ---------------------------------------------------------------------------
# In-kernel building block: Conv2d(3x3, pad=1) + BatchNorm2d (batch stats) + ReLU
# ---------------------------------------------------------------------------
def _conv3x3_bn_relu(pad_ref, w_ref, gamma, beta, *, n, ho, wo, cin, cout):
    """pad_ref: (n, ho+2, wo+2, cin) zero-bordered input; w_ref: (9*cin, cout).

    Returns the (n*ho*wo, cout) f32 activation.
    """
    m = n * ho * wo

    def tap(dy, dx):
        # One 3x3 tap = static shifted window of the zero-padded VMEM buffer.
        return pad_ref[:, dy:dy + ho, dx:dx + wo, :].reshape(m, cin)

    if cin < 128:
        # Small-C regime: a per-tap contraction of K=cin would leave most of the MXU
        # idle.  Assemble the 9 taps into one in-register im2col slab and run a single
        # GEMM with K=9*cin; accumulation stays inside the MXU.
        patch = jnp.concatenate(
            [tap(dy, dx) for dy in range(3) for dx in range(3)], axis=-1)   # (m, 9*cin)
        acc = jnp.dot(patch, w_ref[...], preferred_element_type=jnp.float32)
    else:
        # Large-C regime: K=cin already fills the MXU; avoid the 9x patch blowup and
        # accumulate 9 dots instead.  (Trace-time branch: cin is a Python int.)
        acc = jnp.zeros((m, cout), jnp.float32)
        for dy in range(3):
            for dx in range(3):
                t = dy * 3 + dx
                acc = acc + jnp.dot(tap(dy, dx), w_ref[t * cin:(t + 1) * cin, :],
                                    preferred_element_type=jnp.float32)

    # BatchNorm2d, training semantics: biased batch statistics over all rows (= N,H,W).
    # The conv bias is cancelled exactly by the mean subtraction, so it is never added.
    mean = jnp.mean(acc, axis=0, keepdims=True)                      # (1, cout)
    cen = acc - mean
    var = jnp.mean(cen * cen, axis=0, keepdims=True)                 # biased variance
    scale = gamma * lax.rsqrt(var + _BN_EPS)                         # folded BN affine
    return jnp.maximum(cen * scale + beta, 0.0)                      # ReLU


# ---------------------------------------------------------------------------
# Fused kernel: maxpool(2,2)+indices -> conv1+BN+ReLU -> conv2+BN+ReLU
# ---------------------------------------------------------------------------
def _encoder_kernel(xr_ref, w1_ref, g1_ref, be1_ref, w2_ref, g2_ref, be2_ref,
                    *out_and_scratch, n, ho, wo, cin, c1, emit_inter):
    if emit_inter:
        out_ref, idx_ref, pool_ref, h1_ref, pad1_ref, pad2_ref = out_and_scratch
    else:
        out_ref, idx_ref, pad1_ref, pad2_ref = out_and_scratch
        pool_ref = h1_ref = None

    w_in = 2 * wo                                    # input width before pooling

    # ---- MaxPool2d(kernel=2, stride=2, return_indices=True) -----------------
    # xr_ref[(nb*ho + hb), r, wb, dw*cin + c] == x[nb, 2*hb + r, 2*wb + dw, c]
    xv = xr_ref[...]                                 # (n*ho, 2, wo, 2*cin)
    top, bot = xv[:, 0], xv[:, 1]                    # (n*ho, wo, 2*cin)
    x00, x01 = top[..., :cin], top[..., cin:]
    x10, x11 = bot[..., :cin], bot[..., cin:]

    # Flat PyTorch index of the window's top-left element inside its HxW plane,
    # generated in-kernel (nothing DMA'd from HBM for the indices).
    hoi = lax.broadcasted_iota(jnp.int32, (n, ho, wo, cin), 1)
    woi = lax.broadcasted_iota(jnp.int32, (n, ho, wo, cin), 2)
    base = ((2 * hoi) * w_in + 2 * woi).reshape(n * ho, wo, cin)

    best_v, best_i = x00, base
    for cand, off in ((x01, 1), (x10, w_in), (x11, w_in + 1)):
        take = cand > best_v                         # strict '>' -> first max wins
        # TODO(synk): PyTorch propagates NaN in MaxPool; '>'+where drops a NaN that is
        # not in the first window position (edge case only).
        best_v = jnp.where(take, cand, best_v)
        best_i = jnp.where(take, base + off, best_i)
    idx_ref[...] = best_i
    if pool_ref is not None:
        pool_ref[...] = best_v

    # ---- conv1 + BN + ReLU (pooled tensor never leaves VMEM) ----------------
    pad1_ref[...] = jnp.zeros(pad1_ref.shape, jnp.float32)
    pad1_ref[:, 1:1 + ho, 1:1 + wo, :] = best_v.reshape(n, ho, wo, cin)
    h1 = _conv3x3_bn_relu(pad1_ref, w1_ref, g1_ref[...], be1_ref[...],
                          n=n, ho=ho, wo=wo, cin=cin, cout=c1)
    if h1_ref is not None:
        h1_ref[...] = h1

    # ---- conv2 + BN + ReLU ---------------------------------------------------
    pad2_ref[...] = jnp.zeros(pad2_ref.shape, jnp.float32)
    pad2_ref[:, 1:1 + ho, 1:1 + wo, :] = h1.reshape(n, ho, wo, c1)
    out_ref[...] = _conv3x3_bn_relu(pad2_ref, w2_ref, g2_ref[...], be2_ref[...],
                                    n=n, ho=ho, wo=wo, cin=c1, cout=c1)


def _encoder_block_pallas(x_nhwc, params, *, emit_inter):
    N, H, W, Cin = x_nhwc.shape
    Ho, Wo = H // 2, W // 2
    C1 = params["w1"].shape[-1]
    M = N * Ho * Wo

    # Zero-copy re-view: (N, H, W, Cin) -> (N*Ho, 2, Wo, 2*Cin) so the kernel can split
    # the 2x2 pooling window with static slices; no strided XLA copies of the input.
    xr = x_nhwc.reshape(N * Ho, 2, Wo, 2 * Cin)
    # (3,3,Cin,Cout) -> (9*Cin, Cout): row t*Cin+ci holds tap t=(dy*3+dx), input chan ci.
    w1 = params["w1"].reshape(9 * Cin, C1)
    w2 = params["w2"].reshape(9 * C1, C1)
    g1, be1 = params["g1"].reshape(1, C1), params["be1"].reshape(1, C1)
    g2, be2 = params["g2"].reshape(1, C1), params["be2"].reshape(1, C1)

    out_shape = [jax.ShapeDtypeStruct((M, C1), jnp.float32),          # conv2 output
                 jax.ShapeDtypeStruct((N * Ho, Wo, Cin), jnp.int32)]  # pool indices
    if emit_inter:
        out_shape += [jax.ShapeDtypeStruct((N * Ho, Wo, Cin), jnp.float32),  # pooled
                      jax.ShapeDtypeStruct((M, C1), jnp.float32)]            # conv1 act

    kernel = functools.partial(_encoder_kernel, n=N, ho=Ho, wo=Wo,
                               cin=Cin, c1=C1, emit_inter=emit_inter)
    results = pl.pallas_call(
        kernel,
        out_shape=tuple(out_shape),
        in_specs=[_VMEM] * 7,
        out_specs=tuple([_VMEM] * len(out_shape)),
        scratch_shapes=[
            pltpu.VMEM((N, Ho + 2, Wo + 2, Cin), jnp.float32),   # zero-padded pooled
            pltpu.VMEM((N, Ho + 2, Wo + 2, C1), jnp.float32),    # zero-padded conv1 act
        ],
    )(xr, w1, g1, be1, w2, g2, be2)

    out = results[0].reshape(N, Ho, Wo, C1)
    idx = results[1].reshape(N, Ho, Wo, Cin)
    if emit_inter:
        pooled = results[2].reshape(N, Ho, Wo, Cin)
        h1 = results[3].reshape(N, Ho, Wo, C1)
        return out, idx, pooled, h1
    return out, idx


# ---------------------------------------------------------------------------
# EncoderBlock(filter, filter_next)  (default: additional_conv_layer=False,
# down_sampling=MaxPool2d(2, 2, return_indices=True))
# ---------------------------------------------------------------------------
def init_encoder_block_params(key, filt, filt_next):
    k1, k2 = jax.random.split(key)

    def conv_init(k, cin, cout):
        kw, kb = jax.random.split(k)
        bound = 1.0 / jnp.sqrt(jnp.float32(cin * 9))
        # (3, 3, Cin, Cout) == PyTorch weight (Cout, Cin, 3, 3).transpose(2, 3, 1, 0)
        w = jax.random.uniform(kw, (3, 3, cin, cout), jnp.float32, -bound, bound)
        b = jax.random.uniform(kb, (cout,), jnp.float32, -bound, bound)
        return w, b

    w1, b1 = conv_init(k1, filt, filt_next)
    w2, b2 = conv_init(k2, filt_next, filt_next)
    return {
        # b1/b2 kept for parameter parity; they cancel exactly under BatchNorm's mean
        # subtraction, so the kernel does not consume them.
        "w1": w1, "b1": b1,
        "g1": jnp.ones((filt_next,), jnp.float32), "be1": jnp.zeros((filt_next,), jnp.float32),
        "w2": w2, "b2": b2,
        "g2": jnp.ones((filt_next,), jnp.float32), "be2": jnp.zeros((filt_next,), jnp.float32),
    }
    # TODO(synk): BN running-stat buffer updates (momentum=0.1) are stateful and do not
    # affect the forward output; not emitted.


def _to_nchw(t):
    return jnp.transpose(t, (0, 3, 1, 2))


def encoder_block_forward(x_nchw, params, index_intermediate=None):
    """Matches EncoderBlock.forward for the default config (pool + 2 conv blocks)."""
    x = jnp.transpose(x_nchw, (0, 2, 3, 1)).astype(jnp.float32)      # NCHW -> NHWC

    if index_intermediate is None:
        out, idx = _encoder_block_pallas(x, params, emit_inter=False)
        # TODO(synk): PyTorch pool indices are int64; int32 emitted here (JAX x64 off).
        return _to_nchw(out), _to_nchw(idx)

    out, idx, pooled, h1 = _encoder_block_pallas(x, params, emit_inter=True)
    # layers == [pool, conv1, conv2]; layers[1:k+1] applied to the pooled tensor:
    #   k<=0 -> pooled, k==1 -> conv1 output, k>=2 -> conv2 output (== final out).
    k = int(index_intermediate)
    inter = pooled if k <= 0 else (h1 if k == 1 else out)
    return (_to_nchw(out), _to_nchw(idx)), _to_nchw(inter)


if __name__ == "__main__":
    key = jax.random.PRNGKey(0)
    kx, kp = jax.random.split(key)

    N, filt, H, W = 2, 8, 16, 16            # NCHW input, like PyTorch
    filt_next = 16

    x = jax.random.normal(kx, (N, filt, H, W), jnp.float32)
    params = init_encoder_block_params(kp, filt, filt_next)

    fwd = jax.jit(lambda xx: encoder_block_forward(xx, params))
    out, pool_idx = fwd(x)
    jax.block_until_ready((out, pool_idx))

    assert out.shape == (N, filt_next, H // 2, W // 2)
    assert out.dtype == jnp.float32
    assert pool_idx.shape == (N, filt, H // 2, W // 2)
    assert bool(jnp.all(out >= 0.0))
    assert bool(jnp.all((pool_idx >= 0) & (pool_idx < H * W)))

    # Pure-JAX reference for the forward values (maxpool + conv/BN(batch stats)/ReLU x2).
    def ref_forward(x_nchw):
        xf = x_nchw.astype(jnp.float32)
        pooled = lax.reduce_window(xf, -jnp.inf, lax.max, (1, 1, 2, 2), (1, 1, 2, 2), "VALID")

        def conv_bn_relu(t, w, g, b_):
            y = lax.conv_general_dilated(t, w, (1, 1), ((1, 1), (1, 1)),
                                         dimension_numbers=("NCHW", "HWIO", "NCHW"))
            mean = jnp.mean(y, axis=(0, 2, 3), keepdims=True)
            var = jnp.mean((y - mean) ** 2, axis=(0, 2, 3), keepdims=True)
            yn = (y - mean) * lax.rsqrt(var + _BN_EPS)
            return jnp.maximum(yn * g.reshape(1, -1, 1, 1) + b_.reshape(1, -1, 1, 1), 0.0)

        h = conv_bn_relu(pooled, params["w1"], params["g1"], params["be1"])
        return conv_bn_relu(h, params["w2"], params["g2"], params["be2"])

    ref = ref_forward(x)
    assert bool(jnp.allclose(out, ref, atol=1e-4, rtol=1e-4))

    # Also exercise the intermediate-output path (index_intermediate=1).
    fwd_i = jax.jit(lambda xx: encoder_block_forward(xx, params, index_intermediate=1))
    (out_i, idx_i), inter = fwd_i(x)
    jax.block_until_ready((out_i, idx_i, inter))
    assert inter.shape == (N, filt_next, H // 2, W // 2)
    assert bool(jnp.allclose(out_i, out, atol=1e-4, rtol=1e-4))

    print("KERNEL_OK")
</pallas_src>

<mosaic_0001>
module attributes {stable_mosaic.version = 11 : i64} {
  func.func @_encoder_kernel(%arg0: memref<16x2x8x16xf32, #tpu.memory_space<vmem>>, %arg1: memref<72x16xf32, #tpu.memory_space<vmem>>, %arg2: memref<1x16xf32, #tpu.memory_space<vmem>>, %arg3: memref<1x16xf32, #tpu.memory_space<vmem>>, %arg4: memref<144x16xf32, #tpu.memory_space<vmem>>, %arg5: memref<1x16xf32, #tpu.memory_space<vmem>>, %arg6: memref<1x16xf32, #tpu.memory_space<vmem>>, %arg7: memref<128x16xf32, #tpu.memory_space<vmem>>, %arg8: memref<16x8x8xi32, #tpu.memory_space<vmem>>, %arg9: memref<2x10x10x8xf32, #tpu.memory_space<vmem>>, %arg10: memref<2x10x10x16xf32, #tpu.memory_space<vmem>>) attributes {dimension_semantics = [], scalar_prefetch = 0 : i64, scratch_operands = 2 : i64, tpu.core_type = #tpu.core_type<tc>} {
    %c0 = arith.constant 0 : index
    %c0_0 = arith.constant 0 : index
    %c0_1 = arith.constant 0 : index
    %c0_2 = arith.constant 0 : index
    %0 = vector.load %arg0[%c0, %c0_0, %c0_1, %c0_2] : memref<16x2x8x16xf32, #tpu.memory_space<vmem>>, vector<16x2x8x16xf32>
    %1 = vector.extract_strided_slice %0 {offsets = [0, 0, 0, 0], sizes = [16, 1, 8, 16], strides = [1, 1, 1, 1]} : vector<16x2x8x16xf32> to vector<16x1x8x16xf32>
    %2 = vector.shape_cast %1 : vector<16x1x8x16xf32> to vector<16x8x16xf32>
    %3 = vector.extract_strided_slice %0 {offsets = [0, 1, 0, 0], sizes = [16, 1, 8, 16], strides = [1, 1, 1, 1]} : vector<16x2x8x16xf32> to vector<16x1x8x16xf32>
    %4 = vector.shape_cast %3 : vector<16x1x8x16xf32> to vector<16x8x16xf32>
    %5 = vector.extract_strided_slice %2 {offsets = [0, 0, 0], sizes = [16, 8, 8], strides = [1, 1, 1]} : vector<16x8x16xf32> to vector<16x8x8xf32>
    %6 = vector.extract_strided_slice %2 {offsets = [0, 0, 8], sizes = [16, 8, 8], strides = [1, 1, 1]} : vector<16x8x16xf32> to vector<16x8x8xf32>
    %7 = vector.extract_strided_slice %4 {offsets = [0, 0, 0], sizes = [16, 8, 8], strides = [1, 1, 1]} : vector<16x8x16xf32> to vector<16x8x8xf32>
    %8 = vector.extract_strided_slice %4 {offsets = [0, 0, 8], sizes = [16, 8, 8], strides = [1, 1, 1]} : vector<16x8x16xf32> to vector<16x8x8xf32>
    %9 = tpu.iota {dimensions = array<i32: 1>} : vector<2x8x8x8xi32>
    %10 = tpu.iota {dimensions = array<i32: 2>} : vector<2x8x8x8xi32>
    %c2_i32 = arith.constant 2 : i32
    %11 = vector.broadcast %c2_i32 : i32 to vector<2x8x8x8xi32>
    %12 = arith.muli %11, %9 : vector<2x8x8x8xi32>
    %c16_i32 = arith.constant 16 : i32
    %13 = vector.broadcast %c16_i32 : i32 to vector<2x8x8x8xi32>
    %14 = arith.muli %12, %13 : vector<2x8x8x8xi32>
    %c2_i32_3 = arith.constant 2 : i32
    %15 = vector.broadcast %c2_i32_3 : i32 to vector<2x8x8x8xi32>
    %16 = arith.muli %15, %10 : vector<2x8x8x8xi32>
    %17 = arith.addi %14, %16 : vector<2x8x8x8xi32>
    %18 = vector.shape_cast %17 : vector<2x8x8x8xi32> to vector<16x8x8xi32>
    %19 = arith.cmpf ogt, %6, %5 : vector<16x8x8xf32>
    %20 = arith.select %19, %6, %5 : vector<16x8x8xi1>, vector<16x8x8xf32>
    %c1_i32 = arith.constant 1 : i32
    %21 = vector.broadcast %c1_i32 : i32 to vector<16x8x8xi32>
    %22 = arith.addi %18, %21 : vector<16x8x8xi32>
    %23 = arith.select %19, %22, %18 : vector<16x8x8xi1>, vector<16x8x8xi32>
    %24 = arith.cmpf ogt, %7, %20 : vector<16x8x8xf32>
    %25 = arith.select %24, %7, %20 : vector<16x8x8xi1>, vector<16x8x8xf32>
    %c16_i32_4 = arith.constant 16 : i32
    %26 = vector.broadcast %c16_i32_4 : i32 to vector<16x8x8xi32>
    %27 = arith.addi %18, %26 : vector<16x8x8xi32>
    %28 = arith.select %24, %27, %23 : vector<16x8x8xi1>, vector<16x8x8xi32>
    %29 = arith.cmpf ogt, %8, %25 : vector<16x8x8xf32>
    %30 = arith.select %29, %8, %25 : vector<16x8x8xi1>, vector<16x8x8xf32>
    %c17_i32 = arith.constant 17 : i32
    %31 = vector.broadcast %c17_i32 : i32 to vector<16x8x8xi32>
    %32 = arith.addi %18, %31 : vector<16x8x8xi32>
    %33 = arith.select %29, %32, %28 : vector<16x8x8xi1>, vector<16x8x8xi32>
    %c0_5 = arith.constant 0 : index
    %c0_6 = arith.constant 0 : index
    %c0_7 = arith.constant 0 : index
    %34 = vector.load %arg8[%c0_5, %c0_6, %c0_7] : memref<16x8x8xi32, #tpu.memory_space<vmem>>, vector<16x8x8xi32>
    tpu.vector_store %arg8[%c0_5, %c0_6, %c0_7], %33 {strides = array<i32>} : memref<16x8x8xi32, #tpu.memory_space<vmem>>, vector<16x8x8xi32>,
    %cst = arith.constant 0.000000e+00 : f32
    %35 = vector.broadcast %cst : f32 to vector<2x10x10x8xf32>
    %c0_8 = arith.constant 0 : index
    %c0_9 = arith.constant 0 : index
    %c0_10 = arith.constant 0 : index
    %c0_11 = arith.constant 0 : index
    %36 = vector.load %arg9[%c0_8, %c0_9, %c0_10, %c0_11] : memref<2x10x10x8xf32, #tpu.memory_space<vmem>>, vector<2x10x10x8xf32>
    tpu.vector_store %arg9[%c0_8, %c0_9, %c0_10, %c0_11], %35 {strides = array<i32>} : memref<2x10x10x8xf32, #tpu.memory_space<vmem>>, vector<2x10x10x8xf32>,
    %37 = vector.shape_cast %30 : vector<16x8x8xf32> to vector<2x8x8x8xf32>
    %c0_12 = arith.constant 0 : index
    %c1 = arith.constant 1 : index
    %c1_13 = arith.constant 1 : index
    %c0_14 = arith.constant 0 : index
    %38 = vector.load %arg9[%c0_12, %c1, %c1_13, %c0_14] : memref<2x10x10x8xf32, #tpu.memory_space<vmem>>, vector<2x8x8x8xf32>
    tpu.vector_store %arg9[%c0_12, %c1, %c1_13, %c0_14], %37 {strides = array<i32>} : memref<2x10x10x8xf32, #tpu.memory_space<vmem>>, vector<2x8x8x8xf32>,
    %c0_15 = arith.constant 0 : index
    %c0_16 = arith.constant 0 : index
    %39 = vector.load %arg2[%c0_15, %c0_16] : memref<1x16xf32, #tpu.memory_space<vmem>>, vector<1x16xf32>
    %c0_17 = arith.constant 0 : index
    %c0_18 = arith.constant 0 : index
    %40 = vector.load %arg3[%c0_17, %c0_18] : memref<1x16xf32, #tpu.memory_space<vmem>>, vector<1x16xf32>
    %c0_19 = arith.constant 0 : index
    %c0_20 = arith.constant 0 : index
    %c0_21 = arith.constant 0 : index
    %c0_22 = arith.constant 0 : index
    %41 = vector.load %arg9[%c0_19, %c0_20, %c0_21, %c0_22] : memref<2x10x10x8xf32, #tpu.memory_space<vmem>>, vector<2x8x8x8xf32>
    %42 = vector.shape_cast %41 : vector<2x8x8x8xf32> to vector<128x8xf32>
    %c0_23 = arith.constant 0 : index
    %c0_24 = arith.constant 0 : index
    %c1_25 = arith.constant 1 : index
    %c0_26 = arith.constant 0 : index
    %43 = vector.load %arg9[%c0_23, %c0_24, %c1_25, %c0_26] : memref<2x10x10x8xf32, #tpu.memory_space<vmem>>, vector<2x8x8x8xf32>
    %44 = vector.shape_cast %43 : vector<2x8x8x8xf32> to vector<128x8xf32>
    %c0_27 = arith.constant 0 : index
    %c0_28 = arith.constant 0 : index
    %c2 = arith.constant 2 : index
    %c0_29 = arith.constant 0 : index
    %45 = vector.load %arg9[%c0_27, %c0_28, %c2, %c0_29] : memref<2x10x10x8xf32, #tpu.memory_space<vmem>>, vector<2x8x8x8xf32>
    %46 = vector.shape_cast %45 : vector<2x8x8x8xf32> to vector<128x8xf32>
    %c0_30 = arith.constant 0 : index
    %c1_31 = arith.constant 1 : index
    %c0_32 = arith.constant 0 : index
    %c0_33 = arith.constant 0 : index
    %47 = vector.load %arg9[%c0_30, %c1_31, %c0_32, %c0_33] : memref<2x10x10x8xf32, #tpu.memory_space<vmem>>, vector<2x8x8x8xf32>
    %48 = vector.shape_cast %47 : vector<2x8x8x8xf32> to vector<128x8xf32>
    %c0_34 = arith.constant 0 : index
    %c1_35 = arith.constant 1 : index
    %c1_36 = arith.constant 1 : index
    %c0_37 = arith.constant 0 : index
    %49 = vector.load %arg9[%c0_34, %c1_35, %c1_36, %c0_37] : memref<2x10x10x8xf32, #tpu.memory_space<vmem>>, vector<2x8x8x8xf32>
    %50 = vector.shape_cast %49 : vector<2x8x8x8xf32> to vector<128x8xf32>
    %c0_38 = arith.constant 0 : index
    %c1_39 = arith.constant 1 : index
    %c2_40 = arith.constant 2 : index
    %c0_41 = arith.constant 0 : index
    %51 = vector.load %arg9[%c0_38, %c1_39, %c2_40, %c0_41] : memref<2x10x10x8xf32, #tpu.memory_space<vmem>>, vector<2x8x8x8xf32>
    %52 = vector.shape_cast %51 : vector<2x8x8x8xf32> to vector<128x8xf32>
    %c0_42 = arith.constant 0 : index
    %c2_43 = arith.constant 2 : index
    %c0_44 = arith.constant 0 : index
    %c0_45 = arith.constant 0 : index
    %53 = vector.load %arg9[%c0_42, %c2_43, %c0_44, %c0_45] : memref<2x10x10x8xf32, #tpu.memory_space<vmem>>, vector<2x8x8x8xf32>
    %54 = vector.shape_cast %53 : vector<2x8x8x8xf32> to vector<128x8xf32>
    %c0_46 = arith.constant 0 : index
    %c2_47 = arith.constant 2 : index
    %c1_48 = arith.constant 1 : index
    %c0_49 = arith.constant 0 : index
    %55 = vector.load %arg9[%c0_46, %c2_47, %c1_48, %c0_49] : memref<2x10x10x8xf32, #tpu.memory_space<vmem>>, vector<2x8x8x8xf32>
    %56 = vector.shape_cast %55 : vector<2x8x8x8xf32> to vector<128x8xf32>
    %c0_50 = arith.constant 0 : index
    %c2_51 = arith.constant 2 : index
    %c2_52 = arith.constant 2 : index
    %c0_53 = arith.constant 0 : index
    %57 = vector.load %arg9[%c0_50, %c2_51, %c2_52, %c0_53] : memref<2x10x10x8xf32, #tpu.memory_space<vmem>>, vector<2x8x8x8xf32>
    %58 = vector.shape_cast %57 : vector<2x8x8x8xf32> to vector<128x8xf32>
    %59 = tpu.concatenate %42, %44, %46, %48, %50, %52, %54, %56, %58 in 1 : vector<128x8xf32>, vector<128x8xf32>, vector<128x8xf32>, vector<128x8xf32>, vector<128x8xf32>, vector<128x8xf32>, vector<128x8xf32>, vector<128x8xf32>, vector<128x8xf32> -> vector<128x72xf32>
    %c0_54 = arith.constant 0 : index
    %c0_55 = arith.constant 0 : index
    %60 = vector.load %arg1[%c0_54, %c0_55] : memref<72x16xf32, #tpu.memory_space<vmem>>, vector<72x16xf32>
    %cst_56 = arith.constant dense<0.000000e+00> : vector<128x16xf32>
    %61 = tpu.matmul %59, %60, %cst_56 {dimension_numbers = #tpu.dot_dimension_numbers<[1], [0], [0], [1], [0, 0, 1, 1], [], []>} : vector<128x72xf32>, vector<72x16xf32>, vector<128x16xf32> -> vector<128x16xf32>
    %cst_57 = arith.constant dense<0.000000e+00> : vector<16xf32>
    %62 = vector.multi_reduction <add>, %61, %cst_57 [0] : vector<128x16xf32> to vector<16xf32>
    %63 = vector.shape_cast %62 : vector<16xf32> to vector<1x16xf32>
    %cst_58 = arith.constant 1.280000e+02 : f32
    %64 = vector.broadcast %cst_58 : f32 to vector<1x16xf32>
    %65 = arith.divf %63, %64 : vector<1x16xf32>
    %66 = vector.broadcast %65 : vector<1x16xf32> to vector<128x16xf32>
    %67 = arith.subf %61, %66 : vector<128x16xf32>
    %68 = arith.mulf %67, %67 : vector<128x16xf32>
    %cst_59 = arith.constant dense<0.000000e+00> : vector<16xf32>
    %69 = vector.multi_reduction <add>, %68, %cst_59 [0] : vector<128x16xf32> to vector<16xf32>
    %70 = vector.shape_cast %69 : vector<16xf32> to vector<1x16xf32>
    %cst_60 = arith.constant 1.280000e+02 : f32
    %71 = vector.broadcast %cst_60 : f32 to vector<1x16xf32>
    %72 = arith.divf %70, %71 : vector<1x16xf32>
    %cst_61 = arith.constant 9.99999974E-6 : f32
    %73 = vector.broadcast %cst_61 : f32 to vector<1x16xf32>
    %74 = arith.addf %72, %73 : vector<1x16xf32>
    %75 = math.rsqrt %74 : vector<1x16xf32>
    %76 = arith.mulf %39, %75 : vector<1x16xf32>
    %77 = vector.broadcast %76 : vector<1x16xf32> to vector<128x16xf32>
    %78 = arith.mulf %67, %77 : vector<128x16xf32>
    %79 = vector.broadcast %40 : vector<1x16xf32> to vector<128x16xf32>
    %80 = arith.addf %78, %79 : vector<128x16xf32>
    %cst_62 = arith.constant 0.000000e+00 : f32
    %81 = vector.broadcast %cst_62 : f32 to vector<128x16xf32>
    %82 = arith.maximumf %80, %81 : vector<128x16xf32>
    %cst_63 = arith.constant 0.000000e+00 : f32
    %83 = vector.broadcast %cst_63 : f32 to vector<2x10x10x16xf32>
    %c0_64 = arith.constant 0 : index
    %c0_65 = arith.constant 0 : index
    %c0_66 = arith.constant 0 : index
    %c0_67 = arith.constant 0 : index
    %84 = vector.load %arg10[%c0_64, %c0_65, %c0_66, %c0_67] : memref<2x10x10x16xf32, #tpu.memory_space<vmem>>, vector<2x10x10x16xf32>
    tpu.vector_store %arg10[%c0_64, %c0_65, %c0_66, %c0_67], %83 {strides = array<i32>} : memref<2x10x10x16xf32, #tpu.memory_space<vmem>>, vector<2x10x10x16xf32>,
    %85 = vector.shape_cast %82 : vector<128x16xf32> to vector<2x8x8x16xf32>
    %c0_68 = arith.constant 0 : index
    %c1_69 = arith.constant 1 : index
    %c1_70 = arith.constant 1 : index
    %c0_71 = arith.constant 0 : index
    %86 = vector.load %arg10[%c0_68, %c1_69, %c1_70, %c0_71] : memref<2x10x10x16xf32, #tpu.memory_space<vmem>>, vector<2x8x8x16xf32>
    tpu.vector_store %arg10[%c0_68, %c1_69, %c1_70, %c0_71], %85 {strides = array<i32>} : memref<2x10x10x16xf32, #tpu.memory_space<vmem>>, vector<2x8x8x16xf32>,
    %c0_72 = arith.constant 0 : index
    %c0_73 = arith.constant 0 : index
    %87 = vector.load %arg5[%c0_72, %c0_73] : memref<1x16xf32, #tpu.memory_space<vmem>>, vector<1x16xf32>
    %c0_74 = arith.constant 0 : index
    %c0_75 = arith.constant 0 : index
    %88 = vector.load %arg6[%c0_74, %c0_75] : memref<1x16xf32, #tpu.memory_space<vmem>>, vector<1x16xf32>
    %c0_76 = arith.constant 0 : index
    %c0_77 = arith.constant 0 : index
    %c0_78 = arith.constant 0 : index
    %c0_79 = arith.constant 0 : index
    %89 = vector.load %arg10[%c0_76, %c0_77, %c0_78, %c0_79] : memref<2x10x10x16xf32, #tpu.memory_space<vmem>>, vector<2x8x8x16xf32>
    %90 = vector.shape_cast %89 : vector<2x8x8x16xf32> to vector<128x16xf32>
    %c0_80 = arith.constant 0 : index
    %c0_81 = arith.constant 0 : index
    %c1_82 = arith.constant 1 : index
    %c0_83 = arith.constant 0 : index
    %91 = vector.load %arg10[%c0_80, %c0_81, %c1_82, %c0_83] : memref<2x10x10x16xf32, #tpu.memory_space<vmem>>, vector<2x8x8x16xf32>
    %92 = vector.shape_cast %91 : vector<2x8x8x16xf32> to vector<128x16xf32>
    %c0_84 = arith.constant 0 : index
    %c0_85 = arith.constant 0 : index
    %c2_86 = arith.constant 2 : index
    %c0_87 = arith.constant 0 : index
    %93 = vector.load %arg10[%c0_84, %c0_85, %c2_86, %c0_87] : memref<2x10x10x16xf32, #tpu.memory_space<vmem>>, vector<2x8x8x16xf32>
    %94 = vector.shape_cast %93 : vector<2x8x8x16xf32> to vector<128x16xf32>
    %c0_88 = arith.constant 0 : index
    %c1_89 = arith.constant 1 : index
    %c0_90 = arith.constant 0 : index
    %c0_91 = arith.constant 0 : index
    %95 = vector.load %arg10[%c0_88, %c1_89, %c0_90, %c0_91] : memref<2x10x10x16xf32, #tpu.memory_space<vmem>>, vector<2x8x8x16xf32>
    %96 = vector.shape_cast %95 : vector<2x8x8x16xf32> to vector<128x16xf32>
    %c0_92 = arith.constant 0 : index
    %c1_93 = arith.constant 1 : index
    %c1_94 = arith.constant 1 : index
    %c0_95 = arith.constant 0 : index
    %97 = vector.load %arg10[%c0_92, %c1_93, %c1_94, %c0_95] : memref<2x10x10x16xf32, #tpu.memory_space<vmem>>, vector<2x8x8x16xf32>
    %98 = vector.shape_cast %97 : vector<2x8x8x16xf32> to vector<128x16xf32>
    %c0_96 = arith.constant 0 : index
    %c1_97 = arith.constant 1 : index
    %c2_98 = arith.constant 2 : index
    %c0_99 = arith.constant 0 : index
    %99 = vector.load %arg10[%c0_96, %c1_97, %c2_98, %c0_99] : memref<2x10x10x16xf32, #tpu.memory_space<vmem>>, vector<2x8x8x16xf32>
    %100 = vector.shape_cast %99 : vector<2x8x8x16xf32> to vector<128x16xf32>
    %c0_100 = arith.constant 0 : index
    %c2_101 = arith.constant 2 : index
    %c0_102 = arith.constant 0 : index
    %c0_103 = arith.constant 0 : index
    %101 = vector.load %arg10[%c0_100, %c2_101, %c0_102, %c0_103] : memref<2x10x10x16xf32, #tpu.memory_space<vmem>>, vector<2x8x8x16xf32>
    %102 = vector.shape_cast %101 : vector<2x8x8x16xf32> to vector<128x16xf32>
    %c0_104 = arith.constant 0 : index
    %c2_105 = arith.constant 2 : index
    %c1_106 = arith.constant 1 : index
    %c0_107 = arith.constant 0 : index
    %103 = vector.load %arg10[%c0_104, %c2_105, %c1_106, %c0_107] : memref<2x10x10x16xf32, #tpu.memory_space<vmem>>, vector<2x8x8x16xf32>
    %104 = vector.shape_cast %103 : vector<2x8x8x16xf32> to vector<128x16xf32>
    %c0_108 = arith.constant 0 : index
    %c2_109 = arith.constant 2 : index
    %c2_110 = arith.constant 2 : index
    %c0_111 = arith.constant 0 : index
    %105 = vector.load %arg10[%c0_108, %c2_109, %c2_110, %c0_111] : memref<2x10x10x16xf32, #tpu.memory_space<vmem>>, vector<2x8x8x16xf32>
    %106 = vector.shape_cast %105 : vector<2x8x8x16xf32> to vector<128x16xf32>
    %107 = tpu.concatenate %90, %92, %94, %96, %98, %100, %102, %104, %106 in 1 : vector<128x16xf32>, vector<128x16xf32>, vector<128x16xf32>, vector<128x16xf32>, vector<128x16xf32>, vector<128x16xf32>, vector<128x16xf32>, vector<128x16xf32>, vector<128x16xf32> -> vector<128x144xf32>
    %c0_112 = arith.constant 0 : index
    %c0_113 = arith.constant 0 : index
    %108 = vector.load %arg4[%c0_112, %c0_113] : memref<144x16xf32, #tpu.memory_space<vmem>>, vector<144x16xf32>
    %cst_114 = arith.constant dense<0.000000e+00> : vector<128x16xf32>
    %109 = tpu.matmul %107, %108, %cst_114 {dimension_numbers = #tpu.dot_dimension_numbers<[1], [0], [0], [1], [0, 0, 1, 1], [], []>} : vector<128x144xf32>, vector<144x16xf32>, vector<128x16xf32> -> vector<128x16xf32>
    %cst_115 = arith.constant dense<0.000000e+00> : vector<16xf32>
    %110 = vector.multi_reduction <add>, %109, %cst_115 [0] : vector<128x16xf32> to vector<16xf32>
    %111 = vector.shape_cast %110 : vector<16xf32> to vector<1x16xf32>
    %cst_116 = arith.constant 1.280000e+02 : f32
    %112 = vector.broadcast %cst_116 : f32 to vector<1x16xf32>
    %113 = arith.divf %111, %112 : vector<1x16xf32>
    %114 = vector.broadcast %113 : vector<1x16xf32> to vector<128x16xf32>
    %115 = arith.subf %109, %114 : vector<128x16xf32>
    %116 = arith.mulf %115, %115 : vector<128x16xf32>
    %cst_117 = arith.constant dense<0.000000e+00> : vector<16xf32>
    %117 = vector.multi_reduction <add>, %116, %cst_117 [0] : vector<128x16xf32> to vector<16xf32>
    %118 = vector.shape_cast %117 : vector<16xf32> to vector<1x16xf32>
    %cst_118 = arith.constant 1.280000e+02 : f32
    %119 = vector.broadcast %cst_118 : f32 to vector<1x16xf32>
    %120 = arith.divf %118, %119 : vector<1x16xf32>
    %cst_119 = arith.constant 9.99999974E-6 : f32
    %121 = vector.broadcast %cst_119 : f32 to vector<1x16xf32>
    %122 = arith.addf %120, %121 : vector<1x16xf32>
    %123 = math.rsqrt %122 : vector<1x16xf32>
    %124 = arith.mulf %87, %123 : vector<1x16xf32>
    %125 = vector.broadcast %124 : vector<1x16xf32> to vector<128x16xf32>
    %126 = arith.mulf %115, %125 : vector<128x16xf32>
    %127 = vector.broadcast %88 : vector<1x16xf32> to vector<128x16xf32>
    %128 = arith.addf %126, %127 : vector<128x16xf32>
    %cst_120 = arith.constant 0.000000e+00 : f32
    %129 = vector.broadcast %cst_120 : f32 to vector<128x16xf32>
    %130 = arith.maximumf %128, %129 : vector<128x16xf32>
    %c0_121 = arith.constant 0 : index
    %c0_122 = arith.constant 0 : index
    %131 = vector.load %arg7[%c0_121, %c0_122] : memref<128x16xf32, #tpu.memory_space<vmem>>, vector<128x16xf32>
    tpu.vector_store %arg7[%c0_121, %c0_122], %130 {strides = array<i32>} : memref<128x16xf32, #tpu.memory_space<vmem>>, vector<128x16xf32>,
    return
  }
}

</mosaic_0001>

<bundles_post_ra>
// kernel: _lambda_.1
= control target key start
LH: loop header
LB: loop body
LE: loop exit
PB: predicated region body
PF: predicated region fallthrough
CT: control target
= control target key end

     0   :  { %s3314_s9 = smov 8   ;;  %s5654_s0 = inlined_call_operand.vmem [shape: f32[16,2,8,16], index: 0, kind: input, shape index: {}]   ;;  %s5655_s1 = inlined_call_operand.vmem [shape: f32[72,16], index: 1, kind: input, shape index: {}]   ;;  %s5656_s2 = inlined_call_operand.vmem [shape: f32[1,16], index: 2, kind: input, shape index: {}, may-alias: {2,5}]   ;;  %s5657_s3 = inlined_call_operand.vmem [shape: f32[1,16], index: 3, kind: input, shape index: {}, may-alias: {3,6}]   ;;  %s5658_s4 = inlined_call_operand.vmem [shape: f32[144,16], index: 4, kind: input, shape index: {}]   ;;  %s5659_s5 = inlined_call_operand.vmem [shape: f32[1,16], index: 5, kind: input, shape index: {}, may-alias: {2,5}]   ;;  %s5660_s6 = inlined_call_operand.vmem [shape: f32[1,16], index: 6, kind: input, shape index: {}, may-alias: {3,6}]   ;;  %s5661_s7 = inlined_call_operand.hbm [shape: f32[128,16], index: 7, kind: output, shape index: {0}]   ;;  %s5662_s8 = inlined_call_operand.vmem [shape: s32[16,8,8], index: 8, kind: output, shape index: {1}]  }
   0x1   :  { %v3378_v0 = vld [vmem:[%s5654_s0 + $0x20] sm:$0xff] }
   0x2   :  { %v3383_v1 = vld [vmem:[%s5654_s0] sm:$0xff]  ;;  %91 = vrot.lane.b32.xlu1 %v3378_v0, %s3314_s9 }
   0x3   :  { %87 = vrot.lane.b32.xlu0 %v3383_v1, %s3314_s9  ;;  %v3392_v2 = vld [vmem:[%s5654_s0 + $0x40] sm:$0xff] }
   0x4   :  { %95 = vrot.lane.b32.xlu2 %v3392_v2, %s3314_s9 }
   0x5   :  { %14 = vsyncpa [#allocation5], 0  ;;  %v3399_v3 = vld [vmem:[%s5654_s0 + $0x30] sm:$0xff]  ;;  %v3420_v6 = vld [vmem:[%s5654_s0 + $0x60] sm:$0xff]  ;;  %s3315_s17 = smov 120   ;;  %v61_v36 = vlaneseq  ;;  %s3317_s18 = smov 16  }
   0x6   :  { %v3404_v4 = vld [vmem:[%s5654_s0 + $0x10] sm:$0xff]  ;;  %v3430_v8 = vld [vmem:[%s5654_s0 + $0x80] sm:$0xff]  ;;  %s3318_s19 = smov 56   ;;  %s3319_s20 = smov 64  }
   0x7   :  { %v3409_v5 = vld [vmem:[%s5654_s0 + $0x50] sm:$0xff]  ;;  %v3446_v10 = vld [vmem:[%s5654_s0 + $0xa0] sm:$0xff]  ;;  %v62_v41 = vshrl.u32 %v61_v36, 7  ;;  %s3320_s23 = smov 48   ;;  %s3321_s29 = smov 40  }
   0x8   :  { %v3425_v7 = vld [vmem:[%s5654_s0 + $0x70] sm:$0xff]  ;;  %v3462_v12 = vld [vmem:[%s5654_s0 + $0xc0] sm:$0xff]  ;;  %s3322_s30 = smov 32   ;;  %s3323_s10 = smov 24  }
   0x9   :  { %v3441_v9 = vld [vmem:[%s5654_s0 + $0x90] sm:$0xff]  ;;  %v3472_v14 = vld [vmem:[%s5654_s0 + $0xe0] sm:$0xff]  ;;  %v3607_v44 = vmul.u32 2, %v62_v41  ;;  %v3924_v41 = vld [vmem:[%s5654_s0 + $0x38] sm:$0xff]  ;;  %s3326_s24 = smov 96   ;;  %s3327_s25 = smov 112  }
   0xa   :  { %93 = vrot.lane.b32.xlu1 %v3399_v3, %s3314_s9  ;;  %v3451_v11 = vld [vmem:[%s5654_s0 + $0xb0] sm:$0xff] }
   0xb   :  { %89 = vrot.lane.b32.xlu0 %v3404_v4, %s3314_s9  ;;  %v3467_v13 = vld [vmem:[%s5654_s0 + $0xd0] sm:$0xff]  ;;  %v3622_v47 = vadd.s32 32, %v3607_v44  ;;  %v3653_v54 = vadd.s32 128, %v3607_v44  ;;  %v3656_v55 = vadd.s32 64, %v3607_v44  ;;  %v167_v58 = vadd.s32 1, %v3607_v44 }
   0xc   :  { %97 = vrot.lane.b32.xlu2 %v3409_v5, %s3314_s9  ;;  %v3483_v15 = vld [vmem:[%s5654_s0 + $0xf0] sm:$0xff]  ;;  %v3676_v61 = vadd.s32 96, %v3607_v44  ;;  %v3679_v62 = vadd.s32 160, %v3607_v44 }
   0xd   :  { %v3632_v49 = vadd.s32 1, %v3622_v47  ;;  %v3662_v56 = vadd.s32 1, %v3653_v54  ;;  %v169_v57 = vadd.s32 1, %v3656_v55 }
  0x12   :  { %101 = vrot.lane.b32.xlu1 %v3425_v7, %s3314_s9 }
  0x13   :  { %99 = vrot.lane.b32.xlu0 %v3420_v6, %s3314_s9 }
  0x14   :  { %103 = vrot.lane.b32.xlu2 %v3430_v8, %s3314_s9 }
  0x1a   :  { %107 = vrot.lane.b32.xlu1 %v3446_v10, %s3314_s9 }
  0x1b   :  { %105 = vrot.lane.b32.xlu0 %v3441_v9, %s3314_s9 }
  0x1c   :  { %109 = vrot.lane.b32.xlu2 %v3451_v11, %s3314_s9 }
  0x22   :  { %113 = vrot.lane.b32.xlu1 %v3467_v13, %s3314_s9 }
  0x23   :  { %111 = vrot.lane.b32.xlu0 %v3462_v12, %s3314_s9 }
  0x24   :  { %115 = vrot.lane.b32.xlu2 %v3472_v14, %s3314_s9 }
  0x2b   :  { %117 = vrot.lane.b32.xlu0 %v3483_v15, %s3314_s9 }
  0x5e   :  { %v3487_v16 = vpop.permute.xlu2 %95 }
  0x5f   :  { %vm139_vm6 = vcmp.gt.f32.partialorder %v3392_v2, %v3487_v16 }
  0x60   :  { %v155_v33 = vsel %vm139_vm6, %v3392_v2, %v3487_v16  ;;  %v179_v59 = vsel %vm139_vm6, %v3662_v56, %v3653_v54  ;;  %vm545_vm6 = vcmask 58368   ;;  %v3316_v2 = vmov 0.0  }
  0x61   :  { %546 = vst.msk [vmem:[#allocation2 + $0x8] sm:$0x3] %vm545_vm6, %v3316_v2 }
  0x62   :  { %548 = vst.msk [vmem:[#allocation2 + $0x18] sm:$0x3] %vm545_vm6, %v3316_v2 }
  0x63   :  { %550 = vst.msk [vmem:[#allocation2 + $0x28] sm:$0x3] %vm545_vm6, %v3316_v2 }
  0x64   :  { %552 = vst.msk [vmem:[#allocation2 + $0x38] sm:$0x3] %vm545_vm6, %v3316_v2 }
  0x65   :  { %554 = vst.msk [vmem:[#allocation2 + $0x48] sm:$0x3] %vm545_vm6, %v3316_v2 }
  0x66   :  { %v3489_v17 = vpop.permute.xlu2 %97  ;;  %556 = vst.msk [vmem:[#allocation2 + $0x58] sm:$0x3] %vm545_vm6, %v3316_v2 }
  0x67   :  { %vm140_vm2 = vcmp.gt.f32.partialorder %v3409_v5, %v3489_v17  ;;  %558 = vst.msk [vmem:[#allocation2 + $0x68] sm:$0x3] %vm545_vm6, %v3316_v2 }
  0x68   :  { %v156_v25 = vsel %vm140_vm2, %v3409_v5, %v3489_v17  ;;  %560 = vst.msk [vmem:[#allocation2 + $0x78] sm:$0x3] %vm545_vm6, %v3316_v2 }
  0x69   :  { %562 = vst.msk [vmem:[#allocation2 + $0x88] sm:$0x3] %vm545_vm6, %v3316_v2 }
  0x6a   :  { %564 = vst.msk [vmem:[#allocation2 + $0x98] sm:$0x3] %vm545_vm6, %v3316_v2 }
  0x6b   :  { %566 = vst.msk [vmem:[#allocation2 + $0xa8] sm:$0x3] %vm545_vm6, %v3316_v2 }
  0x6c   :  { %568 = vst.msk [vmem:[#allocation2 + $0xb8] sm:$0x3] %vm545_vm6, %v3316_v2 }
  0x6d   :  { %570 = vst.msk [vmem:[#allocation2 + $0xc8] sm:$0x3] %vm545_vm6, %v3316_v2 }
  0x6e   :  { %v3513_v22 = vpop.permute.xlu2 %103  ;;  %572 = vst.msk [vmem:[#allocation2 + $0xd8] sm:$0x3] %vm545_vm6, %v3316_v2 }
  0x6f   :  { %vm143_vm5 = vcmp.gt.f32.partialorder %v3430_v8, %v3513_v22  ;;  %574 = vst.msk [vmem:[#allocation2 + $0xe8] sm:$0x3] %vm545_vm6, %v3316_v2 }
  0x70   :  { %v159_v30 = vsel %vm143_vm5, %v3430_v8, %v3513_v22  ;;  %v183_v17 = vsel %vm143_vm5, %v167_v58, %v3607_v44  ;;  %576 = vst.msk [vmem:[#allocation2 + $0xf8] sm:$0x3] %vm545_vm6, %v3316_v2 }
  0x71   :  { %578 = vst.msk [vmem:[#allocation2 + $0x108] sm:$0x3] %vm545_vm6, %v3316_v2 }
  0x72   :  { %580 = vst.msk [vmem:[#allocation2 + $0x118] sm:$0x3] %vm545_vm6, %v3316_v2 }
  0x73   :  { %582 = vst.msk [vmem:[#allocation2 + $0x128] sm:$0x3] %vm545_vm6, %v3316_v2 }
  0x74   :  { %v3491_v18 = vpop.permute.xlu1 %91  ;;  %584 = vst.msk [vmem:[#allocation2 + $0x138] sm:$0x3] %vm545_vm6, %v3316_v2 }
  0x75   :  { %v3493_v19 = vpop.permute.xlu0 %87  ;;  %vm137_vm0 = vcmp.gt.f32.partialorder %v3378_v0, %v3491_v18 }
  0x76   :  { %vm135_vm1 = vcmp.gt.f32.partialorder %v3383_v1, %v3493_v19  ;;  %v153_v20 = vsel %vm137_vm0, %v3378_v0, %v3491_v18  ;;  %v3538_v28 = vpop.permute.xlu2 %109  ;;  %v177_v60 = vsel %vm137_vm0, %v169_v57, %v3656_v55  ;;  %v3689_v0 = vadd.s32 224, %v3607_v44 }
  0x77   :  { %v151_v21 = vsel %vm135_vm1, %v3383_v1, %v3493_v19  ;;  %211 = vrot.lane.b32.xlu0 %v153_v20, %s3315_s17  ;;  %vm146_vm8 = vcmp.gt.f32.partialorder %v3451_v11, %v3538_v28  ;;  %v175_v63 = vsel %vm135_vm1, %v167_v58, %v3607_v44  ;;  %v170_v1 = vadd.s32 1, %v3676_v61 }
  0x78   :  { %207 = vrot.lane.b32.xlu1 %v151_v21, %s3315_s17  ;;  %v162_v35 = vsel %vm146_vm8, %v3451_v11, %v3538_v28  ;;  %v3702_v16 = vadd.s32 1, %v3689_v0 }
  0x79   :  { %v186_v8 = vsel %vm146_vm8, %v170_v1, %v3676_v61 }
  0x7c   :  { %v3515_v23 = vpop.permute.xlu1 %93 }
  0x7d   :  { %v90_v24 = vpop.permute.xlu0 %89  ;;  %vm138_vm3 = vcmp.gt.f32.partialorder %v3399_v3, %v3515_v23 }
  0x7e   :  { %vm136_vm4 = vcmp.gt.f32.partialorder %v3404_v4, %v90_v24  ;;  %v154_v26 = vsel %vm138_vm3, %v3399_v3, %v3515_v23  ;;  %v3591_v40 = vpop.permute.xlu2 %115  ;;  %v178_v20 = vsel %vm138_vm3, %v170_v1, %v3676_v61  ;;  %v4004_v1 = vld [vmem:[%s5654_s0 + $0x98] sm:$0xff] }
  0x7f   :  { %v152_v27 = vsel %vm136_vm4, %v3404_v4, %v90_v24  ;;  %217 = vrot.lane.b32.xlu0 %v156_v25, %s3315_s17  ;;  %vm149_vm11 = vcmp.gt.f32.partialorder %v3472_v14, %v3591_v40  ;;  %v176_v52 = vsel %vm136_vm4, %v3632_v49, %v3622_v47  ;;  %vm527_vm4 = vcmask 64512  }
  0x80   :  { %213 = vrot.lane.b32.xlu1 %v154_v26, %s3315_s17  ;;  %209 = vrot.lane.b32.xlu2 %v152_v27, %s3315_s17  ;;  %v165_v43 = vsel %vm149_vm11, %v3472_v14, %v3591_v40  ;;  %544 = vst.msk [vmem:[#allocation2] sm:$0xff] %vm527_vm4, %v3316_v2  ;;  %v172_v4 = vadd.s32 1, %v3679_v62 }
  0x81   :  { %547 = vst.msk [vmem:[#allocation2 + $0x10] sm:$0xff] %vm527_vm4, %v3316_v2 }
  0x82   :  { %549 = vst.msk [vmem:[#allocation2 + $0x20] sm:$0xff] %vm527_vm4, %v3316_v2  ;;  %v180_v19 = vsel %vm140_vm2, %v172_v4, %v3679_v62 }
  0x83   :  { %551 = vst.msk [vmem:[#allocation2 + $0x30] sm:$0xff] %vm527_vm4, %v3316_v2 }
  0x84   :  { %v3549_v31 = vpop.permute.xlu1 %101  ;;  %553 = vst.msk [vmem:[#allocation2 + $0x40] sm:$0xff] %vm527_vm4, %v3316_v2 }
  0x85   :  { %v3542_v29 = vpop.permute.xlu0 %99  ;;  %vm142_vm9 = vcmp.gt.f32.partialorder %v3425_v7, %v3549_v31  ;;  %555 = vst.msk [vmem:[#allocation2 + $0x50] sm:$0xff] %vm527_vm4, %v3316_v2 }
  0x86   :  { %vm141_vm7 = vcmp.gt.f32.partialorder %v3420_v6, %v3542_v29  ;;  %v158_v37 = vsel %vm142_vm9, %v3425_v7, %v3549_v31  ;;  %v182_v18 = vsel %vm142_vm9, %v3702_v16, %v3689_v0  ;;  %v3726_v7 = vadd.s32 192, %v3607_v44  ;;  %557 = vst.msk [vmem:[#allocation2 + $0x60] sm:$0xff] %vm527_vm4, %v3316_v2 }
  0x87   :  { %v157_v32 = vsel %vm141_vm7, %v3420_v6, %v3542_v29  ;;  %223 = vrot.lane.b32.xlu0 %v159_v30, %s3315_s17  ;;  %559 = vst.msk [vmem:[#allocation2 + $0x70] sm:$0xff] %vm527_vm4, %v3316_v2  ;;  %v3868_v29 = vld [vmem:[%s5654_s0 + $0x48] sm:$0xff] }
  0x88   :  { %219 = vrot.lane.b32.xlu1 %v157_v32, %s3315_s17  ;;  %215 = vrot.lane.b32.xlu2 %v155_v33, %s3315_s17  ;;  %v173_v3 = vadd.s32 1, %v3726_v7  ;;  %561 = vst.msk [vmem:[#allocation2 + $0x80] sm:$0xff] %vm527_vm4, %v3316_v2  ;;  %v3884_v32 = vld [vmem:[%s5654_s0 + $0x8] sm:$0xff] }
  0x89   :  { %563 = vst.msk [vmem:[#allocation2 + $0x90] sm:$0xff] %vm527_vm4, %v3316_v2  ;;  %v3889_v33 = vld [vmem:[%s5654_s0 + $0x28] sm:$0xff] }
  0x8a   :  { %v181_v21 = vsel %vm141_vm7, %v173_v3, %v3726_v7  ;;  %565 = vst.msk [vmem:[#allocation2 + $0xa0] sm:$0xff] %vm527_vm4, %v3316_v2  ;;  %v189_v11 = vsel %vm149_vm11, %v173_v3, %v3726_v7  ;;  %v287_v3 = vadd.s32 16, %v3607_v44 }
  0x8b   :  { %567 = vst.msk [vmem:[#allocation2 + $0xb0] sm:$0xff] %vm527_vm4, %v3316_v2 }
  0x8c   :  { %v3584_v38 = vpop.permute.xlu1 %107  ;;  %569 = vst.msk [vmem:[#allocation2 + $0xc0] sm:$0xff] %vm527_vm4, %v3316_v2 }
  0x8d   :  { %v3570_v34 = vpop.permute.xlu0 %105  ;;  %vm145_vm12 = vcmp.gt.f32.partialorder %v3446_v10, %v3584_v38  ;;  %571 = vst.msk [vmem:[#allocation2 + $0xd0] sm:$0xff] %vm527_vm4, %v3316_v2 }
  0x8e   :  { %vm144_vm10 = vcmp.gt.f32.partialorder %v3441_v9, %v3570_v34  ;;  %v161_v45 = vsel %vm145_vm12, %v3446_v10, %v3584_v38  ;;  %v185_v5 = vsel %vm145_vm12, %v169_v57, %v3656_v55  ;;  %573 = vst.msk [vmem:[#allocation2 + $0xe0] sm:$0xff] %vm527_vm4, %v3316_v2 }
  0x8f   :  { %v160_v39 = vsel %vm144_vm10, %v3441_v9, %v3570_v34  ;;  %229 = vrot.lane.b32.xlu0 %v162_v35, %s3315_s17  ;;  %v184_v10 = vsel %vm144_vm10, %v3632_v49, %v3622_v47  ;;  %v684_v9 = vld [vmem:[#allocation2 + $0x1] sm:$0xff]  ;;  %575 = vst.msk [vmem:[#allocation2 + $0xf0] sm:$0xff] %vm527_vm4, %v3316_v2  ;;  %v3894_v34 = vld [vmem:[%s5654_s0 + $0x78] sm:$0xff] }
  0x90   :  { %225 = vrot.lane.b32.xlu1 %v160_v39, %s3315_s17  ;;  %221 = vrot.lane.b32.xlu2 %v158_v37, %s3315_s17  ;;  %577 = vst.msk [vmem:[#allocation2 + $0x100] sm:$0xff] %vm527_vm4, %v3316_v2  ;;  %v788_v14 = vld [vmem:[#allocation2 + $0x91] sm:$0xff] }
  0x91   :  { %579 = vst.msk [vmem:[#allocation2 + $0x110] sm:$0xff] %vm527_vm4, %v3316_v2  ;;  %v804_v23 = vld [vmem:[#allocation2 + $0x92] sm:$0xff]  ;;  %v708_v24 = vld [vmem:[#allocation2 + $0xa2] sm:$0xff] }
  0x92   :  { %581 = vst.msk [vmem:[#allocation2 + $0x120] sm:$0xff] %vm527_vm4, %v3316_v2  ;;  %v772_v25 = vld [vmem:[#allocation2 + $0x90] sm:$0xff]  ;;  %v692_v27 = vld [vmem:[#allocation2 + $0xa1] sm:$0xff] }
  0x93   :  { %583 = vst.msk [vmem:[#allocation2 + $0x130] sm:$0xff] %vm527_vm4, %v3316_v2 }
  0x94   :  { %v3626_v48 = vpop.permute.xlu1 %113 }
  0x95   :  { %v3600_v42 = vpop.permute.xlu0 %111  ;;  %vm148_vm14 = vcmp.gt.f32.partialorder %v3467_v13, %v3626_v48 }
  0x96   :  { %vm147_vm13 = vcmp.gt.f32.partialorder %v3462_v12, %v3600_v42  ;;  %v164_v51 = vsel %vm148_vm14, %v3467_v13, %v3626_v48  ;;  %v188_v6 = vsel %vm148_vm14, %v172_v4, %v3679_v62 }
  0x97   :  { %v163_v46 = vsel %vm147_vm13, %v3462_v12, %v3600_v42  ;;  %235 = vrot.lane.b32.xlu0 %v165_v43, %s3315_s17  ;;  %v187_v13 = vsel %vm147_vm13, %v3662_v56, %v3653_v54  ;;  %v700_v12 = vld [vmem:[#allocation2 + $0x2] sm:$0xff]  ;;  %v3929_v42 = vld [vmem:[%s5654_s0 + $0x58] sm:$0xff] }
  0x98   :  { %231 = vrot.lane.b32.xlu1 %v163_v46, %s3315_s17  ;;  %227 = vrot.lane.b32.xlu2 %v161_v45, %s3315_s17  ;;  %v3934_v43 = vld [vmem:[%s5654_s0 + $0xa8] sm:$0xff]  ;;  %v3974_v56 = vld [vmem:[%s5654_s0 + $0xd8] sm:$0xff] }
  0x9d   :  { %v3634_v50 = vpop.permute.xlu0 %117 }
  0x9e   :  { %vm150_vm15 = vcmp.gt.f32.partialorder %v3483_v15, %v3634_v50 }
  0x9f   :  { %v166_v53 = vsel %vm150_vm15, %v3483_v15, %v3634_v50  ;;  %297 = vrot.lane.b32.xlu0 %v176_v52, %s3315_s17  ;;  %v190_v22 = vsel %vm150_vm15, %v3702_v16, %v3689_v0  ;;  %v3852_v15 = vld [vmem:[%s5654_s0 + $0x18] sm:$0xff]  ;;  %v3964_v52 = vld [vmem:[%s5654_s0 + $0x68] sm:$0xff] }
  0xa0   :  { %237 = vrot.lane.b32.xlu1 %v166_v53, %s3315_s17  ;;  %233 = vrot.lane.b32.xlu2 %v164_v51, %s3315_s17  ;;  %v3969_v53 = vld [vmem:[%s5654_s0 + $0x88] sm:$0xff]  ;;  %v4009_v16 = vld [vmem:[%s5654_s0 + $0xb8] sm:$0xff] }
  0xa7   :  { %303 = vrot.lane.b32.xlu0 %v179_v59, %s3315_s17 }
  0xa8   :  { %299 = vrot.lane.b32.xlu1 %v177_v60, %s3315_s17  ;;  %295 = vrot.lane.b32.xlu2 %v175_v63, %s3315_s17 }
  0xaf   :  { %309 = vrot.lane.b32.xlu0 %v182_v18, %s3315_s17 }
  0xb0   :  { %305 = vrot.lane.b32.xlu1 %v180_v19, %s3315_s17  ;;  %301 = vrot.lane.b32.xlu2 %v178_v20, %s3315_s17 }
  0xb7   :  { %315 = vrot.lane.b32.xlu0 %v185_v5, %s3315_s17 }
  0xb8   :  { %311 = vrot.lane.b32.xlu1 %v183_v17, %s3315_s17  ;;  %307 = vrot.lane.b32.xlu2 %v181_v21, %s3315_s17 }
  0xbf   :  { %321 = vrot.lane.b32.xlu0 %v188_v6, %s3315_s17  ;;  %v4033_v6 = vld [vmem:[%s5654_s0 + $0xc8] sm:$0xff] }
  0xc0   :  { %317 = vrot.lane.b32.xlu1 %v186_v8, %s3315_s17  ;;  %313 = vrot.lane.b32.xlu2 %v184_v10, %s3315_s17  ;;  %v4038_v8 = vld [vmem:[%s5654_s0 + $0xe8] sm:$0xff] }
  0xc7   :  { %829 = vrot.lane.b32.xlu0 %v684_v9, %s3314_s9 }
  0xc8   :  { %323 = vrot.lane.b32.xlu1 %v189_v11, %s3315_s17  ;;  %319 = vrot.lane.b32.xlu2 %v187_v13, %s3315_s17  ;;  %v4046_v13 = vadd.s32 16, %v3676_v61 }
  0xcf   :  { %1227 = vrot.lane.b32.xlu0 %v788_v14, %s3318_s19 }
  0xd0   :  { %893 = vrot.lane.b32.xlu1 %v700_v12, %s3317_s18  ;;  %325 = vrot.lane.b32.xlu2 %v190_v22, %s3315_s17 }
  0xd7   :  { %909 = vrot.lane.b32.xlu0 %v708_v24, %s3317_s18  ;;  %v4066_v24 = vld [vmem:[%s5654_s0 + $0xf8] sm:$0xff] }
  0xd8   :  { %1291 = vrot.lane.b32.xlu1 %v804_v23, %s3319_s20  ;;  %1163 = vrot.lane.b32.xlu2 %v772_v25, %s3320_s23  ;;  %v288_v23 = vadd.s32 16, %v3622_v47 }
  0xda   :  { %v3855_v26 = vpop.permute.xlu2 %209 }
  0xdb   :  { %vm256_vm0 = vcmp.gt.f32.partialorder %v3852_v15, %v3855_v26 }
  0xdc   :  { %v272_v28 = vsel %vm256_vm0, %v3852_v15, %v3855_v26  ;;  %v291_v26 = vadd.s32 16, %v3653_v54 }
  0xe0   :  { %361 = vrot.lane.b32.xlu1 %v272_v28, %s3314_s9  ;;  %845 = vrot.lane.b32.xlu2 %v692_v27, %s3314_s9 }
  0xe2   :  { %v3871_v30 = vpop.permute.xlu2 %215 }
  0xe3   :  { %vm259_vm1 = vcmp.gt.f32.partialorder %v3868_v29, %v3871_v30 }
  0xe4   :  { %v275_v31 = vsel %vm259_vm1, %v3868_v29, %v3871_v30 }
  0xe8   :  { %367 = vrot.lane.b32.xlu1 %v275_v31, %s3314_s9 }
  0xe9   :  { %v3896_v36 = vpop.permute.xlu0 %211 }
  0xea   :  { %v208_v35 = vpop.permute.xlu1 %207  ;;  %v3899_v37 = vpop.permute.xlu2 %221  ;;  %vm257_vm3 = vcmp.gt.f32.partialorder %v3889_v33, %v3896_v36 }
  0xeb   :  { %vm255_vm2 = vcmp.gt.f32.partialorder %v3884_v32, %v208_v35  ;;  %vm262_vm5 = vcmp.gt.f32.partialorder %v3894_v34, %v3899_v37  ;;  %v273_v39 = vsel %vm257_vm3, %v3889_v33, %v3896_v36 }
  0xec   :  { %v271_v38 = vsel %vm255_vm2, %v3884_v32, %v208_v35  ;;  %363 = vrot.lane.b32.xlu2 %v273_v39, %s3314_s9  ;;  %v278_v40 = vsel %vm262_vm5, %v3894_v34, %v3899_v37  ;;  %v4073_v35 = vadd.s32 16, %v3726_v7 }
  0xed   :  { %359 = vrot.lane.b32.xlu0 %v271_v38, %s3314_s9 }
  0xf0   :  { %373 = vrot.lane.b32.xlu1 %v278_v40, %s3314_s9  ;;  %v289_v40 = vadd.s32 16, %v3656_v55 }
  0xf1   :  { %v3936_v46 = vpop.permute.xlu0 %217 }
  0xf2   :  { %v214_v45 = vpop.permute.xlu1 %213  ;;  %v3939_v48 = vpop.permute.xlu2 %227  ;;  %vm260_vm8 = vcmp.gt.f32.partialorder %v3929_v42, %v3936_v46 }
  0xf3   :  { %vm258_vm7 = vcmp.gt.f32.partialorder %v3924_v41, %v214_v45  ;;  %vm265_vm9 = vcmp.gt.f32.partialorder %v3934_v43, %v3939_v48  ;;  %v276_v50 = vsel %vm260_vm8, %v3929_v42, %v3936_v46 }
  0xf4   :  { %v274_v49 = vsel %vm258_vm7, %v3924_v41, %v214_v45  ;;  %369 = vrot.lane.b32.xlu2 %v276_v50, %s3314_s9  ;;  %v281_v51 = vsel %vm265_vm9, %v3934_v43, %v3939_v48 }
  0xf5   :  { %365 = vrot.lane.b32.xlu0 %v274_v49, %s3314_s9 }
  0xf8   :  { %379 = vrot.lane.b32.xlu1 %v281_v51, %s3314_s9 }
  0xf9   :  { %v3976_v58 = vpop.permute.xlu0 %223 }
  0xfa   :  { %v220_v57 = vpop.permute.xlu1 %219  ;;  %v3978_v59 = vpop.permute.xlu2 %233  ;;  %vm263_vm11 = vcmp.gt.f32.partialorder %v3969_v53, %v3976_v58 }
  0xfb   :  { %vm261_vm10 = vcmp.gt.f32.partialorder %v3964_v52, %v220_v57  ;;  %vm268_vm12 = vcmp.gt.f32.partialorder %v3974_v56, %v3978_v59  ;;  %v279_v63 = vsel %vm263_vm11, %v3969_v53, %v3976_v58 }
  0xfc   :  { %v277_v60 = vsel %vm261_vm10, %v3964_v52, %v220_v57  ;;  %375 = vrot.lane.b32.xlu2 %v279_v63, %s3314_s9  ;;  %v284_v4 = vsel %vm268_vm12, %v3974_v56, %v3978_v59  ;;  %v292_v63 = vadd.s32 16, %v3679_v62 }
  0xfd   :  { %371 = vrot.lane.b32.xlu0 %v277_v60, %s3314_s9 }
 0x100   :  { %385 = vrot.lane.b32.xlu1 %v284_v4, %s3314_s9  ;;  %v294_v4 = vadd.s32 16, %v3689_v0 }
 0x101   :  { %v4011_v19 = vpop.permute.xlu0 %229 }
 0x102   :  { %v226_v18 = vpop.permute.xlu1 %225  ;;  %v296_v20 = vpop.permute.xlu2 %295  ;;  %vm266_vm14 = vcmp.gt.f32.partialorder %v4009_v16, %v4011_v19 }
 0x103   :  { %vm264_vm13 = vcmp.gt.f32.partialorder %v4004_v1, %v226_v18  ;;  %v282_v17 = vsel %vm266_vm14, %v4009_v16, %v4011_v19  ;;  %v327_v21 = vsel %vm255_vm2, %v287_v3, %v296_v20 }
 0x104   :  { %v280_v5 = vsel %vm264_vm13, %v4004_v1, %v226_v18  ;;  %381 = vrot.lane.b32.xlu2 %v282_v17, %s3314_s9 }
 0x105   :  { %377 = vrot.lane.b32.xlu0 %v280_v5, %s3314_s9 }
 0x108   :  { %447 = vrot.lane.b32.xlu1 %v327_v21, %s3314_s9 }
 0x109   :  { %v4040_v9 = vpop.permute.xlu0 %235 }
 0x10a   :  { %v232_v10 = vpop.permute.xlu1 %231  ;;  %v302_v11 = vpop.permute.xlu2 %301  ;;  %vm269_vm6 = vcmp.gt.f32.partialorder %v4038_v8, %v4040_v9 }
 0x10b   :  { %vm267_vm15 = vcmp.gt.f32.partialorder %v4033_v6, %v232_v10  ;;  %v285_v14 = vsel %vm269_vm6, %v4038_v8, %v4040_v9  ;;  %v330_v22 = vsel %vm258_vm7, %v4046_v13, %v302_v11 }
 0x10c   :  { %v283_v12 = vsel %vm267_vm15, %v4033_v6, %v232_v10  ;;  %387 = vrot.lane.b32.xlu2 %v285_v14, %s3314_s9 }
 0x10d   :  { %383 = vrot.lane.b32.xlu0 %v283_v12, %s3314_s9 }
 0x110   :  { %453 = vrot.lane.b32.xlu1 %v330_v22, %s3314_s9 }
 0x111   :  { %v298_v27 = vpop.permute.xlu0 %297 }
 0x112   :  { %v238_v25 = vpop.permute.xlu1 %237  ;;  %v308_v28 = vpop.permute.xlu2 %307  ;;  %v328_v31 = vsel %vm256_vm0, %v288_v23, %v298_v27  ;;  %vm5663_vm0 = vcmask 130048  }
 0x113   :  { %vm270_vm2 = vcmp.gt.f32.partialorder %v4066_v24, %v238_v25  ;;  %v333_v39 = vsel %vm261_vm10, %v4073_v35, %v308_v28  ;;  %1764 = vst.msk [vmem:[#allocation3] sm:$0xff] %vm5663_vm0, %v3316_v2 }
 0x114   :  { %v286_v38 = vsel %vm270_vm2, %v4066_v24, %v238_v25  ;;  %449 = vrot.lane.b32.xlu2 %v328_v31, %s3314_s9  ;;  %1767 = vst.msk [vmem:[#allocation3 + $0x10] sm:$0xff] %vm5663_vm0, %v3316_v2 }
 0x115   :  { %389 = vrot.lane.b32.xlu0 %v286_v38, %s3314_s9  ;;  %1769 = vst.msk [vmem:[#allocation3 + $0x20] sm:$0xff] %vm5663_vm0, %v3316_v2 }
 0x116   :  { %1771 = vst.msk [vmem:[#allocation3 + $0x30] sm:$0xff] %vm5663_vm0, %v3316_v2 }
 0x117   :  { %1773 = vst.msk [vmem:[#allocation3 + $0x40] sm:$0xff] %vm5663_vm0, %v3316_v2 }
 0x118   :  { %459 = vrot.lane.b32.xlu1 %v333_v39, %s3314_s9  ;;  %1775 = vst.msk [vmem:[#allocation3 + $0x50] sm:$0xff] %vm5663_vm0, %v3316_v2 }
 0x119   :  { %v304_v49 = vpop.permute.xlu0 %303  ;;  %1777 = vst.msk [vmem:[#allocation3 + $0x60] sm:$0xff] %vm5663_vm0, %v3316_v2 }
 0x11a   :  { %v300_v45 = vpop.permute.xlu1 %299  ;;  %v314_v50 = vpop.permute.xlu2 %313  ;;  %v331_v60 = vsel %vm259_vm1, %v291_v26, %v304_v49  ;;  %1779 = vst.msk [vmem:[#allocation3 + $0x70] sm:$0xff] %vm5663_vm0, %v3316_v2 }
 0x11b   :  { %v329_v51 = vsel %vm257_vm3, %v289_v40, %v300_v45  ;;  %v336_v57 = vsel %vm264_vm13, %v288_v23, %v314_v50  ;;  %1781 = vst.msk [vmem:[#allocation3 + $0x80] sm:$0xff] %vm5663_vm0, %v3316_v2 }
 0x11c   :  { %455 = vrot.lane.b32.xlu2 %v331_v60, %s3314_s9  ;;  %1783 = vst.msk [vmem:[#allocation3 + $0x90] sm:$0xff] %vm5663_vm0, %v3316_v2 }
 0x11d   :  { %451 = vrot.lane.b32.xlu0 %v329_v51, %s3314_s9  ;;  %1785 = vst.msk [vmem:[#allocation3 + $0xa0] sm:$0xff] %vm5663_vm0, %v3316_v2 }
 0x11e   :  { %1787 = vst.msk [vmem:[#allocation3 + $0xb0] sm:$0xff] %vm5663_vm0, %v3316_v2 }
 0x11f   :  { %1789 = vst.msk [vmem:[#allocation3 + $0xc0] sm:$0xff] %vm5663_vm0, %v3316_v2 }
 0x120   :  { %465 = vrot.lane.b32.xlu1 %v336_v57, %s3314_s9  ;;  %1791 = vst.msk [vmem:[#allocation3 + $0xd0] sm:$0xff] %vm5663_vm0, %v3316_v2  ;;  %v440_v57 = vadd.s32 17, %v3622_v47 }
 0x121   :  { %v310_v36 = vpop.permute.xlu0 %309  ;;  %1793 = vst.msk [vmem:[#allocation3 + $0xe0] sm:$0xff] %vm5663_vm0, %v3316_v2 }
 0x122   :  { %v306_v20 = vpop.permute.xlu1 %305  ;;  %v320_v5 = vpop.permute.xlu2 %319  ;;  %v334_v17 = vsel %vm262_vm5, %v294_v4, %v310_v36  ;;  %1795 = vst.msk [vmem:[#allocation3 + $0xf0] sm:$0xff] %vm5663_vm0, %v3316_v2 }
 0x123   :  { %v332_v30 = vsel %vm260_vm8, %v292_v63, %v306_v20  ;;  %v339_v18 = vsel %vm267_vm15, %v291_v26, %v320_v5  ;;  %1797 = vst.msk [vmem:[#allocation3 + $0x100] sm:$0xff] %vm5663_vm0, %v3316_v2  ;;  %v443_v5 = vadd.s32 17, %v3653_v54 }
 0x124   :  { %461 = vrot.lane.b32.xlu2 %v334_v17, %s3314_s9  ;;  %1799 = vst.msk [vmem:[#allocation3 + $0x110] sm:$0xff] %vm5663_vm0, %v3316_v2  ;;  %v439_v17 = vadd.s32 17, %v3607_v44 }
 0x125   :  { %457 = vrot.lane.b32.xlu0 %v332_v30, %s3314_s9  ;;  %1801 = vst.msk [vmem:[#allocation3 + $0x120] sm:$0xff] %vm5663_vm0, %v3316_v2 }
 0x126   :  { %1803 = vst.msk [vmem:[#allocation3 + $0x130] sm:$0xff] %vm5663_vm0, %v3316_v2 }
 0x128   :  { %471 = vrot.lane.b32.xlu1 %v339_v18, %s3314_s9 }
 0x129   :  { %v316_v11 = vpop.permute.xlu0 %315 }
 0x12a   :  { %v312_v21 = vpop.permute.xlu1 %311  ;;  %v326_v46 = vpop.permute.xlu2 %325  ;;  %v337_v12 = vsel %vm265_vm9, %v289_v40, %v316_v11  ;;  %v446_v11 = vadd.s32 17, %v3689_v0 }
 0x12b   :  { %v335_v37 = vsel %vm263_vm11, %v287_v3, %v312_v21  ;;  %v342_v48 = vsel %vm270_vm2, %v294_v4, %v326_v46 }
 0x12c   :  { %467 = vrot.lane.b32.xlu2 %v337_v12, %s3314_s9 }
 0x12d   :  { %463 = vrot.lane.b32.xlu0 %v335_v37, %s3314_s9  ;;  %v442_v37 = vadd.s32 17, %v3676_v61 }
 0x130   :  { %477 = vrot.lane.b32.xlu1 %v342_v48, %s3314_s9 }
 0x131   :  { %v322_v3 = vpop.permute.xlu0 %321 }
 0x132   :  { %v318_v58 = vpop.permute.xlu1 %317  ;;  %v340_v14 = vsel %vm268_vm12, %v292_v63, %v322_v3  ;;  %v4146_v22 = vpop.permute.xlu2 %1163 }
 0x133   :  { %v338_v10 = vsel %vm266_vm14, %v4046_v13, %v318_v58  ;;  %v441_v58 = vadd.s32 17, %v3656_v55 }
 0x134   :  { %473 = vrot.lane.b32.xlu2 %v340_v14, %s3314_s9 }
 0x135   :  { %469 = vrot.lane.b32.xlu0 %v338_v10, %s3314_s9  ;;  %v445_v10 = vadd.s32 17, %v3726_v7 }
 0x139   :  { %v4179_v23 = vpop.permute.xlu0 %829 }
 0x13a   :  { %v324_v59 = vpop.permute.xlu1 %323  ;;  %v4175_v13 = vpop.permute.xlu2 %845 }
 0x13b   :  { %v341_v19 = vsel %vm269_vm6, %v4073_v35, %v324_v59 }
 0x13d   :  { %475 = vrot.lane.b32.xlu0 %v341_v19, %s3314_s9 }
 0x141   :  { %v4187_v28 = vpop.permute.xlu0 %1227 }
 0x142   :  { %v4181_v25 = vpop.permute.xlu1 %893 }
 0x146   :  { %v4183_v27 = vpop.permute.xlu2 %363 }
 0x147   :  { %vm409_vm11 = vcmp.gt.f32.partialorder %v3889_v33, %v4183_v27 }
 0x149   :  { %v4193_v38 = vpop.permute.xlu0 %909 }
 0x14a   :  { %v4185_v9 = vpop.permute.xlu1 %1291 }
 0x14e   :  { %v4189_v31 = vpop.permute.xlu2 %369 }
 0x14f   :  { %vm412_vm13 = vcmp.gt.f32.partialorder %v3929_v42, %v4189_v31 }
 0x152   :  { %v4191_v35 = vpop.permute.xlu1 %361 }
 0x153   :  { %vm408_vm1 = vcmp.gt.f32.partialorder %v3852_v15, %v4191_v35 }
 0x156   :  { %v4195_v39 = vpop.permute.xlu2 %375 }
 0x157   :  { %vm415_vm15 = vcmp.gt.f32.partialorder %v3969_v53, %v4195_v39 }
 0x15a   :  { %v4197_v40 = vpop.permute.xlu1 %367 }
 0x15b   :  { %vm411_vm3 = vcmp.gt.f32.partialorder %v3868_v29, %v4197_v40 }
 0x15e   :  { %v4199_v26 = vpop.permute.xlu2 %381 }
 0x15f   :  { %v360_v45 = vpop.permute.xlu0 %359  ;;  %vm418_vm2 = vcmp.gt.f32.partialorder %v4009_v16, %v4199_v26 }
 0x160   :  { %vm407_vm5 = vcmp.gt.f32.partialorder %v3884_v32, %v360_v45 }
 0x161   :  { %v423_v19 = vsel %vm407_vm5, %v3884_v32, %v360_v45  ;;  %v444_v32 = vadd.s32 17, %v3679_v62 }
 0x162   :  { %v4201_v49 = vpop.permute.xlu1 %373 }
 0x163   :  { %vm414_vm7 = vcmp.gt.f32.partialorder %v3894_v34, %v4201_v49 }
 0x166   :  { %v4203_v50 = vpop.permute.xlu2 %387 }
 0x167   :  { %v4205_v51 = vpop.permute.xlu0 %365  ;;  %vm421_vm0 = vcmp.gt.f32.partialorder %v4038_v8, %v4203_v50 }
 0x168   :  { %vm410_vm8 = vcmp.gt.f32.partialorder %v3924_v41, %v4205_v51 }
 0x16a   :  { %v4207_v60 = vpop.permute.xlu1 %379 }
 0x16b   :  { %vm417_vm9 = vcmp.gt.f32.partialorder %v3934_v43, %v4207_v60 }
 0x16e   :  { %v450_v63 = vpop.permute.xlu2 %449 }
 0x16f   :  { %v4212_v4 = vpop.permute.xlu0 %371  ;;  %v480_v20 = vsel %vm408_vm1, %v440_v57, %v450_v63 }
 0x170   :  { %497 = vrot.lane.b32.xlu0 %v480_v20, %s3315_s17  ;;  %vm413_vm10 = vcmp.gt.f32.partialorder %v3964_v52, %v4212_v4 }
 0x172   :  { %v4218_v36 = vpop.permute.xlu1 %385 }
 0x173   :  { %vm420_vm6 = vcmp.gt.f32.partialorder %v3974_v56, %v4218_v36 }
 0x176   :  { %v456_v47 = vpop.permute.xlu2 %455 }
 0x177   :  { %v4223_v30 = vpop.permute.xlu0 %377  ;;  %v483_v18 = vsel %vm411_vm3, %v443_v5, %v456_v47 }
 0x178   :  { %503 = vrot.lane.b32.xlu0 %v483_v18, %s3315_s17  ;;  %vm416_vm12 = vcmp.gt.f32.partialorder %v4004_v1, %v4223_v30 }
 0x17a   :  { %v448_v21 = vpop.permute.xlu1 %447 }
 0x17b   :  { %v479_v54 = vsel %vm407_vm5, %v439_v17, %v448_v21 }
 0x17c   :  { %495 = vrot.lane.b32.xlu2 %v479_v54, %s3315_s17 }
 0x17e   :  { %v462_v44 = vpop.permute.xlu2 %461 }
 0x17f   :  { %v4237_v46 = vpop.permute.xlu0 %383  ;;  %v486_v12 = vsel %vm414_vm7, %v446_v11, %v462_v44 }
 0x180   :  { %509 = vrot.lane.b32.xlu0 %v486_v12, %s3315_s17  ;;  %vm419_vm14 = vcmp.gt.f32.partialorder %v4033_v6, %v4237_v46 }
 0x182   :  { %v454_v48 = vpop.permute.xlu1 %453 }
 0x183   :  { %v482_v0 = vsel %vm410_vm8, %v442_v37, %v454_v48 }
 0x184   :  { %501 = vrot.lane.b32.xlu2 %v482_v0, %s3315_s17 }
 0x186   :  { %v468_v61 = vpop.permute.xlu2 %467 }
 0x187   :  { %v4253_v3 = vpop.permute.xlu0 %389  ;;  %v489_v14 = vsel %vm417_vm9, %v441_v58, %v468_v61 }
 0x188   :  { %515 = vrot.lane.b32.xlu0 %v489_v14, %s3315_s17  ;;  %vm422_vm5 = vcmp.gt.f32.partialorder %v4066_v24, %v4253_v3 }
 0x18a   :  { %v460_v59 = vpop.permute.xlu1 %459 }
 0x18b   :  { %v485_v55 = vsel %vm413_vm10, %v445_v10, %v460_v59 }
 0x18c   :  { %507 = vrot.lane.b32.xlu2 %v485_v55, %s3315_s17 }
 0x18e   :  { %v474_v54 = vpop.permute.xlu2 %473 }
 0x18f   :  { %v452_v7 = vpop.permute.xlu0 %451 }
 0x190   :  { %v481_v63 = vsel %vm409_vm11, %v441_v58, %v452_v7  ;;  %601 = vrot.lane.b32.xlu0 %v423_v19, %s3315_s17 }
 0x191   :  { %499 = vrot.lane.b32.xlu1 %v481_v63, %s3315_s17 }
 0x192   :  { %v466_v20 = vpop.permute.xlu1 %465 }
 0x193   :  { %v488_v47 = vsel %vm416_vm12, %v440_v57, %v466_v20 }
 0x194   :  { %513 = vrot.lane.b32.xlu2 %v488_v47, %s3315_s17 }
 0x197   :  { %v458_v45 = vpop.permute.xlu0 %457 }
 0x198   :  { %v484_v18 = vsel %vm412_vm13, %v444_v32, %v458_v45 }
 0x199   :  { %505 = vrot.lane.b32.xlu1 %v484_v18, %s3315_s17 }
 0x19a   :  { %v472_v21 = vpop.permute.xlu1 %471 }
 0x19b   :  { %v491_v57 = vsel %vm419_vm14, %v443_v5, %v472_v21  ;;  %v492_v5 = vsel %vm420_vm6, %v444_v32, %v474_v54 }
 0x19c   :  { %519 = vrot.lane.b32.xlu2 %v491_v57, %s3315_s17 }
 0x19f   :  { %v464_v62 = vpop.permute.xlu0 %463 }
 0x1a0   :  { %v487_v44 = vsel %vm415_vm15, %v439_v17, %v464_v62 }
 0x1a1   :  { %511 = vrot.lane.b32.xlu1 %v487_v44, %s3315_s17 }
 0x1a2   :  { %v478_v48 = vpop.permute.xlu1 %477 }
 0x1a3   :  { %v494_v0 = vsel %vm422_vm5, %v446_v11, %v478_v48  ;;  %v428_v11 = vsel %vm412_vm13, %v3929_v42, %v4189_v31  ;;  %v431_v42 = vsel %vm415_vm15, %v3969_v53, %v4195_v39  ;;  %v434_v53 = vsel %vm418_vm2, %v4009_v16, %v4199_v26 }
 0x1a4   :  { %521 = vrot.lane.b32.xlu2 %v492_v5, %s3315_s17  ;;  %v433_v16 = vsel %vm417_vm9, %v3934_v43, %v4207_v60  ;;  %v436_v43 = vsel %vm420_vm6, %v3974_v56, %v4218_v36  ;;  %vm1426_vm9 = vcmask 457728  }
 0x1a7   :  { %v470_v12 = vpop.permute.xlu0 %469 }
 0x1a8   :  { %v490_v17 = vsel %vm418_vm2, %v442_v37, %v470_v12  ;;  %v424_v37 = vsel %vm408_vm1, %v3852_v15, %v4191_v35  ;;  %v425_v15 = vsel %vm409_vm11, %v3889_v33, %v4183_v27  ;;  %v426_v35 = vsel %vm410_vm8, %v3924_v41, %v4205_v51 }
 0x1a9   :  { %517 = vrot.lane.b32.xlu1 %v490_v17, %s3315_s17  ;;  %v427_v33 = vsel %vm411_vm3, %v3868_v29, %v4197_v40  ;;  %v429_v41 = vsel %vm413_vm10, %v3964_v52, %v4212_v4  ;;  %v430_v29 = vsel %vm414_vm7, %v3894_v34, %v4201_v49  ;;  %v432_v52 = vsel %vm416_vm12, %v4004_v1, %v4223_v30 }
 0x1aa   :  { %v435_v34 = vsel %vm419_vm14, %v4033_v6, %v4237_v46  ;;  %v437_v6 = vsel %vm421_vm0, %v4038_v8, %v4203_v50  ;;  %v438_v8 = vsel %vm422_vm5, %v4066_v24, %v4253_v3  ;;  %vm1375_vm1 = vcmask 261120  }
 0x1ab   :  { %vm5664_vm3 = vcmask 130048   ;;  %vm1392_vm7 = vcmask 326656   ;;  %vm1409_vm8 = vcmask 392192   ;;  %vm1443_vm10 = vcmask 523264  }
 0x1ac   :  { %525 = vrot.lane.b32.xlu2 %v494_v0, %s3315_s17  ;;  %vm1469_vm11 = vcmask 588800   ;;  %vm5665_vm12 = vmmov %vm5664_vm3 }
 0x1ad   :  { %vm5666_vm13 = vmmov %vm5664_vm3 }
 0x1ae   :  { %vm5667_vm14 = vmmov %vm5664_vm3 }
 0x1af   :  { %v476_v58 = vpop.permute.xlu0 %475  ;;  %vm5668_vm15 = vmmov %vm5664_vm3 }
 0x1b0   :  { %v493_v61 = vsel %vm421_vm0, %v445_v10, %v476_v58  ;;  %vm1358_vm0 = vcmask 195584   ;;  %vm5669_vm6 = vmmov %vm5664_vm3 }
 0x1b1   :  { %603 = vrot.lane.b32.xlu1 %v424_v37, %s3315_s17  ;;  %523 = vrot.lane.b32.xlu0 %v493_v61, %s3315_s17  ;;  %vm5670_vm2 = vmmov %vm5664_vm3 }
 0x1b2   :  { %vm5671_vm5 = vmmov %vm5670_vm2 }
 0x1b4   :  { %611 = vrot.lane.b32.xlu2 %v428_v11, %s3315_s17 }
 0x1b9   :  { %605 = vrot.lane.b32.xlu1 %v425_v15, %s3315_s17  ;;  %607 = vrot.lane.b32.xlu0 %v426_v35, %s3315_s17 }
 0x1bc   :  { %617 = vrot.lane.b32.xlu2 %v431_v42, %s3315_s17 }
 0x1c1   :  { %609 = vrot.lane.b32.xlu1 %v427_v33, %s3315_s17  ;;  %613 = vrot.lane.b32.xlu0 %v429_v41, %s3315_s17  ;;  %v1468_v33 = vld [vmem:[%s5655_s1 + $0x40] sm:$0xff]  ;;  %v1467_v41 = vld [vmem:[%s5655_s1 + $0x38] sm:$0xff] }
 0x1c2   :  { %1525 = vmatpush.msra.mxu0 %v1468_v33  ;;  %2972 = vmatpush.msra.mxu3 %v1468_v33 }
 0x1c4   :  { %623 = vrot.lane.b32.xlu2 %v434_v53, %s3315_s17  ;;  %v1466_v53 = vld [vmem:[%s5655_s1 + $0x30] sm:$0xff]  ;;  %1526 = vmatpush.msra.mxu0 %v1467_v41 }
 0x1c5   :  { %2973 = vmatpush.msra.mxu3 %v1467_v41 }
 0x1c6   :  { %1527 = vmatpush.msra.mxu0 %v1466_v53 }
 0x1c7   :  { %2974 = vmatpush.msra.mxu3 %v1466_v53 }
 0x1c9   :  { %615 = vrot.lane.b32.xlu1 %v430_v29, %s3315_s17  ;;  %619 = vrot.lane.b32.xlu0 %v432_v52, %s3315_s17 }
 0x1d1   :  { %621 = vrot.lane.b32.xlu1 %v433_v16, %s3315_s17  ;;  %625 = vrot.lane.b32.xlu0 %v435_v34, %s3315_s17  ;;  %v1465_v16 = vld [vmem:[%s5655_s1 + $0x28] sm:$0xff]  ;;  %v1464_v34 = vld [vmem:[%s5655_s1 + $0x20] sm:$0xff] }
 0x1d2   :  { %1528 = vmatpush.msra.mxu0 %v1465_v16  ;;  %2975 = vmatpush.msra.mxu3 %v1465_v16 }
 0x1d4   :  { %1529 = vmatpush.msra.mxu0 %v1464_v34  ;;  %2976 = vmatpush.msra.mxu3 %v1464_v34 }
 0x1d6   :  { %v496_v1 = vpop.permute.xlu2 %495 }
 0x1d7   :  { %528 = vst.msk [vmem:[%s5662_s8] sm:$0xff] %vm527_vm4, %v496_v1  ;;  %v1463_v1 = vld [vmem:[%s5655_s1 + $0x18] sm:$0xff] }
 0x1d8   :  { %1530 = vmatpush.msra.mxu0 %v1463_v1  ;;  %2977 = vmatpush.msra.mxu3 %v1463_v1 }
 0x1d9   :  { %627 = vrot.lane.b32.xlu1 %v436_v43, %s3315_s17  ;;  %v1462_v43 = vld [vmem:[%s5655_s1 + $0x10] sm:$0xff] }
 0x1da   :  { %1531 = vmatpush.msra.mxu0 %v1462_v43  ;;  %2978 = vmatpush.msra.mxu3 %v1462_v43 }
 0x1de   :  { %v502_v27 = vpop.permute.xlu2 %501 }
 0x1df   :  { %531 = vst.msk [vmem:[%s5662_s8 + $0x18] sm:$0xff] %vm527_vm4, %v502_v27  ;;  %v1461_v27 = vld [vmem:[%s5655_s1 + $0x8] sm:$0xff] }
 0x1e0   :  { %1532 = vmatpush.msra.mxu0 %v1461_v27  ;;  %2979 = vmatpush.msra.mxu3 %v1461_v27 }
 0x1e1   :  { %629 = vrot.lane.b32.xlu1 %v437_v6, %s3315_s17 }
 0x1e2   :  { %v498_v31 = vpop.permute.xlu0 %497 }
 0x1e3   :  { %529 = vst.msk [vmem:[%s5662_s8 + $0x8] sm:$0xff] %vm527_vm4, %v498_v31  ;;  %v1460_v31 = vld [vmem:[%s5655_s1] sm:$0xff] }
 0x1e4   :  { %1533 = vmatpush.msra.mxu0 %v1460_v31  ;;  %2980 = vmatpush.msra.mxu3 %v1460_v31 }
 0x1e6   :  { %v508_v56 = vpop.permute.xlu2 %507 }
 0x1e7   :  { %534 = vst.msk [vmem:[%s5662_s8 + $0x30] sm:$0xff] %vm527_vm4, %v508_v56 }
 0x1e9   :  { %631 = vrot.lane.b32.xlu1 %v438_v8, %s3315_s17 }
 0x1ea   :  { %v504_v39 = vpop.permute.xlu0 %503 }
 0x1eb   :  { %532 = vst.msk [vmem:[%s5662_s8 + $0x20] sm:$0xff] %vm527_vm4, %v504_v39 }
 0x1ee   :  { %v514_v40 = vpop.permute.xlu2 %513 }
 0x1ef   :  { %537 = vst.msk [vmem:[%s5662_s8 + $0x48] sm:$0xff] %vm527_vm4, %v514_v40 }
 0x1f2   :  { %v510_v26 = vpop.permute.xlu0 %509 }
 0x1f3   :  { %535 = vst.msk [vmem:[%s5662_s8 + $0x38] sm:$0xff] %vm527_vm4, %v510_v26 }
 0x1f6   :  { %v520_v24 = vpop.permute.xlu2 %519 }
 0x1f7   :  { %540 = vst.msk [vmem:[%s5662_s8 + $0x60] sm:$0xff] %vm527_vm4, %v520_v24  ;;  %v668_v24 = vld [vmem:[#allocation2] sm:$0xff] }
 0x1fa   :  { %v516_v49 = vpop.permute.xlu0 %515 }
 0x1fb   :  { %538 = vst.msk [vmem:[%s5662_s8 + $0x50] sm:$0xff] %vm527_vm4, %v516_v49 }
 0x1fe   :  { %v522_v50 = vpop.permute.xlu2 %521 }
 0x1ff   :  { %541 = vst.msk [vmem:[%s5662_s8 + $0x68] sm:$0xff] %vm527_vm4, %v522_v50  ;;  %v1325_v50 = vsel %vm527_vm4, %v668_v24, %v4179_v23 }
 0x202   :  { %v602_v60 = vpop.permute.xlu0 %601 }
 0x203   :  { %v500_v51 = vpop.permute.xlu1 %499  ;;  %650 = vst.msk [vmem:[#allocation2 + $0x11] sm:$0xff] %vm527_vm4, %v602_v60 }
 0x204   :  { %530 = vst.msk [vmem:[%s5662_s8 + $0x10] sm:$0xff] %vm527_vm4, %v500_v51 }
 0x206   :  { %v526_v4 = vpop.permute.xlu2 %525 }
 0x207   :  { %543 = vst.msk [vmem:[%s5662_s8 + $0x78] sm:$0xff] %vm527_vm4, %v526_v4 }
 0x20a   :  { %v748_v30 = vld [vmem:[#allocation2 + $0x12] sm:$0xff] }
 0x20b   :  { %v506_v36 = vpop.permute.xlu1 %505  ;;  %v732_v46 = vld [vmem:[#allocation2 + $0x11] sm:$0xff]  ;;  %1085 = vrot.lane.b32.xlu1 %v748_v30, %s3321_s29 }
 0x20c   :  { %533 = vst.msk [vmem:[%s5662_s8 + $0x28] sm:$0xff] %vm527_vm4, %v506_v36  ;;  %v4468_v3 = vld [vmem:[#allocation2 + $0x10] sm:$0xff]  ;;  %1021 = vrot.lane.b32.xlu0 %v732_v46, %s3322_s30  ;;  %v1342_v36 = vsel %vm5664_vm3, %v1325_v50, %v4181_v25  ;;  %vm5672_vm3 = vmmov %vm5670_vm2 }
 0x20d   :  { %957 = vrot.lane.b32.xlu2 %v4468_v3, %s3323_s10 }
 0x20e   :  { %v612_v10 = vpop.permute.xlu2 %611 }
 0x20f   :  { %655 = vst.msk [vmem:[#allocation2 + $0x61] sm:$0xff] %vm527_vm4, %v612_v10 }
 0x213   :  { %v512_v14 = vpop.permute.xlu1 %511 }
 0x214   :  { %536 = vst.msk [vmem:[%s5662_s8 + $0x40] sm:$0xff] %vm527_vm4, %v512_v14 }
 0x216   :  { %v618_v59 = vpop.permute.xlu2 %617  ;;  %v4553_v29 = vld [vmem:[#allocation2 + $0x60] sm:$0xff] }
 0x217   :  { %658 = vst.msk [vmem:[#allocation2 + $0xb1] sm:$0xff] %vm527_vm4, %v618_v59  ;;  %v801_v56 = vld [vmem:[#allocation2 + $0x62] sm:$0xff] }
 0x218   :  { %v785_v40 = vld [vmem:[#allocation2 + $0x61] sm:$0xff] }
 0x21b   :  { %v518_v55 = vpop.permute.xlu1 %517 }
 0x21c   :  { %539 = vst.msk [vmem:[%s5662_s8 + $0x58] sm:$0xff] %vm527_vm4, %v518_v55 }
 0x21e   :  { %v624_v7 = vpop.permute.xlu2 %623  ;;  %v740_v41 = vld [vmem:[#allocation2 + $0xb1] sm:$0xff] }
 0x21f   :  { %661 = vst.msk [vmem:[#allocation2 + $0xe1] sm:$0xff] %vm527_vm4, %v624_v7  ;;  %v756_v50 = vld [vmem:[#allocation2 + $0xb2] sm:$0xff] }
 0x223   :  { %v604_v19 = vpop.permute.xlu1 %603  ;;  %v524_v63 = vpop.permute.xlu0 %523 }
 0x224   :  { %651 = vst.msk [vmem:[#allocation2 + $0x21] sm:$0xff] %vm527_vm4, %v604_v19 }
 0x225   :  { %542 = vst.msk [vmem:[%s5662_s8 + $0x70] sm:$0xff] %vm527_vm4, %v524_v63 }
 0x22b   :  { %v606_v20 = vpop.permute.xlu1 %605  ;;  %v608_v47 = vpop.permute.xlu0 %607  ;;  %v797_v32 = vld [vmem:[#allocation2 + $0x22] sm:$0xff] }
 0x22c   :  { %v781_v45 = vld [vmem:[#allocation2 + $0x21] sm:$0xff]  ;;  %652 = vst.msk [vmem:[#allocation2 + $0x31] sm:$0xff] %vm527_vm4, %v606_v20  ;;  %1277 = vrot.lane.b32.xlu1 %v797_v32, %s3319_s20 }
 0x22d   :  { %v4490_v18 = vld [vmem:[#allocation2 + $0x20] sm:$0xff]  ;;  %1213 = vrot.lane.b32.xlu0 %v781_v45, %s3318_s19  ;;  %653 = vst.msk [vmem:[#allocation2 + $0x41] sm:$0xff] %vm527_vm4, %v608_v47 }
 0x22e   :  { %1149 = vrot.lane.b32.xlu2 %v4490_v18, %s3320_s23 }
 0x233   :  { %v610_v21 = vpop.permute.xlu1 %609  ;;  %v614_v57 = vpop.permute.xlu0 %613  ;;  %v4504_v44 = vld [vmem:[#allocation2 + $0x30] sm:$0xff] }
 0x234   :  { %654 = vst.msk [vmem:[#allocation2 + $0x51] sm:$0xff] %vm527_vm4, %v610_v21  ;;  %959 = vrot.lane.b32.xlu1 %v4490_v18, %s3323_s10  ;;  %v798_v48 = vld [vmem:[#allocation2 + $0x32] sm:$0xff]  ;;  %v799_v37 = vld [vmem:[#allocation2 + $0x42] sm:$0xff] }
 0x235   :  { %895 = vrot.lane.b32.xlu0 %v748_v30, %s3317_s18  ;;  %656 = vst.msk [vmem:[#allocation2 + $0x71] sm:$0xff] %vm527_vm4, %v614_v57  ;;  %v782_v17 = vld [vmem:[#allocation2 + $0x31] sm:$0xff]  ;;  %v4522_v61 = vld [vmem:[#allocation2 + $0x40] sm:$0xff] }
 0x236   :  { %831 = vrot.lane.b32.xlu2 %v732_v46, %s3314_s9  ;;  %v783_v15 = vld [vmem:[#allocation2 + $0x41] sm:$0xff] }
 0x23b   :  { %v616_v62 = vpop.permute.xlu1 %615  ;;  %v620_v54 = vpop.permute.xlu0 %619  ;;  %v4534_v35 = vld [vmem:[#allocation2 + $0x50] sm:$0xff] }
 0x23c   :  { %657 = vst.msk [vmem:[#allocation2 + $0x81] sm:$0xff] %vm527_vm4, %v616_v62  ;;  %1151 = vrot.lane.b32.xlu1 %v4504_v44, %s3320_s23  ;;  %v800_v42 = vld [vmem:[#allocation2 + $0x52] sm:$0xff] }
 0x23d   :  { %1087 = vrot.lane.b32.xlu0 %v797_v32, %s3321_s29  ;;  %659 = vst.msk [vmem:[#allocation2 + $0xc1] sm:$0xff] %vm527_vm4, %v620_v54  ;;  %v784_v52 = vld [vmem:[#allocation2 + $0x51] sm:$0xff] }
 0x23e   :  { %1023 = vrot.lane.b32.xlu2 %v781_v45, %s3322_s30  ;;  %v4581_v8 = vld [vmem:[#allocation2 + $0x70] sm:$0xff] }
 0x23f   :  { %v738_v49 = vld [vmem:[#allocation2 + $0x71] sm:$0xff] }
 0x240   :  { %v802_v10 = vld [vmem:[#allocation2 + $0x72] sm:$0xff] }
 0x243   :  { %v622_v5 = vpop.permute.xlu1 %621  ;;  %v626_v12 = vpop.permute.xlu0 %625  ;;  %v787_v14 = vld [vmem:[#allocation2 + $0x81] sm:$0xff] }
 0x244   :  { %660 = vst.msk [vmem:[#allocation2 + $0xd1] sm:$0xff] %vm527_vm4, %v622_v5  ;;  %833 = vrot.lane.b32.xlu1 %v781_v45, %s3314_s9  ;;  %v771_v57 = vld [vmem:[#allocation2 + $0x80] sm:$0xff] }
 0x245   :  { %1279 = vrot.lane.b32.xlu0 %v798_v48, %s3319_s20  ;;  %662 = vst.msk [vmem:[#allocation2 + $0xf1] sm:$0xff] %vm527_vm4, %v626_v12  ;;  %v755_v62 = vld [vmem:[#allocation2 + $0x82] sm:$0xff] }
 0x246   :  { %1215 = vrot.lane.b32.xlu2 %v782_v17, %s3318_s19 }
 0x24b   :  { %v628_v0 = vpop.permute.xlu1 %627 }
 0x24c   :  { %663 = vst.msk [vmem:[#allocation2 + $0x101] sm:$0xff] %vm527_vm4, %v628_v0  ;;  %1025 = vrot.lane.b32.xlu1 %v782_v17, %s3322_s30  ;;  %v4640_v31 = vld [vmem:[#allocation2 + $0xf1] sm:$0xff] }
 0x24d   :  { %961 = vrot.lane.b32.xlu0 %v4504_v44, %s3323_s10 }
 0x24e   :  { %897 = vrot.lane.b32.xlu2 %v797_v32, %s3317_s18 }
 0x253   :  { %v630_v58 = vpop.permute.xlu1 %629 }
 0x254   :  { %664 = vst.msk [vmem:[#allocation2 + $0x111] sm:$0xff] %vm527_vm4, %v630_v58  ;;  %1153 = vrot.lane.b32.xlu1 %v4522_v61, %s3320_s23  ;;  %v4621_v58 = vld [vmem:[#allocation2 + $0xe1] sm:$0xff] }
 0x255   :  { %1281 = vrot.lane.b32.xlu0 %v799_v37, %s3319_s20 }
 0x256   :  { %1089 = vrot.lane.b32.xlu2 %v798_v48, %s3321_s29 }
 0x25b   :  { %v632_v11 = vpop.permute.xlu1 %631 }
 0x25c   :  { %665 = vst.msk [vmem:[#allocation2 + $0x121] sm:$0xff] %vm527_vm4, %v632_v11  ;;  %963 = vrot.lane.b32.xlu1 %v4522_v61, %s3323_s10 }
 0x25d   :  { %899 = vrot.lane.b32.xlu0 %v798_v48, %s3317_s18 }
 0x25e   :  { %1217 = vrot.lane.b32.xlu2 %v783_v15, %s3318_s19 }
 0x264   :  { %1155 = vrot.lane.b32.xlu1 %v4534_v35, %s3320_s23 }
 0x265   :  { %1091 = vrot.lane.b32.xlu0 %v799_v37, %s3321_s29 }
 0x266   :  { %835 = vrot.lane.b32.xlu2 %v782_v17, %s3314_s9 }
 0x267   :  { %v958_v6 = vpop.permute.xlu2 %957 }
 0x268   :  { %v1359_v30 = vsel %vm1358_vm0, %v1342_v36, %v958_v6  ;;  %v4638_v6 = vld [vmem:[#allocation2 + $0xe2] sm:$0xff] }
 0x26c   :  { %965 = vrot.lane.b32.xlu1 %v4534_v35, %s3323_s10 }
 0x26d   :  { %1283 = vrot.lane.b32.xlu0 %v800_v42, %s3319_s20 }
 0x26e   :  { %1027 = vrot.lane.b32.xlu2 %v783_v15, %s3322_s30 }
 0x274   :  { %1157 = vrot.lane.b32.xlu1 %v4553_v29, %s3320_s23 }
 0x275   :  { %901 = vrot.lane.b32.xlu0 %v799_v37, %s3317_s18 }
 0x276   :  { %1219 = vrot.lane.b32.xlu2 %v784_v52, %s3318_s19 }
 0x27c   :  { %967 = vrot.lane.b32.xlu1 %v4553_v29, %s3323_s10 }
 0x27d   :  { %1093 = vrot.lane.b32.xlu0 %v800_v42, %s3321_s29  ;;  %v1086_v51 = vpop.permute.xlu1 %1085 }
 0x27e   :  { %837 = vrot.lane.b32.xlu2 %v783_v15, %s3314_s9  ;;  %v1022_v60 = vpop.permute.xlu0 %1021 }
 0x27f   :  { %v1376_v46 = vsel %vm1375_vm1, %v1359_v30, %v1022_v60  ;;  %v4654_v60 = vld [vmem:[#allocation2 + $0xb0] sm:$0xff] }
 0x280   :  { %v1393_v23 = vsel %vm1392_vm7, %v1376_v46, %v1086_v51  ;;  %v4652_v51 = vld [vmem:[#allocation2 + $0xc1] sm:$0xff] }
 0x284   :  { %1159 = vrot.lane.b32.xlu1 %v4581_v8, %s3320_s23 }
 0x285   :  { %1285 = vrot.lane.b32.xlu0 %v801_v56, %s3319_s20 }
 0x286   :  { %1029 = vrot.lane.b32.xlu2 %v784_v52, %s3322_s30 }
 0x288   :  { %v1150_v39 = vpop.permute.xlu2 %1149 }
 0x289   :  { %v1410_v25 = vsel %vm1409_vm8, %v1393_v23, %v1150_v39 }
 0x28c   :  { %841 = vrot.lane.b32.xlu1 %v785_v40, %s3314_s9 }
 0x28d   :  { %903 = vrot.lane.b32.xlu0 %v800_v42, %s3317_s18 }
 0x28e   :  { %1221 = vrot.lane.b32.xlu2 %v785_v40, %s3318_s19 }
 0x290   :  { %v832_v26 = vpop.permute.xlu2 %831 }
 0x291   :  { %v1326_v45 = vsel %vm527_vm4, %v4468_v3, %v832_v26 }
 0x294   :  { %1033 = vrot.lane.b32.xlu1 %v738_v49, %s3322_s30 }
 0x295   :  { %1095 = vrot.lane.b32.xlu0 %v801_v56, %s3321_s29 }
 0x296   :  { %839 = vrot.lane.b32.xlu2 %v784_v52, %s3314_s9 }
 0x298   :  { %v1024_v4 = vpop.permute.xlu2 %1023 }
 0x29c   :  { %1225 = vrot.lane.b32.xlu1 %v787_v14, %s3318_s19 }
 0x29d   :  { %1287 = vrot.lane.b32.xlu0 %v802_v10, %s3319_s20 }
 0x29e   :  { %1031 = vrot.lane.b32.xlu2 %v785_v40, %s3322_s30  ;;  %v1278_v59 = vpop.permute.xlu1 %1277 }
 0x29f   :  { %v1214_v55 = vpop.permute.xlu0 %1213 }
 0x2a0   :  { %v1216_v7 = vpop.permute.xlu2 %1215  ;;  %v1427_v19 = vsel %vm1426_vm9, %v1410_v25, %v1214_v55  ;;  %v4670_v25 = vld [vmem:[#allocation2 + $0xf0] sm:$0xff] }
 0x2a1   :  { %v1444_v63 = vsel %vm1443_vm10, %v1427_v19, %v1278_v59 }
 0x2a2   :  { %2940 = vmatmul.msk.f32.vlgmr.msra.gmra.mxu0 %vm1469_vm11, %v1444_v63 }
 0x2a4   :  { %907 = vrot.lane.b32.xlu1 %v802_v10, %s3317_s18 }
 0x2a5   :  { %969 = vrot.lane.b32.xlu0 %v4581_v8, %s3323_s10 }
 0x2a6   :  { %1223 = vrot.lane.b32.xlu2 %v738_v49, %s3318_s19  ;;  %v960_v20 = vpop.permute.xlu1 %959 }
 0x2a7   :  { %v896_v47 = vpop.permute.xlu0 %895 }
 0x2a8   :  { %v898_v32 = vpop.permute.xlu2 %897  ;;  %v1343_v21 = vsel %vm5665_vm12, %v1326_v45, %v896_v47  ;;  %v4677_v47 = vld [vmem:[#allocation2 + $0x102] sm:$0xff]  ;;  %vm5673_vm12 = vmmov %vm5670_vm2 }
 0x2a9   :  { %v1360_v54 = vsel %vm1358_vm0, %v1343_v21, %v960_v20  ;;  %v805_v20 = vld [vmem:[#allocation2 + $0xc2] sm:$0xff] }
 0x2aa   :  { %v1377_v17 = vsel %vm1375_vm1, %v1360_v54, %v1024_v4 }
 0x2ac   :  { %1099 = vrot.lane.b32.xlu1 %v755_v62, %s3321_s29 }
 0x2ad   :  { %1161 = vrot.lane.b32.xlu0 %v771_v57, %s3320_s23 }
 0x2ae   :  { %905 = vrot.lane.b32.xlu2 %v801_v56, %s3317_s18  ;;  %v1152_v5 = vpop.permute.xlu1 %1151 }
 0x2af   :  { %v1088_v12 = vpop.permute.xlu0 %1087 }
 0x2b0   :  { %v1090_v48 = vpop.permute.xlu2 %1089  ;;  %v1394_v0 = vsel %vm1392_vm7, %v1377_v17, %v1088_v12 }
 0x2b1   :  { %v1411_v3 = vsel %vm1409_vm8, %v1394_v0, %v1152_v5  ;;  %v4690_v5 = vld [vmem:[#allocation2 + $0x100] sm:$0xff] }
 0x2b2   :  { %v1428_v15 = vsel %vm1426_vm9, %v1411_v3, %v1216_v7 }
 0x2b4   :  { %853 = vrot.lane.b32.xlu1 %v4621_v58, %s3314_s9 }
 0x2b5   :  { %843 = vrot.lane.b32.xlu0 %v738_v49, %s3314_s9 }
 0x2b6   :  { %1097 = vrot.lane.b32.xlu2 %v802_v10, %s3321_s29  ;;  %v834_v37 = vpop.permute.xlu1 %833 }
 0x2b7   :  { %v1280_v11 = vpop.permute.xlu0 %1279  ;;  %v1327_v53 = vsel %vm527_vm4, %v4490_v18, %v834_v37 }
 0x2b8   :  { %v1218_v42 = vpop.permute.xlu2 %1217  ;;  %v1445_v33 = vsel %vm1443_vm10, %v1428_v15, %v1280_v11  ;;  %v1344_v1 = vsel %vm5666_vm13, %v1327_v53, %v898_v32  ;;  %v4682_v32 = vld [vmem:[#allocation2 + $0xc0] sm:$0xff]  ;;  %vm5674_vm13 = vmmov %vm5670_vm2 }
 0x2b9   :  { %2941 = vmatmul.msk.f32.gmra.mxu0 %vm1469_vm11, %v1445_v33  ;;  %v793_v11 = vld [vmem:[#allocation2 + $0x101] sm:$0xff] }
 0x2bc   :  { %1037 = vrot.lane.b32.xlu1 %v740_v41, %s3322_s30 }
 0x2bd   :  { %1035 = vrot.lane.b32.xlu0 %v787_v14, %s3322_s30  ;;  %v4664_v14 = vld [vmem:[#allocation2 + $0xf2] sm:$0xff] }
 0x2be   :  { %1289 = vrot.lane.b32.xlu2 %v755_v62, %s3319_s20  ;;  %v1026_v52 = vpop.permute.xlu1 %1025 }
 0x2bf   :  { %v962_v16 = vpop.permute.xlu0 %961 }
 0x2c0   :  { %v836_v34 = vpop.permute.xlu2 %835  ;;  %v1361_v43 = vsel %vm1358_vm0, %v1344_v1, %v962_v16 }
 0x2c1   :  { %v1378_v27 = vsel %vm1375_vm1, %v1361_v43, %v1026_v52  ;;  %v1328_v46 = vsel %vm527_vm4, %v4504_v44, %v836_v34 }
 0x2c2   :  { %v1395_v56 = vsel %vm1392_vm7, %v1378_v27, %v1090_v48  ;;  %v4716_v27 = vld [vmem:[#allocation2 + $0xd0] sm:$0xff] }
 0x2c4   :  { %1045 = vrot.lane.b32.xlu1 %v4640_v31, %s3322_s30 }
 0x2c5   :  { %917 = vrot.lane.b32.xlu0 %v4638_v6, %s3317_s18 }
 0x2c6   :  { %971 = vrot.lane.b32.xlu2 %v771_v57, %s3323_s10  ;;  %v1154_v18 = vpop.permute.xlu1 %1153 }
 0x2c7   :  { %v1282_v39 = vpop.permute.xlu0 %1281  ;;  %v1412_v40 = vsel %vm1409_vm8, %v1395_v56, %v1154_v18  ;;  %v4718_v18 = vld [vmem:[#allocation2 + $0xd2] sm:$0xff] }
 0x2c8   :  { %v1028_v26 = vpop.permute.xlu2 %1027  ;;  %v1429_v24 = vsel %vm1426_vm9, %v1412_v40, %v1218_v42 }
 0x2c9   :  { %v1446_v49 = vsel %vm1443_vm10, %v1429_v24, %v1282_v39 }
 0x2ca   :  { %2942 = vmatmul.msk.f32.gmra.mxu0 %vm1469_vm11, %v1446_v49  ;;  %v4729_v49 = vld [vmem:[#allocation2 + $0x110] sm:$0xff] }
 0x2cc   :  { %1229 = vrot.lane.b32.xlu1 %v4652_v51, %s3318_s19 }
 0x2cd   :  { %1101 = vrot.lane.b32.xlu0 %v756_v50, %s3321_s29 }
 0x2ce   :  { %973 = vrot.lane.b32.xlu2 %v4654_v60, %s3323_s10  ;;  %v964_v4 = vpop.permute.xlu1 %963 }
 0x2cf   :  { %v900_v36 = vpop.permute.xlu0 %899 }
 0x2d0   :  { %v1220_v30 = vpop.permute.xlu2 %1219  ;;  %v1345_v10 = vsel %vm5667_vm14, %v1328_v46, %v900_v36  ;;  %vm5675_vm14 = vmmov %vm5670_vm2 }
 0x2d1   :  { %v1362_v23 = vsel %vm1358_vm0, %v1345_v10, %v964_v4 }
 0x2d2   :  { %v1379_v44 = vsel %vm1375_vm1, %v1362_v23, %v1028_v26  ;;  %v794_v23 = vld [vmem:[#allocation2 + $0x111] sm:$0xff] }
 0x2d4   :  { %847 = vrot.lane.b32.xlu1 %v740_v41, %s3314_s9 }
 0x2d5   :  { %1109 = vrot.lane.b32.xlu0 %v4664_v14, %s3321_s29 }
 0x2d6   :  { %981 = vrot.lane.b32.xlu2 %v4670_v25, %s3323_s10  ;;  %v1156_v59 = vpop.permute.xlu1 %1155 }
 0x2d7   :  { %v1092_v55 = vpop.permute.xlu0 %1091 }
 0x2d8   :  { %v838_v7 = vpop.permute.xlu2 %837  ;;  %v1396_v19 = vsel %vm1392_vm7, %v1379_v44, %v1092_v55 }
 0x2d9   :  { %v1413_v63 = vsel %vm1409_vm8, %v1396_v19, %v1156_v59  ;;  %v1329_v0 = vsel %vm527_vm4, %v4522_v61, %v838_v7  ;;  %v790_v59 = vld [vmem:[#allocation2 + $0xd1] sm:$0xff] }
 0x2da   :  { %v1430_v57 = vsel %vm1426_vm9, %v1413_v63, %v1220_v30 }
 0x2dc   :  { %1301 = vrot.lane.b32.xlu1 %v4677_v47, %s3319_s20 }
 0x2dd   :  { %1293 = vrot.lane.b32.xlu0 %v805_v20, %s3319_s20 }
 0x2de   :  { %1165 = vrot.lane.b32.xlu2 %v4682_v32, %s3320_s23  ;;  %v966_v45 = vpop.permute.xlu1 %965 }
 0x2df   :  { %v1284_v21 = vpop.permute.xlu0 %1283 }
 0x2e0   :  { %v1030_v62 = vpop.permute.xlu2 %1029  ;;  %v1447_v54 = vsel %vm1443_vm10, %v1430_v57, %v1284_v21 }
 0x2e1   :  { %2943 = vmatmul.msk.f32.gmra.mxu0 %vm1469_vm11, %v1447_v54 }
 0x2e4   :  { %919 = vrot.lane.b32.xlu1 %v4664_v14, %s3317_s18 }
 0x2e5   :  { %911 = vrot.lane.b32.xlu0 %v756_v50, %s3317_s18 }
 0x2e6   :  { %1173 = vrot.lane.b32.xlu2 %v4690_v5, %s3320_s23  ;;  %v1158_v12 = vpop.permute.xlu1 %1157 }
 0x2e7   :  { %v902_v48 = vpop.permute.xlu0 %901 }
 0x2e8   :  { %v1222_v17 = vpop.permute.xlu2 %1221  ;;  %v1346_v3 = vsel %vm5668_vm15, %v1329_v0, %v902_v48  ;;  %vm5676_vm15 = vmmov %vm5670_vm2 }
 0x2e9   :  { %v1363_v37 = vsel %vm1358_vm0, %v1346_v3, %v966_v45 }
 0x2ea   :  { %v1380_v41 = vsel %vm1375_vm1, %v1363_v37, %v1030_v62 }
 0x2ec   :  { %1103 = vrot.lane.b32.xlu1 %v805_v20, %s3321_s29 }
 0x2ed   :  { %975 = vrot.lane.b32.xlu0 %v4682_v32, %s3323_s10 }
 0x2ee   :  { %1237 = vrot.lane.b32.xlu2 %v793_v11, %s3318_s19  ;;  %v968_v15 = vpop.permute.xlu1 %967 }
 0x2ef   :  { %v1094_v42 = vpop.permute.xlu0 %1093 }
 0x2f0   :  { %v840_v33 = vpop.permute.xlu2 %839  ;;  %v1397_v53 = vsel %vm1392_vm7, %v1380_v41, %v1094_v42  ;;  %v4767_v42 = vld [vmem:[#allocation2 + $0x120] sm:$0xff] }
 0x2f1   :  { %v1414_v61 = vsel %vm1409_vm8, %v1397_v53, %v1158_v12  ;;  %v1330_v26 = vsel %vm527_vm4, %v4534_v35, %v840_v33  ;;  %v4755_v12 = vld [vmem:[#allocation2 + $0xe0] sm:$0xff] }
 0x2f2   :  { %v1431_v34 = vsel %vm1426_vm9, %v1414_v61, %v1222_v17 }
 0x2f4   :  { %1111 = vrot.lane.b32.xlu1 %v4677_v47, %s3321_s29 }
 0x2f5   :  { %983 = vrot.lane.b32.xlu0 %v4690_v5, %s3323_s10 }
 0x2f6   :  { %855 = vrot.lane.b32.xlu2 %v4640_v31, %s3314_s9  ;;  %v1160_v52 = vpop.permute.xlu1 %1159 }
 0x2f7   :  { %v1286_v16 = vpop.permute.xlu0 %1285 }
 0x2f8   :  { %v1032_v1 = vpop.permute.xlu2 %1031  ;;  %v1448_v43 = vsel %vm1443_vm10, %v1431_v34, %v1286_v16 }
 0x2f9   :  { %2944 = vmatmul.msk.f32.gmra.mxu0 %vm1469_vm11, %v1448_v43 }
 0x2fc   :  { %1295 = vrot.lane.b32.xlu1 %v4718_v18, %s3319_s20 }
 0x2fd   :  { %1167 = vrot.lane.b32.xlu0 %v4716_v27, %s3320_s23 }
 0x2fe   :  { %1039 = vrot.lane.b32.xlu2 %v4652_v51, %s3322_s30  ;;  %v842_v56 = vpop.permute.xlu1 %841 }
 0x2ff   :  { %v904_v39 = vpop.permute.xlu0 %903  ;;  %v1331_v21 = vsel %vm527_vm4, %v4553_v29, %v842_v56 }
 0x300   :  { %v1224_v40 = vpop.permute.xlu2 %1223  ;;  %v1347_v24 = vsel %vm5669_vm6, %v1330_v26, %v904_v39  ;;  %vm5677_vm6 = vmmov %vm5670_vm2 }
 0x301   :  { %v1364_v50 = vsel %vm1358_vm0, %v1347_v24, %v968_v15 }
 0x302   :  { %v1381_v46 = vsel %vm1375_vm1, %v1364_v50, %v1032_v1 }
 0x304   :  { %913 = vrot.lane.b32.xlu1 %v805_v20, %s3317_s18 }
 0x305   :  { %1175 = vrot.lane.b32.xlu0 %v4729_v49, %s3320_s23 }
 0x306   :  { %1047 = vrot.lane.b32.xlu2 %v793_v11, %s3322_s30  ;;  %v1034_v4 = vpop.permute.xlu1 %1033 }
 0x307   :  { %v1096_v36 = vpop.permute.xlu0 %1095 }
 0x308   :  { %v906_v30 = vpop.permute.xlu2 %905  ;;  %v1398_v35 = vsel %vm1392_vm7, %v1381_v46, %v1096_v36  ;;  %v811_v36 = vld [vmem:[#allocation2 + $0x122] sm:$0xff] }
 0x309   :  { %v1415_v10 = vsel %vm1409_vm8, %v1398_v35, %v1160_v52  ;;  %v1348_v62 = vsel %vm5670_vm2, %v1331_v21, %v906_v30  ;;  %v795_v52 = vld [vmem:[#allocation2 + $0x121] sm:$0xff] }
 0x30a   :  { %v1432_v44 = vsel %vm1426_vm9, %v1415_v10, %v1224_v40 }
 0x30c   :  { %977 = vrot.lane.b32.xlu1 %v4716_v27, %s3323_s10 }
 0x30d   :  { %1239 = vrot.lane.b32.xlu0 %v794_v23, %s3318_s19 }
 0x30e   :  { %1231 = vrot.lane.b32.xlu2 %v790_v59, %s3318_s19  ;;  %v1226_v55 = vpop.permute.xlu1 %1225 }
 0x30f   :  { %v1288_v7 = vpop.permute.xlu0 %1287 }
 0x310   :  { %v1098_v19 = vpop.permute.xlu2 %1097  ;;  %v1449_v63 = vsel %vm1443_vm10, %v1432_v44, %v1288_v7 }
 0x311   :  { %2945 = vmatmul.msk.f32.gmra.mxu0 %vm1469_vm11, %v1449_v63 }
 0x314   :  { %985 = vrot.lane.b32.xlu1 %v4729_v49, %s3323_s10 }
 0x315   :  { %857 = vrot.lane.b32.xlu0 %v793_v11, %s3314_s9 }
 0x316   :  { %849 = vrot.lane.b32.xlu2 %v4652_v51, %s3314_s9  ;;  %v908_v20 = vpop.permute.xlu1 %907  ;;  %v810_v51 = vld [vmem:[#allocation2 + $0x112] sm:$0xff] }
 0x317   :  { %v970_v45 = vpop.permute.xlu0 %969 }
 0x318   :  { %v1290_v57 = vpop.permute.xlu2 %1289  ;;  %v1365_v54 = vsel %vm1358_vm0, %v1348_v62, %v970_v45 }
 0x319   :  { %v1382_v48 = vsel %vm1375_vm1, %v1365_v54, %v1034_v4 }
 0x31a   :  { %v1399_v29 = vsel %vm1392_vm7, %v1382_v48, %v1098_v19 }
 0x31c   :  { %1169 = vrot.lane.b32.xlu1 %v4755_v12, %s3320_s23 }
 0x31d   :  { %1041 = vrot.lane.b32.xlu0 %v790_v59, %s3322_s30 }
 0x31e   :  { %1303 = vrot.lane.b32.xlu2 %v810_v51, %s3319_s20  ;;  %v1100_v17 = vpop.permute.xlu1 %1099 }
 0x31f   :  { %v1162_v3 = vpop.permute.xlu0 %1161 }
 0x320   :  { %v972_v0 = vpop.permute.xlu2 %971  ;;  %v1416_v37 = vsel %vm1409_vm8, %v1399_v29, %v1162_v3 }
 0x321   :  { %v1433_v11 = vsel %vm1426_vm9, %v1416_v37, %v1226_v55  ;;  %v780_v37 = vld [vmem:[#allocation2 + $0x130] sm:$0xff] }
 0x322   :  { %v1450_v15 = vsel %vm1443_vm10, %v1433_v11, %v1290_v57 }
 0x323   :  { %2946 = vmatmul.msk.f32.gmra.mxu0 %vm1469_vm11, %v1450_v15 }
 0x324   :  { %1177 = vrot.lane.b32.xlu1 %v4767_v42, %s3320_s23 }
 0x325   :  { %1049 = vrot.lane.b32.xlu0 %v794_v23, %s3322_s30 }
 0x326   :  { %921 = vrot.lane.b32.xlu2 %v4677_v47, %s3317_s18  ;;  %v854_v33 = vpop.permute.xlu1 %853 }
 0x327   :  { %v844_v53 = vpop.permute.xlu0 %843  ;;  %v1337_v46 = vsel %vm527_vm4, %v4755_v12, %v854_v33 }
 0x328   :  { %v974_v41 = vpop.permute.xlu2 %973  ;;  %v1332_v61 = vsel %vm527_vm4, %v4581_v8, %v844_v53 }
 0x329   :  { %v1349_v16 = vsel %vm5671_vm5, %v1332_v61, %v908_v20  ;;  %vm5678_vm5 = vmmov %vm5670_vm2 }
 0x32a   :  { %v1366_v47 = vsel %vm1358_vm0, %v1349_v16, %v972_v0 }
 0x32c   :  { %1241 = vrot.lane.b32.xlu1 %v795_v52, %s3318_s19 }
 0x32d   :  { %1233 = vrot.lane.b32.xlu0 %v4621_v58, %s3318_s19 }
 0x32e   :  { %1105 = vrot.lane.b32.xlu2 %v4718_v18, %s3321_s29  ;;  %v1038_v34 = vpop.permute.xlu1 %1037 }
 0x32f   :  { %v1036_v43 = vpop.permute.xlu0 %1035 }
 0x330   :  { %v982_v1 = vpop.permute.xlu2 %981  ;;  %v1383_v56 = vsel %vm1375_vm1, %v1366_v47, %v1036_v43 }
 0x331   :  { %v1400_v8 = vsel %vm1392_vm7, %v1383_v56, %v1100_v17 }
 0x332   :  { %v1417_v39 = vsel %vm1409_vm8, %v1400_v8, %v4146_v22 }
 0x333   :  { %v1434_v40 = vsel %vm1426_vm9, %v1417_v39, %v4187_v28 }
 0x334   :  { %859 = vrot.lane.b32.xlu1 %v794_v23, %s3314_s9  ;;  %v1451_v26 = vsel %vm1443_vm10, %v1434_v40, %v4185_v9  ;;  %v676_v9 = vld [vmem:[#allocation2 + $0xa0] sm:$0xff] }
 0x335   :  { %851 = vrot.lane.b32.xlu0 %v790_v59, %s3314_s9  ;;  %2947 = vmatmul.msk.f32.gmra.mxu0 %vm1469_vm11, %v1451_v26  ;;  %v1333_v10 = vsel %vm527_vm4, %v676_v9, %v4175_v13 }
 0x336   :  { %1113 = vrot.lane.b32.xlu2 %v810_v51, %s3321_s29  ;;  %v1046_v24 = vpop.permute.xlu1 %1045 }
 0x337   :  { %v918_v4 = vpop.permute.xlu0 %917 }
 0x338   :  { %v1166_v50 = vpop.permute.xlu2 %1165  ;;  %v1354_v35 = vsel %vm5672_vm3, %v1337_v46, %v918_v4 }
 0x339   :  { %v1371_v23 = vsel %vm1358_vm0, %v1354_v35, %v982_v1 }
 0x33a   :  { %v1388_v44 = vsel %vm1375_vm1, %v1371_v23, %v1046_v24 }
 0x33c   :  { %1043 = vrot.lane.b32.xlu1 %v4621_v58, %s3322_s30  ;;  %v1350_v58 = vsel %vm5673_vm12, %v1333_v10, %v4193_v38 }
 0x33d   :  { %1305 = vrot.lane.b32.xlu0 %v811_v36, %s3319_s20  ;;  %v1367_v55 = vsel %vm1358_vm0, %v1350_v58, %v974_v41 }
 0x33e   :  { %1297 = vrot.lane.b32.xlu2 %v4638_v6, %s3319_s20  ;;  %v1230_v22 = vpop.permute.xlu1 %1229  ;;  %v1384_v13 = vsel %vm1375_vm1, %v1367_v55, %v1038_v34 }
 0x33f   :  { %v1102_v30 = vpop.permute.xlu0 %1101 }
 0x340   :  { %v1174_v28 = vpop.permute.xlu2 %1173  ;;  %v1401_v20 = vsel %vm1392_vm7, %v1384_v13, %v1102_v30 }
 0x344   :  { %1051 = vrot.lane.b32.xlu1 %v795_v52, %s3322_s30 }
 0x345   :  { %923 = vrot.lane.b32.xlu0 %v810_v51, %s3317_s18 }
 0x346   :  { %915 = vrot.lane.b32.xlu2 %v4718_v18, %s3317_s18  ;;  %v848_v59 = vpop.permute.xlu1 %847  ;;  %v1418_v18 = vsel %vm1409_vm8, %v1401_v20, %v1166_v50 }
 0x347   :  { %v1110_v19 = vpop.permute.xlu0 %1109  ;;  %v1435_v54 = vsel %vm1426_vm9, %v1418_v18, %v1230_v22  ;;  %v1334_v15 = vsel %vm527_vm4, %v4654_v60, %v848_v59 }
 0x348   :  { %v1238_v7 = vpop.permute.xlu2 %1237  ;;  %v1405_v63 = vsel %vm1392_vm7, %v1388_v44, %v1110_v19 }
 0x349   :  { %v1422_v45 = vsel %vm1409_vm8, %v1405_v63, %v1174_v28 }
 0x34a   :  { %v1439_v21 = vsel %vm1426_vm9, %v1422_v45, %v1238_v7 }
 0x34c   :  { %1235 = vrot.lane.b32.xlu1 %v4640_v31, %s3318_s19 }
 0x34d   :  { %1107 = vrot.lane.b32.xlu0 %v4638_v6, %s3321_s29  ;;  %v796_v6 = vld [vmem:[#allocation2 + $0x131] sm:$0xff] }
 0x34e   :  { %979 = vrot.lane.b32.xlu2 %v4755_v12, %s3323_s10  ;;  %v1302_v38 = vpop.permute.xlu1 %1301 }
 0x34f   :  { %v1294_v62 = vpop.permute.xlu0 %1293  ;;  %v1456_v48 = vsel %vm1443_vm10, %v1439_v21, %v1302_v38 }
 0x350   :  { %v856_v57 = vpop.permute.xlu2 %855  ;;  %v1452_v51 = vsel %vm1443_vm10, %v1435_v54, %v1294_v62  ;;  %2952 = vmatmul.msk.f32.vlgmr.msra.gmra.mxu3 %vm1469_vm11, %v1456_v48 }
 0x351   :  { %2948 = vmatmul.msk.f32.gmra.mxu0 %vm1469_vm11, %v1452_v51  ;;  %v1338_v56 = vsel %vm527_vm4, %v4670_v25, %v856_v57 }
 0x354   :  { %1243 = vrot.lane.b32.xlu1 %v796_v6, %s3318_s19 }
 0x355   :  { %1115 = vrot.lane.b32.xlu0 %v811_v36, %s3321_s29 }
 0x356   :  { %987 = vrot.lane.b32.xlu2 %v4767_v42, %s3323_s10  ;;  %v920_v31 = vpop.permute.xlu1 %919 }
 0x357   :  { %v912_v17 = vpop.permute.xlu0 %911  ;;  %v1355_v39 = vsel %vm5675_vm14, %v1338_v56, %v920_v31 }
 0x358   :  { %v1040_v12 = vpop.permute.xlu2 %1039  ;;  %v1351_v41 = vsel %vm5674_vm13, %v1334_v15, %v912_v17 }
 0x35d   :  { %1299 = vrot.lane.b32.xlu0 %v4664_v14, %s3319_s20  ;;  %v812_v14 = vld [vmem:[#allocation2 + $0x132] sm:$0xff] }
 0x35e   :  { %1171 = vrot.lane.b32.xlu2 %v4670_v25, %s3320_s23  ;;  %v1104_v0 = vpop.permute.xlu1 %1103 }
 0x35f   :  { %v976_v3 = vpop.permute.xlu0 %975 }
 0x360   :  { %v1048_v29 = vpop.permute.xlu2 %1047  ;;  %v1368_v53 = vsel %vm1358_vm0, %v1351_v41, %v976_v3 }
 0x361   :  { %v1385_v61 = vsel %vm1375_vm1, %v1368_v53, %v1040_v12 }
 0x362   :  { %v1402_v34 = vsel %vm1392_vm7, %v1385_v61, %v1104_v0 }
 0x366   :  { %1179 = vrot.lane.b32.xlu2 %v780_v37, %s3320_s23  ;;  %v1112_v11 = vpop.permute.xlu1 %1111 }
 0x367   :  { %v984_v33 = vpop.permute.xlu0 %983 }
 0x368   :  { %v1232_v42 = vpop.permute.xlu2 %1231  ;;  %v1372_v24 = vsel %vm1358_vm0, %v1355_v39, %v984_v33 }
 0x369   :  { %v1389_v50 = vsel %vm1375_vm1, %v1372_v24, %v1048_v29 }
 0x36a   :  { %v1406_v4 = vsel %vm1392_vm7, %v1389_v50, %v1112_v11 }
 0x36e   :  { %1307 = vrot.lane.b32.xlu2 %v812_v14, %s3319_s20  ;;  %v1296_v52 = vpop.permute.xlu1 %1295 }
 0x36f   :  { %v1168_v1 = vpop.permute.xlu0 %1167 }
 0x370   :  { %v850_v16 = vpop.permute.xlu2 %849  ;;  %v1419_v47 = vsel %vm1409_vm8, %v1402_v34, %v1168_v1 }
 0x371   :  { %v1436_v60 = vsel %vm1426_vm9, %v1419_v47, %v1232_v42  ;;  %v1335_v55 = vsel %vm527_vm4, %v4682_v32, %v850_v16 }
 0x372   :  { %v1453_v43 = vsel %vm1443_vm10, %v1436_v60, %v1296_v52 }
 0x373   :  { %2949 = vmatmul.msk.f32.gmra.mxu0 %vm1469_vm11, %v1453_v43 }
 0x376   :  { %v914_v8 = vpop.permute.xlu1 %913 }
 0x377   :  { %v1176_v26 = vpop.permute.xlu0 %1175  ;;  %v1352_v44 = vsel %vm5676_vm15, %v1335_v55, %v914_v8 }
 0x378   :  { %v1304_v40 = vpop.permute.xlu2 %1303  ;;  %v1423_v22 = vsel %vm1409_vm8, %v1406_v4, %v1176_v26 }
 0x37e   :  { %v978_v36 = vpop.permute.xlu1 %977 }
 0x37f   :  { %v1240_v30 = vpop.permute.xlu0 %1239  ;;  %v1369_v63 = vsel %vm1358_vm0, %v1352_v44, %v978_v36 }
 0x380   :  { %v922_v28 = vpop.permute.xlu2 %921  ;;  %v1440_v9 = vsel %vm1426_vm9, %v1423_v22, %v1240_v30  ;;  %v4901_v30 = vpop.f32.mrf.mxu0 }
 0x381   :  { %v1457_v25 = vsel %vm1443_vm10, %v1440_v9, %v1304_v40 }
 0x382   :  { %2953 = vmatmul.msk.f32.gmra.mxu3 %vm1469_vm11, %v1457_v25 }
 0x386   :  { %v986_v46 = vpop.permute.xlu1 %985 }
 0x387   :  { %v858_v10 = vpop.permute.xlu0 %857 }
 0x388   :  { %v1106_v35 = vpop.permute.xlu2 %1105  ;;  %v1339_v32 = vsel %vm527_vm4, %v4690_v5, %v858_v10  ;;  %v4903_v9 = vpop.f32.mrf.mxu0 }
 0x389   :  { %v1356_v48 = vsel %vm5677_vm6, %v1339_v32, %v922_v28 }
 0x38a   :  { %v1373_v6 = vsel %vm1358_vm0, %v1356_v48, %v986_v46 }
 0x38e   :  { %v1170_v23 = vpop.permute.xlu1 %1169 }
 0x38f   :  { %v1042_v59 = vpop.permute.xlu0 %1041 }
 0x390   :  { %v1114_v58 = vpop.permute.xlu2 %1113  ;;  %v1386_v20 = vsel %vm1375_vm1, %v1369_v63, %v1042_v59  ;;  %v4905_v25 = vpop.f32.mrf.mxu0 }
 0x391   :  { %v1403_v45 = vsel %vm1392_vm7, %v1386_v20, %v1106_v35 }
 0x392   :  { %v1420_v21 = vsel %vm1409_vm8, %v1403_v45, %v1170_v23 }
 0x396   :  { %v1178_v7 = vpop.permute.xlu1 %1177 }
 0x397   :  { %v1050_v13 = vpop.permute.xlu0 %1049 }
 0x398   :  { %v1298_v19 = vpop.permute.xlu2 %1297  ;;  %v1390_v17 = vsel %vm1375_vm1, %v1373_v6, %v1050_v13  ;;  %v4907_v46 = vpop.f32.mrf.mxu0 }
 0x399   :  { %v1407_v0 = vsel %vm1392_vm7, %v1390_v17, %v1114_v58 }
 0x39a   :  { %v1424_v29 = vsel %vm1409_vm8, %v1407_v0, %v1178_v7 }
 0x39e   :  { %v1242_v18 = vpop.permute.xlu1 %1241 }
 0x39f   :  { %v1234_v57 = vpop.permute.xlu0 %1233  ;;  %v1441_v5 = vsel %vm1426_vm9, %v1424_v29, %v1242_v18  ;;  %v3324_v29 = vmov 128.0  }
 0x3a0   :  { %v916_v38 = vpop.permute.xlu2 %915  ;;  %v1437_v62 = vsel %vm1426_vm9, %v1420_v21, %v1234_v57  ;;  %v4909_v35 = vpop.f32.mrf.mxu0  ;;  %3282 = vrcp.f32 %v3324_v29 }
 0x3a1   :  { %v1454_v54 = vsel %vm1443_vm10, %v1437_v62, %v1298_v19 }
 0x3a2   :  { %2950 = vmatmul.msk.f32.gmra.mxu0 %vm1469_vm11, %v1454_v54 }
 0x3a6   :  { %v860_v51 = vpop.permute.xlu1 %859 }
 0x3a7   :  { %v852_v12 = vpop.permute.xlu0 %851  ;;  %v1340_v52 = vsel %vm527_vm4, %v4729_v49, %v860_v51 }
 0x3a8   :  { %v980_v31 = vpop.permute.xlu2 %979  ;;  %v1336_v16 = vsel %vm527_vm4, %v4716_v27, %v852_v12  ;;  %v4911_v10 = vpop.f32.mrf.mxu0  ;;  %vm5679_vm4 = vmmov %vm5670_vm2 }
 0x3a9   :  { %v1353_v1 = vsel %vm5678_vm5, %v1336_v16, %v916_v38  ;;  %v1584_v55 = vsel %vm5679_vm4, %v4903_v9, 0.0 }
 0x3aa   :  { %v1370_v60 = vsel %vm1358_vm0, %v1353_v1, %v980_v31 }
 0x3ae   :  { %v1044_v3 = vpop.permute.xlu1 %1043 }
 0x3af   :  { %v1306_v11 = vpop.permute.xlu0 %1305  ;;  %v1387_v39 = vsel %vm1375_vm1, %v1370_v60, %v1044_v3 }
 0x3b0   :  { %v988_v37 = vpop.permute.xlu2 %987  ;;  %v1458_v15 = vsel %vm1443_vm10, %v1441_v5, %v1306_v11  ;;  %v4913_v23 = vpop.f32.mrf.mxu0 }
 0x3b1   :  { %2954 = vmatmul.msk.f32.gmra.mxu3 %vm1469_vm11, %v1458_v15 }
 0x3b6   :  { %v1052_v42 = vpop.permute.xlu1 %1051 }
 0x3b7   :  { %v924_v41 = vpop.permute.xlu0 %923 }
 0x3b8   :  { %v1172_v33 = vpop.permute.xlu2 %1171  ;;  %v1357_v34 = vsel %vm5670_vm2, %v1340_v52, %v924_v41  ;;  %v4915_v58 = vpop.f32.mrf.mxu0 }
 0x3b9   :  { %v1374_v47 = vsel %vm1358_vm0, %v1357_v34, %v988_v37  ;;  %vm5680_vm0 = vmmov %vm5670_vm2 }
 0x3ba   :  { %v1391_v43 = vsel %vm1375_vm1, %v1374_v47, %v1052_v42  ;;  %v1583_v7 = vsel %vm5680_vm0, %v4901_v30, 0.0  ;;  %vm5684_vm3 = vmmov %vm5680_vm0 }
 0x3bb   :  { %v1585_v19 = vadd.f32 %v1584_v55, %v1583_v7  ;;  %v1592_v21 = vsel %vm5684_vm3, %v4911_v10, 0.0  ;;  %vm5685_vm12 = vmmov %vm5680_vm0 }
 0x3bc   :  { %v1594_v62 = vsel %vm5685_vm12, %v4913_v23, 0.0  ;;  %vm5686_vm13 = vmmov %vm5680_vm0 }
 0x3bd   :  { %v1596_v48 = vsel %vm5686_vm13, %v4915_v58, 0.0  ;;  %vm5687_vm14 = vmmov %vm5680_vm0 }
 0x3be   :  { %v1236_v53 = vpop.permute.xlu1 %1235  ;;  %vm5688_vm15 = vmmov %vm5680_vm0 }
 0x3bf   :  { %v1108_v14 = vpop.permute.xlu0 %1107  ;;  %vm5689_vm6 = vmmov %vm5680_vm0 }
 0x3c0   :  { %v1180_v61 = vpop.permute.xlu2 %1179  ;;  %v1404_v26 = vsel %vm1392_vm7, %v1387_v39, %v1108_v14  ;;  %vm5690_vm2 = vmmov %vm5680_vm0 }
 0x3c1   :  { %v1421_v4 = vsel %vm1409_vm8, %v1404_v26, %v1172_v33  ;;  %v3283_v33 = vpop.eup %3282  ;;  %vm5691_vm5 = vmmov %vm5680_vm0 }
 0x3c2   :  { %v1438_v22 = vsel %vm1426_vm9, %v1421_v4, %v1236_v53  ;;  %vm5692_vm4 = vmmov %vm5680_vm0  ;;  %v1621_v52 = vmul.f32 128.0, %v3283_v33 }
 0x3c3   :  { %vm5695_vm3 = vmmov %vm5680_vm0 }
 0x3c4   :  { %vm5696_vm12 = vmmov %vm5680_vm0 }
 0x3c5   :  { %vm5697_vm13 = vmmov %vm5680_vm0 }
 0x3c6   :  { %v1244_v8 = vpop.permute.xlu1 %1243 }
 0x3c7   :  { %v1116_v56 = vpop.permute.xlu0 %1115 }
 0x3c8   :  { %v1408_v40 = vsel %vm1392_vm7, %v1391_v43, %v1116_v56  ;;  %v1308_v49 = vpop.permute.xlu2 %1307  ;;  %vm5681_vm7 = vmmov %vm5680_vm0  ;;  %v1622_v43 = vsub.f32 1.0, %v1621_v52 }
 0x3c9   :  { %v1425_v27 = vsel %vm1409_vm8, %v1408_v40, %v1180_v61  ;;  %v1586_v44 = vsel %vm5681_vm7, %v4905_v25, 0.0  ;;  %vm5693_vm7 = vmmov %vm5680_vm0 }
 0x3ca   :  { %v1442_v24 = vsel %vm1426_vm9, %v1425_v27, %v1244_v8  ;;  %vm5682_vm9 = vmmov %vm5680_vm0  ;;  %v1587_v20 = vadd.f32 %v1586_v44, %v1585_v19  ;;  %v1623_v39 = vmul.f32 %v3283_v33, %v1622_v43 }
 0x3cb   :  { %v1459_v50 = vsel %vm1443_vm10, %v1442_v24, %v1308_v49  ;;  %v1588_v63 = vsel %vm5682_vm9, %v4907_v46, 0.0  ;;  %vm1625_vm9 = vweird.f32 %v3283_v33 }
 0x3cc   :  { %2955 = vmatmul.msk.f32.gmra.mxu3 %vm1469_vm11, %v1459_v50  ;;  %v1589_v38 = vadd.f32 %v1588_v63, %v1587_v20  ;;  %v1624_v26 = vadd.f32 %v3283_v33, %v1623_v39 }
 0x3ce   :  { %v4917_v59 = vpop.f32.mrf.mxu0  ;;  %v4962_v50 = vsel %vm1625_vm9, %v3283_v33, %v1624_v26  ;;  %vm5705_vm9 = vmmov %vm5680_vm0 }
 0x3cf   :  { %v1300_v36 = vpop.permute.xlu0 %1299  ;;  %v1598_v31 = vsel %vm5687_vm14, %v4917_v59, 0.0  ;;  %vm5698_vm14 = vmmov %vm5680_vm0 }
 0x3d0   :  { %v1455_v28 = vsel %vm1443_vm10, %v1438_v22, %v1300_v36 }
 0x3d1   :  { %2951 = vmatmul.msk.f32.gmra.mxu0 %vm1469_vm11, %v1455_v28  ;;  %vm5683_vm11 = vmmov %vm5680_vm0 }
 0x3d2   :  { %v1590_v18 = vsel %vm5683_vm11, %v4909_v35, 0.0  ;;  %vm5694_vm11 = vmmov %vm5680_vm0 }
 0x3d3   :  { %v4925_v13 = vpop.f32.mrf.mxu3  ;;  %v1591_v57 = vadd.f32 %v1590_v18, %v1589_v38 }
 0x3d4   :  { %v1606_v53 = vsel %vm5691_vm5, %v4925_v13, 0.0  ;;  %vm5702_vm5 = vmmov %vm5680_vm0 }
 0x3d5   :  { %v1593_v32 = vadd.f32 %v1592_v21, %v1591_v57 }
 0x3d7   :  { %v1595_v51 = vadd.f32 %v1594_v62, %v1593_v32 }
 0x3d9   :  { %v1597_v12 = vadd.f32 %v1596_v48, %v1595_v51 }
 0x3db   :  { %v1599_v0 = vadd.f32 %v1598_v31, %v1597_v12 }
 0x3f0   :  { %v4929_v45 = vpop.f32.mrf.mxu0 }
 0x3f1   :  { %v1600_v17 = vsel %vm5688_vm15, %v4929_v45, 0.0  ;;  %vm5699_vm15 = vmmov %vm5680_vm0 }
 0x3f2   :  { %v1601_v5 = vadd.f32 %v1600_v17, %v1599_v0 }
 0x405   :  { %v4937_v54 = vpop.f32.mrf.mxu3 }
 0x406   :  { %v1608_v61 = vsel %vm5692_vm4, %v4937_v54, 0.0  ;;  %vm5703_vm4 = vmmov %vm5680_vm0 }
 0x41f   :  { %v4941_v6 = vpop.f32.mrf.mxu0 }
 0x420   :  { %v1602_v3 = vsel %vm5689_vm6, %v4941_v6, 0.0  ;;  %vm5700_vm6 = vmmov %vm5680_vm0 }
 0x421   :  { %v1603_v11 = vadd.f32 %v1602_v3, %v1601_v5 }
 0x434   :  { %v4949_v37 = vpop.f32.mrf.mxu3 }
 0x435   :  { %v1610_v1 = vsel %vm5680_vm0, %v4949_v37, 0.0 }
 0x44e   :  { %v1568_v15 = vpop.f32.mrf.mxu0 }
 0x44f   :  { %v1604_v42 = vsel %vm5690_vm2, %v1568_v15, 0.0  ;;  %v4956_v34 = vpop.f32.mrf.mxu3  ;;  %vm5701_vm2 = vmmov %vm5680_vm0 }
 0x450   :  { %v1605_v41 = vadd.f32 %v1604_v42, %v1603_v11  ;;  %v1612_v60 = vsel %vm5693_vm7, %v4956_v34, 0.0  ;;  %vm5704_vm7 = vmmov %vm5680_vm0 }
 0x452   :  { %v1607_v14 = vadd.f32 %v1606_v53, %v1605_v41 }
 0x454   :  { %v1609_v16 = vadd.f32 %v1608_v61, %v1607_v14 }
 0x456   :  { %v1611_v47 = vadd.f32 %v1610_v1, %v1609_v16 }
 0x458   :  { %v1613_v56 = vadd.f32 %v1612_v60, %v1611_v47 }
 0x45a   :  { %v1614_v8 = vrot.slane %v1613_v56, 4 }
 0x45c   :  { %v1615_v40 = vadd.f32 %v1614_v8, %v1613_v56 }
 0x45e   :  { %v1616_v49 = vrot.slane %v1615_v40, 2 }
 0x460   :  { %v1617_v27 = vadd.f32 %v1616_v49, %v1615_v40 }
 0x462   :  { %v1618_v24 = vrot.slane %v1617_v27, 1 }
 0x464   :  { %v1619_v4 = vadd.f32 %v1618_v24, %v1617_v27 }
 0x466   :  { %v1627_v36 = vmul.f32 %v4962_v50, %v1619_v4 }
 0x468   :  { %v4966_v22 = vsub.f32 %v4901_v30, %v1627_v36  ;;  %v4969_v28 = vsub.f32 %v4903_v9, %v1627_v36  ;;  %v4972_v55 = vsub.f32 %v4905_v25, %v1627_v36  ;;  %v4975_v7 = vsub.f32 %v4907_v46, %v1627_v36 }
 0x469   :  { %v4982_v63 = vsub.f32 %v4909_v35, %v1627_v36  ;;  %v4987_v9 = vsub.f32 %v4911_v10, %v1627_v36  ;;  %v4994_v38 = vsub.f32 %v4913_v23, %v1627_v36  ;;  %v5000_v10 = vsub.f32 %v4915_v58, %v1627_v36 }
 0x46a   :  { %v1644_v44 = vmul.f32 %v4966_v22, %v4966_v22  ;;  %v1645_v19 = vmul.f32 %v4969_v28, %v4969_v28  ;;  %v1646_v30 = vmul.f32 %v4972_v55, %v4972_v55  ;;  %v1647_v25 = vmul.f32 %v4975_v7, %v4975_v7 }
 0x46b   :  { %v1648_v35 = vmul.f32 %v4982_v63, %v4982_v63  ;;  %v1649_v62 = vmul.f32 %v4987_v9, %v4987_v9  ;;  %v5006_v51 = vsub.f32 %v4917_v59, %v1627_v36  ;;  %v1650_v23 = vmul.f32 %v4994_v38, %v4994_v38 }
 0x46c   :  { %v1660_v46 = vsel %vm5694_vm11, %v1644_v44, 0.0  ;;  %v1661_v20 = vsel %vm5695_vm3, %v1645_v19, 0.0  ;;  %v1663_v21 = vsel %vm5696_vm12, %v1646_v30, 0.0  ;;  %v1665_v32 = vsel %vm5697_vm13, %v1647_v25, 0.0  ;;  %vm5706_vm11 = vmmov %vm5680_vm0 }
 0x46d   :  { %v1662_v18 = vadd.f32 %v1661_v20, %v1660_v46  ;;  %v1667_v31 = vsel %vm5698_vm14, %v1648_v35, 0.0  ;;  %v5012_v17 = vsub.f32 %v4929_v45, %v1627_v36  ;;  %v1651_v58 = vmul.f32 %v5000_v10, %v5000_v10  ;;  %vm5707_vm3 = vmmov %vm5680_vm0 }
 0x46e   :  { %v1669_v0 = vsel %vm5699_vm15, %v1649_v62, 0.0  ;;  %v5018_v3 = vsub.f32 %v4941_v6, %v1627_v36  ;;  %v1652_v59 = vmul.f32 %v5006_v51, %v5006_v51  ;;  %v1671_v5 = vsel %vm5700_vm6, %v1650_v23, 0.0  ;;  %vm5708_vm12 = vmmov %vm5680_vm0 }
 0x46f   :  { %v1664_v57 = vadd.f32 %v1663_v21, %v1662_v18  ;;  %v5023_v42 = vsub.f32 %v1568_v15, %v1627_v36  ;;  %v1653_v45 = vmul.f32 %v5012_v17, %v5012_v17  ;;  %v1673_v33 = vsel %vm5701_vm2, %v1651_v58, 0.0  ;;  %v666_v58 = vld [vmem:[%s5656_s2] sm:$0x1]  ;;  %vm5709_vm2 = vmmov %vm5680_vm0 }
 0x470   :  { %v5029_v53 = vsub.f32 %v4925_v13, %v1627_v36  ;;  %v1654_v6 = vmul.f32 %v5018_v3, %v5018_v3  ;;  %v1675_v14 = vsel %vm5702_vm5, %v1652_v59, 0.0  ;;  %v5035_v52 = vsub.f32 %v4937_v54, %v1627_v36  ;;  %vm5710_vm5 = vmmov %vm5680_vm0 }
 0x471   :  { %v1666_v48 = vadd.f32 %v1665_v32, %v1664_v57  ;;  %v1655_v15 = vmul.f32 %v5023_v42, %v5023_v42  ;;  %v1677_v16 = vsel %vm5703_vm4, %v1653_v45, 0.0  ;;  %v5041_v47 = vsub.f32 %v4949_v37, %v1627_v36  ;;  %v5076_v32 = vld [vmem:[%s5658_s4 + $0x88] sm:$0xff]  ;;  %vm5711_vm4 = vmmov %vm5680_vm0 }
 0x472   :  { %v1656_v13 = vmul.f32 %v5029_v53, %v5029_v53  ;;  %v1679_v60 = vsel %vm5680_vm0, %v1654_v6, 0.0  ;;  %v5047_v56 = vsub.f32 %v4956_v34, %v1627_v36  ;;  %v1657_v54 = vmul.f32 %v5035_v52, %v5035_v52  ;;  %2677 = vmatpush.msra.mxu2 %v5076_v32 }
 0x473   :  { %v1668_v12 = vadd.f32 %v1667_v31, %v1666_v48  ;;  %v1681_v8 = vsel %vm5704_vm7, %v1655_v15, 0.0  ;;  %v1658_v40 = vmul.f32 %v5041_v47, %v5041_v47  ;;  %vm1765_vm13 = vcmask 123904   ;;  %v5092_v31 = vld [vmem:[%s5658_s4 + $0x80] sm:$0xff]  ;;  %vm5712_vm7 = vmmov %vm5680_vm0 }
 0x474   :  { %v1683_v37 = vsel %vm5705_vm9, %v1656_v13, 0.0  ;;  %v1659_v26 = vmul.f32 %v5047_v56, %v5047_v56  ;;  %v1685_v27 = vsel %vm5706_vm11, %v1657_v54, 0.0  ;;  %1788 = vst.msk [vmem:[#allocation3 + $0xb8] sm:$0x3] %vm1765_vm13, %v3316_v2  ;;  %2678 = vmatpush.msra.mxu2 %v5092_v31  ;;  %vm5713_vm9 = vmmov %vm5680_vm0 }
 0x475   :  { %v1670_v29 = vadd.f32 %v1669_v0, %v1668_v12  ;;  %v1687_v34 = vsel %vm5707_vm3, %v1658_v40, 0.0  ;;  %1792 = vst.msk [vmem:[#allocation3 + $0xd8] sm:$0x3] %vm1765_vm13, %v3316_v2  ;;  %vm5714_vm11 = vmmov %vm5680_vm0 }
 0x476   :  { %v1689_v36 = vsel %vm5708_vm12, %v1659_v26, 0.0  ;;  %1794 = vst.msk [vmem:[#allocation3 + $0xe8] sm:$0x3] %vm1765_vm13, %v3316_v2  ;;  %vm5715_vm3 = vmmov %vm5680_vm0 }
 0x477   :  { %v1672_v11 = vadd.f32 %v1671_v5, %v1670_v29  ;;  %1796 = vst.msk [vmem:[#allocation3 + $0xf8] sm:$0x3] %vm1765_vm13, %v3316_v2  ;;  %vm5716_vm12 = vmmov %vm5680_vm0 }
 0x478   :  { %1798 = vst.msk [vmem:[#allocation3 + $0x108] sm:$0x3] %vm1765_vm13, %v3316_v2 }
 0x479   :  { %v1674_v41 = vadd.f32 %v1673_v33, %v1672_v11  ;;  %1800 = vst.msk [vmem:[#allocation3 + $0x118] sm:$0x3] %vm1765_vm13, %v3316_v2  ;;  %v3280_v33 = vld [vmem:[%s5657_s3] ss:$0 sm:$0xff]  ;;  %s3325_s3 = smov 80  }
 0x47a   :  { %1802 = vst.msk [vmem:[#allocation3 + $0x128] sm:$0x3] %vm1765_vm13, %v3316_v2 }
 0x47b   :  { %v1676_v61 = vadd.f32 %v1675_v14, %v1674_v41  ;;  %1766 = vst.msk [vmem:[#allocation3 + $0x8] sm:$0x3] %vm1765_vm13, %v3316_v2 }
 0x47c   :  { %1768 = vst.msk [vmem:[#allocation3 + $0x18] sm:$0x3] %vm1765_vm13, %v3316_v2 }
 0x47d   :  { %v1678_v1 = vadd.f32 %v1677_v16, %v1676_v61  ;;  %1770 = vst.msk [vmem:[#allocation3 + $0x28] sm:$0x3] %vm1765_vm13, %v3316_v2 }
 0x47e   :  { %1772 = vst.msk [vmem:[#allocation3 + $0x38] sm:$0x3] %vm1765_vm13, %v3316_v2 }
 0x47f   :  { %v1680_v43 = vadd.f32 %v1679_v60, %v1678_v1  ;;  %1774 = vst.msk [vmem:[#allocation3 + $0x48] sm:$0x3] %vm1765_vm13, %v3316_v2 }
 0x480   :  { %1776 = vst.msk [vmem:[#allocation3 + $0x58] sm:$0x3] %vm1765_vm13, %v3316_v2 }
 0x481   :  { %v1682_v39 = vadd.f32 %v1681_v8, %v1680_v43  ;;  %1778 = vst.msk [vmem:[#allocation3 + $0x68] sm:$0x3] %vm1765_vm13, %v3316_v2 }
 0x482   :  { %1780 = vst.msk [vmem:[#allocation3 + $0x78] sm:$0x3] %vm1765_vm13, %v3316_v2 }
 0x483   :  { %v1684_v49 = vadd.f32 %v1683_v37, %v1682_v39  ;;  %1782 = vst.msk [vmem:[#allocation3 + $0x88] sm:$0x3] %vm1765_vm13, %v3316_v2 }
 0x484   :  { %1784 = vst.msk [vmem:[#allocation3 + $0x98] sm:$0x3] %vm1765_vm13, %v3316_v2 }
 0x485   :  { %v1686_v24 = vadd.f32 %v1685_v27, %v1684_v49  ;;  %1786 = vst.msk [vmem:[#allocation3 + $0xa8] sm:$0x3] %vm1765_vm13, %v3316_v2 }
 0x486   :  { %1790 = vst.msk [vmem:[#allocation3 + $0xc8] sm:$0x3] %vm1765_vm13, %v3316_v2 }
 0x487   :  { %v1688_v4 = vadd.f32 %v1687_v34, %v1686_v24  ;;  %1804 = vst.msk [vmem:[#allocation3 + $0x138] sm:$0x3] %vm1765_vm13, %v3316_v2  ;;  %vm5717_vm13 = vmmov %vm5680_vm0 }
 0x489   :  { %v1690_v44 = vadd.f32 %v1689_v36, %v1688_v4 }
 0x48b   :  { %v1691_v19 = vrot.slane %v1690_v44, 4 }
 0x48d   :  { %v1692_v30 = vadd.f32 %v1691_v19, %v1690_v44  ;;  %v1856_v19 = vld [vmem:[#allocation3 + $0x2] sm:$0xff] }
 0x48f   :  { %v1693_v25 = vrot.slane %v1692_v30, 2 }
 0x491   :  { %v1694_v46 = vadd.f32 %v1693_v25, %v1692_v30 }
 0x493   :  { %v1695_v20 = vrot.slane %v1694_v46, 1 }
 0x495   :  { %v1696_v18 = vadd.f32 %v1695_v20, %v1694_v46 }
 0x497   :  { %v1697_v35 = vmul.f32 %v1696_v18, %v4962_v50 }
 0x499   :  { %v1698_v21 = vadd.f32 1e-05, %v1697_v35 }
 0x49b   :  { %3284 = vrsqrt.f32 %v1698_v21  ;;  %vm1705_vm15 = vweird.f32 %v1698_v21 }
 0x4a1   :  { %v3285_v57 = vpop.eup %3284 }
 0x4a2   :  { %v1700_v62 = vmul.f32 %v3285_v57, %v1698_v21  ;;  %vm1706_vm14 = vweird.f32 %v3285_v57 }
 0x4a3   :  { %vm1707_vm6 = vmor %vm1705_vm15, %vm1706_vm14 }
 0x4a4   :  { %v1701_v48 = vmul.f32 %v3285_v57, %v1700_v62  ;;  %vm5718_vm14 = vmmov %vm5680_vm0 }
 0x4a5   :  { %vm5719_vm15 = vmmov %vm5680_vm0 }
 0x4a6   :  { %v1702_v23 = vmul.f32 0.5, %v1701_v48 }
 0x4a8   :  { %v1703_v12 = vsub.f32 1.5, %v1702_v23 }
 0x4aa   :  { %v1704_v0 = vmul.f32 %v3285_v57, %v1703_v12 }
 0x4ac   :  { %v1708_v29 = vsel %vm1707_vm6, %v3285_v57, %v1704_v0  ;;  %vm5720_vm6 = vmmov %vm5680_vm0 }
 0x4ad   :  { %v1709_v59 = vmul.f32 %v1708_v29, %v666_v58 }
 0x4af   :  { %v1711_v5 = vperm.slane %v1709_v59, 0 }
 0x4b1   :  { %v1713_v11 = vmul.f32 %v1711_v5, %v4966_v22  ;;  %v1716_v45 = vmul.f32 %v1711_v5, %v4975_v7  ;;  %v1721_v41 = vmul.f32 %v1711_v5, %v5006_v51  ;;  %v1723_v6 = vmul.f32 %v1711_v5, %v5018_v3 }
 0x4b2   :  { %v1724_v14 = vmul.f32 %v1711_v5, %v5023_v42  ;;  %v1725_v61 = vmul.f32 %v1711_v5, %v5029_v53  ;;  %v1726_v15 = vmul.f32 %v1711_v5, %v5035_v52  ;;  %v1727_v2 = vmul.f32 %v1711_v5, %v5041_v47 }
 0x4b3   :  { %v1732_v16 = vadd.f32 %v3280_v33, %v1713_v11  ;;  %v1735_v22 = vadd.f32 %v3280_v33, %v1716_v45  ;;  %v1728_v7 = vmul.f32 %v1711_v5, %v5047_v56  ;;  %v1740_v1 = vadd.f32 %v3280_v33, %v1721_v41 }
 0x4b4   :  { %v1717_v13 = vmul.f32 %v1711_v5, %v4982_v63  ;;  %v1742_v60 = vadd.f32 %v3280_v33, %v1723_v6  ;;  %v1743_v43 = vadd.f32 %v3280_v33, %v1724_v14  ;;  %v1744_v51 = vadd.f32 %v3280_v33, %v1725_v61 }
 0x4b5   :  { %v1718_v3 = vmul.f32 %v1711_v5, %v4987_v9  ;;  %v1745_v54 = vadd.f32 %v3280_v33, %v1726_v15  ;;  %v1748_v42 = vmax.f32 %v1732_v16, 0.0  ;;  %v1719_v53 = vmul.f32 %v1711_v5, %v4994_v38 }
 0x4b6   :  { %v1746_v8 = vadd.f32 %v3280_v33, %v1727_v2  ;;  %v1751_v52 = vmax.f32 %v1735_v22, 0.0  ;;  %v1720_v47 = vmul.f32 %v1711_v5, %v5000_v10  ;;  %v1747_v39 = vadd.f32 %v3280_v33, %v1728_v7 }
 0x4b7   :  { %v1756_v40 = vmax.f32 %v1740_v1, 0.0  ;;  %v1758_v37 = vmax.f32 %v1742_v60, 0.0  ;;  %1806 = vst.msk [vmem:[#allocation3 + $0x11] sm:$0xff] %vm5709_vm2, %v1748_v42  ;;  %v1722_v63 = vmul.f32 %v1711_v5, %v5012_v17  ;;  %v1736_v56 = vadd.f32 %v3280_v33, %v1717_v13  ;;  %vm5721_vm2 = vmmov %vm5680_vm0 }
 0x4b8   :  { %v1759_v49 = vmax.f32 %v1743_v43, 0.0  ;;  %v1760_v26 = vmax.f32 %v1744_v51, 0.0  ;;  %1809 = vst.msk [vmem:[#allocation3 + $0x41] sm:$0xff] %vm5710_vm5, %v1751_v52  ;;  %v1714_v9 = vmul.f32 %v1711_v5, %v4969_v28  ;;  %v1737_v27 = vadd.f32 %v3280_v33, %v1718_v3  ;;  %v1840_v28 = vld [vmem:[#allocation3 + $0x1] sm:$0xff]  ;;  %vm5722_vm5 = vmmov %vm5680_vm0 }
 0x4b9   :  { %v1761_v38 = vmax.f32 %v1745_v54, 0.0  ;;  %1814 = vst.msk [vmem:[#allocation3 + $0xb1] sm:$0xff] %vm5711_vm4, %v1756_v40  ;;  %v1715_v10 = vmul.f32 %v1711_v5, %v4972_v55  ;;  %v1738_v24 = vadd.f32 %v3280_v33, %v1719_v53  ;;  %v1762_v34 = vmax.f32 %v1746_v8, 0.0  ;;  %vm5723_vm4 = vmmov %vm5680_vm0 }
 0x4ba   :  { %1816 = vst.msk [vmem:[#allocation3 + $0xd1] sm:$0xff] %vm5680_vm0, %v1758_v37  ;;  %v1739_v4 = vadd.f32 %v3280_v33, %v1720_v47  ;;  %v1763_v36 = vmax.f32 %v1747_v39, 0.0  ;;  %v1741_v17 = vadd.f32 %v3280_v33, %v1722_v63  ;;  %v1752_v44 = vmax.f32 %v1736_v56, 0.0 }
 0x4bb   :  { %1817 = vst.msk [vmem:[#allocation3 + $0xe1] sm:$0xff] %vm5712_vm7, %v1759_v49  ;;  %v1753_v30 = vmax.f32 %v1737_v27, 0.0  ;;  %v1733_v25 = vadd.f32 %v3280_v33, %v1714_v9  ;;  %v1734_v46 = vadd.f32 %v3280_v33, %v1715_v10  ;;  %v1754_v55 = vmax.f32 %v1738_v24, 0.0  ;;  %vm5724_vm7 = vmmov %vm5680_vm0 }
 0x4bc   :  { %1818 = vst.msk [vmem:[#allocation3 + $0xf1] sm:$0xff] %vm5713_vm9, %v1760_v26  ;;  %v1755_v35 = vmax.f32 %v1739_v4, 0.0  ;;  %v1757_v62 = vmax.f32 %v1741_v17, 0.0  ;;  %vm5725_vm9 = vmmov %vm5680_vm0  ;;  %v1960_v4 = vld [vmem:[#allocation3 + $0x92] sm:$0xff] }
 0x4bd   :  { %1819 = vst.msk [vmem:[#allocation3 + $0x101] sm:$0xff] %vm5714_vm11, %v1761_v38  ;;  %v1749_v48 = vmax.f32 %v1733_v25, 0.0  ;;  %v1750_v23 = vmax.f32 %v1734_v46, 0.0  ;;  %vm5726_vm11 = vmmov %vm5680_vm0 }
 0x4be   :  { %1820 = vst.msk [vmem:[#allocation3 + $0x111] sm:$0xff] %vm5715_vm3, %v1762_v34  ;;  %v1857_v20 = vld [vmem:[#allocation3 + $0x12] sm:$0xff]  ;;  %vm5727_vm3 = vmmov %vm5680_vm0 }
 0x4bf   :  { %v1841_v18 = vld [vmem:[#allocation3 + $0x11] sm:$0xff]  ;;  %1821 = vst.msk [vmem:[#allocation3 + $0x121] sm:$0xff] %vm5716_vm12, %v1763_v36  ;;  %v3020_v21 = vpack.i.bf16 %v1857_v20, %v1856_v19  ;;  %v1891_v61 = vld [vmem:[#allocation3 + $0x41] sm:$0xff]  ;;  %vm5728_vm12 = vmmov %vm5680_vm0 }
 0x4c0   :  { %v3015_v57 = vpack.i.bf16 %v1841_v18, %v1840_v28  ;;  %1810 = vst.msk [vmem:[#allocation3 + $0x51] sm:$0xff] %vm5717_vm13, %v1752_v44  ;;  %v5153_v12 = vld [vmem:[#allocation3 + $0x10] sm:$0xff]  ;;  %v5171_v15 = vld [vmem:[#allocation3 + $0x40] sm:$0xff]  ;;  %vm5729_vm13 = vmmov %vm5680_vm0 }
 0x4c1   :  { %1811 = vst.msk [vmem:[#allocation3 + $0x61] sm:$0xff] %vm5718_vm14, %v1753_v30  ;;  %3021 = vrot.lane.b32.xlu1 %v3020_v21, %s3322_s30  ;;  %v1955_v2 = vld [vmem:[#allocation3 + $0x42] sm:$0xff]  ;;  %v5187_v54 = vld [vmem:[#allocation3 + $0xd1] sm:$0xff]  ;;  %vm5730_vm14 = vmmov %vm5680_vm0 }
 0x4c2   :  { %3016 = vrot.lane.b32.xlu0 %v3015_v57, %s3317_s18  ;;  %1812 = vst.msk [vmem:[#allocation3 + $0x71] sm:$0xff] %vm5719_vm15, %v1754_v55  ;;  %v5189_v42 = vld [vmem:[#allocation3 + $0xe0] sm:$0xff]  ;;  %v5191_v53 = vld [vmem:[#allocation3 + $0xd2] sm:$0xff]  ;;  %v3085_v52 = vpack.i.bf16 %v5187_v54, %v1891_v61  ;;  %vm5731_vm15 = vmmov %vm5680_vm0 }
 0x4c3   :  { %1813 = vst.msk [vmem:[#allocation3 + $0x81] sm:$0xff] %vm5720_vm6, %v1755_v35  ;;  %v3090_v39 = vpack.i.bf16 %v5191_v53, %v1955_v2  ;;  %v5201_v40 = vld [vmem:[#allocation3 + $0xe1] sm:$0xff]  ;;  %v5205_v63 = vld [vmem:[#allocation3 + $0xf0] sm:$0xff]  ;;  %vm5732_vm6 = vmmov %vm5680_vm0 }
 0x4c4   :  { %1815 = vst.msk [vmem:[#allocation3 + $0xc1] sm:$0xff] %vm5721_vm2, %v1757_v62  ;;  %v1915_v56 = vld [vmem:[#allocation3 + $0xe2] sm:$0xff]  ;;  %v1948_v10 = vld [vmem:[#allocation3 + $0xf1] sm:$0xff]  ;;  %vm5733_vm2 = vmmov %vm5680_vm0 }
 0x4c5   :  { %1807 = vst.msk [vmem:[#allocation3 + $0x21] sm:$0xff] %vm5722_vm5, %v1749_v48  ;;  %v1916_v36 = vld [vmem:[#allocation3 + $0xf2] sm:$0xff]  ;;  %v5227_v19 = vld [vmem:[#allocation3 + $0x100] sm:$0xff]  ;;  %v2545_v62 = vld [vmem:[%s5658_s4 + $0x68] sm:$0xff] }
 0x4c6   :  { %1808 = vst.msk [vmem:[#allocation3 + $0x31] sm:$0xff] %vm5723_vm4, %v1750_v23  ;;  %v1949_v30 = vld [vmem:[#allocation3 + $0x101] sm:$0xff]  ;;  %v5249_v21 = vld [vmem:[#allocation3 + $0x111] sm:$0xff]  ;;  %vm5734_vm5 = vmmov %vm5680_vm0 }
 0x4c7   :  { %v1940_v1 = vld [vmem:[#allocation3 + $0x51] sm:$0xff]  ;;  %v1917_v35 = vld [vmem:[#allocation3 + $0x102] sm:$0xff]  ;;  %vm5735_vm4 = vmmov %vm5680_vm0 }
 0x4c8   :  { %v5179_v13 = vld [vmem:[#allocation3 + $0x50] sm:$0xff]  ;;  %v3080_v51 = vpack.i.bf16 %v1940_v1, %v1891_v61  ;;  %v1957_v8 = vld [vmem:[#allocation3 + $0x62] sm:$0xff]  ;;  %v3100_v26 = vpack.i.bf16 %v5201_v40, %v1940_v1 }
 0x4c9   :  { %v1956_v60 = vld [vmem:[#allocation3 + $0x52] sm:$0xff]  ;;  %v3075_v3 = vpack.i.bf16 %v5179_v13, %v5171_v15  ;;  %v3095_v47 = vpack.i.bf16 %v5189_v42, %v5179_v13  ;;  %v5203_v37 = vld [vmem:[#allocation3 + $0x60] sm:$0xff]  ;;  %v3140_v17 = vpack.i.bf16 %v1916_v36, %v1957_v8  ;;  %v2537_v1 = vld [vmem:[%s5658_s4 + $0x28] sm:$0xff] }
 0x4ca   :  { %v1958_v49 = vld [vmem:[#allocation3 + $0x72] sm:$0xff]  ;;  %v3110_v9 = vpack.i.bf16 %v5205_v63, %v5203_v37  ;;  %v3105_v27 = vpack.i.bf16 %v1915_v56, %v1956_v60  ;;  %v1941_v38 = vld [vmem:[#allocation3 + $0x61] sm:$0xff] }
 0x4cb   :  { %v5214_v24 = vld [vmem:[#allocation3 + $0x82] sm:$0xff]  ;;  %v3115_v34 = vpack.i.bf16 %v1948_v10, %v1941_v38  ;;  %v5225_v44 = vld [vmem:[#allocation3 + $0x70] sm:$0xff] }
 0x4cc   :  { %v1953_v58 = vld [vmem:[#allocation3 + $0x22] sm:$0xff]  ;;  %v1942_v28 = vld [vmem:[#allocation3 + $0x71] sm:$0xff]  ;;  %v3145_v46 = vpack.i.bf16 %v5227_v19, %v5225_v44 }
 0x4cd   :  { %v5155_v0 = vld [vmem:[#allocation3 + $0x20] sm:$0xff]  ;;  %2956 = vmatmul.msk.f32.vlgmr.msra.gmra.mxu2 %vm5680_vm0, %v1953_v58  ;;  %v3035_v5 = vpack.i.bf16 %v1953_v58, %v1857_v20  ;;  %v5163_v45 = vld [vmem:[#allocation3 + $0x30] sm:$0xff]  ;;  %v3150_v55 = vpack.i.bf16 %v1949_v30, %v1942_v28  ;;  %v2547_v20 = vld [vmem:[%s5658_s4 + $0x78] sm:$0xff] }
 0x4ce   :  { %v1889_v29 = vld [vmem:[#allocation3 + $0x21] sm:$0xff]  ;;  %v3025_v59 = vpack.i.bf16 %v5155_v0, %v5153_v12  ;;  %v1843_v33 = vld [vmem:[#allocation3 + $0x31] sm:$0xff]  ;;  %v3040_v6 = vpack.i.bf16 %v5163_v45, %v5155_v0  ;;  %v3060_v7 = vpack.i.bf16 %v5171_v15, %v5163_v45  ;;  %2598 = vmatpush.msra.mxu1 %v2547_v20  ;;  %2981 = vmatpush.msrb.mxu3 %v2547_v20 }
 0x4cf   :  { %v3030_v11 = vpack.i.bf16 %v1889_v29, %v1841_v18  ;;  %3036 = vrot.lane.b32.xlu1 %v3035_v5, %s3325_s3  ;;  %v1954_v41 = vld [vmem:[#allocation3 + $0x32] sm:$0xff]  ;;  %v3050_v14 = vpack.i.bf16 %v1843_v33, %v1889_v29  ;;  %v3065_v22 = vpack.i.bf16 %v1891_v61, %v1843_v33  ;;  %v5229_v25 = vld [vmem:[#allocation3 + $0xc2] sm:$0xff]  ;;  %v3175_v29 = vpack.i.bf16 %v1917_v35, %v1958_v49 }
 0x4d0   :  { %3026 = vrot.lane.b32.xlu2 %v3025_v59, %s3320_s23  ;;  %v3055_v16 = vpack.i.bf16 %v1954_v41, %v1953_v58  ;;  %v3070_v43 = vpack.i.bf16 %v1955_v2, %v1954_v41  ;;  %v2546_v18 = vld [vmem:[%s5658_s4 + $0x70] sm:$0xff]  ;;  %v1943_v57 = vld [vmem:[#allocation3 + $0x81] sm:$0xff]  ;;  %v2543_v5 = vld [vmem:[%s5658_s4 + $0x58] sm:$0xff] }
 0x4d1   :  { %3031 = vrot.lane.b32.xlu0 %v3030_v11, %s3319_s20  ;;  %2599 = vmatpush.msra.mxu1 %v2546_v18  ;;  %v2544_v48 = vld [vmem:[%s5658_s4 + $0x60] sm:$0xff]  ;;  %v5257_v58 = vld [vmem:[#allocation3 + $0x110] sm:$0xff]  ;;  %v3185_v59 = vpack.i.bf16 %v5249_v21, %v1943_v57 }
 0x4d2   :  { %2982 = vmatpush.msrb.mxu3 %v2546_v18  ;;  %v1927_v23 = vld [vmem:[#allocation3 + $0x80] sm:$0xff]  ;;  %v2542_v33 = vld [vmem:[%s5658_s4 + $0x50] sm:$0xff] }
 0x4d3   :  { %2600 = vmatpush.msra.mxu1 %v2545_v62  ;;  %v3180_v11 = vpack.i.bf16 %v5257_v58, %v1927_v23  ;;  %v2538_v61 = vld [vmem:[%s5658_s4 + $0x30] sm:$0xff]  ;;  %v5323_v28 = vld [vmem:[#allocation3 + $0x122] sm:$0xff] }
 0x4d4   :  { %2983 = vmatpush.msrb.mxu3 %v2545_v62 }
 0x4d5   :  { %2957 = vmatmul.msk.f32.gmra.mxu2 %vm5724_vm7, %v1954_v41  ;;  %2601 = vmatpush.msra.mxu1 %v2544_v48  ;;  %v2541_v41 = vld [vmem:[%s5658_s4 + $0x48] sm:$0xff]  ;;  %vm5736_vm7 = vmmov %vm5680_vm0 }
 0x4d6   :  { %2984 = vmatpush.msrb.mxu3 %v2544_v48 }
 0x4d7   :  { %3051 = vrot.lane.b32.xlu1 %v3050_v14, %s3317_s18  ;;  %2602 = vmatpush.msra.mxu1 %v2543_v5 }
 0x4d8   :  { %3041 = vrot.lane.b32.xlu2 %v3040_v6, %s3326_s24  ;;  %2985 = vmatpush.msrb.mxu3 %v2543_v5  ;;  %v2540_v6 = vld [vmem:[%s5658_s4 + $0x40] sm:$0xff] }
 0x4d9   :  { %3046 = vrot.lane.b32.xlu0 %v3050_v14, %s3327_s25  ;;  %2603 = vmatpush.msra.mxu1 %v2542_v33  ;;  %v2539_v14 = vld [vmem:[%s5658_s4 + $0x38] sm:$0xff]  ;;  %v1850_v5 = vld [vmem:[#allocation3 + $0xc1] sm:$0xff] }
 0x4da   :  { %2986 = vmatpush.msrb.mxu3 %v2542_v33 }
 0x4db   :  { %2604 = vmatpush.msra.mxu1 %v2541_v41 }
 0x4dc   :  { %2987 = vmatpush.msrb.mxu3 %v2541_v41 }
 0x4dd   :  { %2958 = vmatmul.msk.f32.gmra.mxu2 %vm5725_vm9, %v1955_v2  ;;  %2605 = vmatpush.msra.mxu1 %v2540_v6  ;;  %vm2481_vm9 = vcmask 654336  }
 0x4de   :  { %2988 = vmatpush.msrb.mxu3 %v2540_v6  ;;  %v1952_v6 = vld [vmem:[#allocation3 + $0x131] sm:$0xff] }
 0x4df   :  { %3066 = vrot.lane.b32.xlu1 %v3065_v22, %s3319_s20  ;;  %2606 = vmatpush.msra.mxu1 %v2539_v14  ;;  %v1935_v22 = vld [vmem:[#allocation3 + $0x120] sm:$0xff] }
 0x4e0   :  { %3056 = vrot.lane.b32.xlu2 %v3055_v16, %s3322_s30  ;;  %v1928_v16 = vld [vmem:[#allocation3 + $0x90] sm:$0xff]  ;;  %2989 = vmatpush.msrb.mxu3 %v2539_v14 }
 0x4e1   :  { %3061 = vrot.lane.b32.xlu0 %v3060_v7, %s3320_s23  ;;  %2607 = vmatpush.msra.mxu1 %v2538_v61  ;;  %v1966_v7 = vld [vmem:[#allocation3 + $0x112] sm:$0xff] }
 0x4e2   :  { %2990 = vmatpush.msrb.mxu3 %v2538_v61 }
 0x4e3   :  { %2608 = vmatpush.msra.mxu1 %v2537_v1 }
 0x4e4   :  { %2991 = vmatpush.msrb.mxu3 %v2537_v1  ;;  %v3255_v1 = vpack.i.bf16 %v1952_v6, %v1850_v5 }
 0x4e5   :  { %2959 = vmatmul.msk.f32.gmra.mxu2 %vm5726_vm11, %v1956_v60  ;;  %v2536_v60 = vld [vmem:[%s5658_s4 + $0x20] sm:$0xff]  ;;  %vm5737_vm11 = vmmov %vm5680_vm0 }
 0x4e6   :  { %2609 = vmatpush.msra.mxu1 %v2536_v60  ;;  %2992 = vmatpush.msrb.mxu3 %v2536_v60 }
 0x4e7   :  { %3081 = vrot.lane.b32.xlu1 %v3080_v51, %s3327_s25  ;;  %v2535_v51 = vld [vmem:[%s5658_s4 + $0x18] sm:$0xff] }
 0x4e8   :  { %3071 = vrot.lane.b32.xlu2 %v3070_v43, %s3325_s3  ;;  %v3215_v43 = vpack.i.bf16 %v1935_v22, %v1928_v16  ;;  %2610 = vmatpush.msra.mxu1 %v2535_v51 }
 0x4e9   :  { %3076 = vrot.lane.b32.xlu0 %v3075_v3, %s3326_s24  ;;  %v3210_v3 = vpack.i.bf16 %v1966_v7, %v5214_v24  ;;  %2993 = vmatpush.msrb.mxu3 %v2535_v51 }
 0x4ed   :  { %2960 = vmatmul.msk.f32.gmra.mxu2 %vm5727_vm3, %v1957_v8  ;;  %v2534_v8 = vld [vmem:[%s5658_s4 + $0x10] sm:$0xff]  ;;  %vm2498_vm3 = vcmask 785408  }
 0x4ee   :  { %2611 = vmatpush.msra.mxu1 %v2534_v8  ;;  %2994 = vmatpush.msrb.mxu3 %v2534_v8 }
 0x4ef   :  { %3096 = vrot.lane.b32.xlu1 %v3095_v47, %s3320_s23  ;;  %v1944_v47 = vld [vmem:[#allocation3 + $0x91] sm:$0xff] }
 0x4f0   :  { %3086 = vrot.lane.b32.xlu2 %v3085_v52, %s3317_s18 }
 0x4f1   :  { %3091 = vrot.lane.b32.xlu0 %v3090_v39, %s3322_s30  ;;  %v1951_v39 = vld [vmem:[#allocation3 + $0x121] sm:$0xff] }
 0x4f5   :  { %2961 = vmatmul.msk.f32.gmra.mxu2 %vm5728_vm12, %v1958_v49  ;;  %v2533_v49 = vld [vmem:[%s5658_s4 + $0x8] sm:$0xff]  ;;  %vm2515_vm12 = vcmask 916480  }
 0x4f6   :  { %2612 = vmatpush.msra.mxu1 %v2533_v49  ;;  %2995 = vmatpush.msrb.mxu3 %v2533_v49  ;;  %v5353_v49 = vld [vmem:[#allocation3 + $0xd0] sm:$0xff] }
 0x4f7   :  { %3111 = vrot.lane.b32.xlu1 %v3110_v9, %s3326_s24 }
 0x4f8   :  { %3101 = vrot.lane.b32.xlu2 %v3100_v26, %s3319_s20 }
 0x4f9   :  { %3106 = vrot.lane.b32.xlu0 %v3105_v27, %s3325_s3 }
 0x4fd   :  { %2962 = vmatmul.msk.f32.gmra.mxu2 %vm5729_vm13, %v5214_v24  ;;  %vm5738_vm13 = vmmov %vm5680_vm0 }
 0x4ff   :  { %3126 = vrot.lane.b32.xlu1 %v3105_v27, %s3322_s30  ;;  %v3220_v27 = vpack.i.bf16 %v1951_v39, %v1944_v47 }
 0x500   :  { %3116 = vrot.lane.b32.xlu2 %v3115_v34, %s3327_s25 }
 0x501   :  { %3121 = vrot.lane.b32.xlu0 %v3100_v26, %s3317_s18  ;;  %v1848_v26 = vld [vmem:[#allocation3 + $0xa1] sm:$0xff] }
 0x502   :  { %v3225_v10 = vpack.i.bf16 %v5249_v21, %v1848_v26 }
 0x505   :  { %2963 = vmatmul.msk.f32.gmra.mxu2 %vm5730_vm14, %v1960_v4  ;;  %vm5739_vm14 = vmmov %vm5680_vm0 }
 0x507   :  { %3141 = vrot.lane.b32.xlu1 %v3140_v17, %s3325_s3 }
 0x508   :  { %3131 = vrot.lane.b32.xlu2 %v3110_v9, %s3320_s23  ;;  %v2532_v9 = vld [vmem:[%s5658_s4] sm:$0xff] }
 0x509   :  { %3136 = vrot.lane.b32.xlu0 %v3115_v34, %s3319_s20  ;;  %2613 = vmatpush.msra.mxu1 %v2532_v9 }
 0x50a   :  { %2996 = vmatpush.msrb.mxu3 %v2532_v9 }
 0x50c   :  { %2997 = vmatpush.msra.mxu3 %v5076_v32  ;;  %v1936_v32 = vld [vmem:[#allocation3 + $0x130] sm:$0xff] }
 0x50d   :  { %2964 = vmatmul.msk.f32.gmra.mxu2 %vm5731_vm15, %v5229_v25  ;;  %vm5740_vm15 = vmmov %vm5680_vm0 }
 0x50e   :  { %2998 = vmatpush.msra.mxu3 %v5092_v31 }
 0x50f   :  { %3156 = vrot.lane.b32.xlu1 %v3115_v34, %s3317_s18 }
 0x510   :  { %3146 = vrot.lane.b32.xlu2 %v3145_v46, %s3326_s24 }
 0x511   :  { %3151 = vrot.lane.b32.xlu0 %v3150_v55, %s3327_s25 }
 0x515   :  { %2965 = vmatmul.msk.f32.gmra.mxu2 %vm5732_vm6, %v5191_v53  ;;  %vm5741_vm6 = vmmov %vm5680_vm0 }
 0x517   :  { %3171 = vrot.lane.b32.xlu1 %v3150_v55, %s3319_s20 }
 0x518   :  { %3161 = vrot.lane.b32.xlu2 %v3140_v17, %s3322_s30  ;;  %v1912_v17 = vld [vmem:[#allocation3 + $0xb2] sm:$0xff] }
 0x519   :  { %3166 = vrot.lane.b32.xlu0 %v3145_v46, %s3320_s23  ;;  %v1896_v46 = vld [vmem:[#allocation3 + $0xb1] sm:$0xff]  ;;  %v3245_v18 = vpack.i.bf16 %v5323_v28, %v1912_v17  ;;  %v3265_v9 = vpack.i.bf16 %v5229_v25, %v1912_v17 }
 0x51a   :  { %v3240_v21 = vpack.i.bf16 %v1951_v39, %v1896_v46  ;;  %v3260_v16 = vpack.i.bf16 %v1850_v5, %v1896_v46 }
 0x51d   :  { %2966 = vmatmul.msk.f32.gmra.mxu2 %vm5733_vm2, %v1915_v56  ;;  %v1864_v56 = vld [vmem:[#allocation3 + $0xa2] sm:$0xff]  ;;  %vm5742_vm2 = vmmov %vm5680_vm0 }
 0x51e   :  { %v3230_v38 = vpack.i.bf16 %v1966_v7, %v1864_v56 }
 0x51f   :  { %3186 = vrot.lane.b32.xlu1 %v3185_v59, %s3327_s25 }
 0x520   :  { %3176 = vrot.lane.b32.xlu2 %v3175_v29, %s3325_s3 }
 0x521   :  { %3181 = vrot.lane.b32.xlu0 %v3180_v11, %s3326_s24 }
 0x525   :  { %2967 = vmatmul.msk.f32.gmra.mxu2 %vm5734_vm5, %v1916_v36  ;;  %v5321_v36 = vld [vmem:[#allocation3 + $0xb0] sm:$0xff]  ;;  %vm5743_vm5 = vmmov %vm5680_vm0 }
 0x526   :  { %v3235_v20 = vpack.i.bf16 %v1935_v22, %v5321_v36 }
 0x527   :  { %3201 = vrot.lane.b32.xlu1 %v3180_v11, %s3320_s23 }
 0x528   :  { %3191 = vrot.lane.b32.xlu2 %v3150_v55, %s3317_s18  ;;  %v1824_v55 = vld [vmem:[#allocation3] sm:$0xff] }
 0x529   :  { %3196 = vrot.lane.b32.xlu0 %v3175_v29, %s3322_s30  ;;  %v5336_v29 = vld [vmem:[#allocation3 + $0xc0] sm:$0xff] }
 0x52a   :  { %v5287_v2 = vpop.permute.xlu2 %3026  ;;  %v3250_v14 = vpack.i.bf16 %v1936_v32, %v5336_v29 }
 0x52b   :  { %v3028_v11 = vunpack.i.l.bf16 %v5287_v2 }
 0x52d   :  { %2968 = vmatmul.msk.f32.gmra.mxu2 %vm5735_vm4, %v1917_v35  ;;  %vm5744_vm4 = vmmov %vm5680_vm0 }
 0x52f   :  { %3216 = vrot.lane.b32.xlu1 %v3215_v43, %s3326_s24 }
 0x530   :  { %3206 = vrot.lane.b32.xlu2 %v3185_v59, %s3319_s20 }
 0x531   :  { %3211 = vrot.lane.b32.xlu0 %v3210_v3, %s3325_s3 }
 0x532   :  { %v5306_v52 = vpop.permute.xlu2 %3041 }
 0x533   :  { %v3022_v24 = vpop.permute.xlu1 %3021  ;;  %v3043_v8 = vunpack.i.l.bf16 %v5306_v52 }
 0x534   :  { %v3017_v34 = vpop.permute.xlu0 %3016  ;;  %v3023_v35 = vunpack.i.l.bf16 %v3022_v24  ;;  %v3024_v22 = vunpack.i.h.bf16 %v3022_v24 }
 0x535   :  { %2969 = vmatmul.msk.f32.gmra.mxu2 %vm5680_vm0, %v1966_v7  ;;  %v3018_v30 = vunpack.i.l.bf16 %v3017_v34  ;;  %v3019_v33 = vunpack.i.h.bf16 %v3017_v34  ;;  %v3275_v34 = vpack.i.bf16 %v5187_v54, %v1850_v5 }
 0x537   :  { %3231 = vrot.lane.b32.xlu1 %v3230_v38, %s3322_s30  ;;  %v2417_v57 = vsel %vm5736_vm7, %v1824_v55, %v3018_v30  ;;  %v2418_v60 = vsel %vm5737_vm11, %v5153_v12, %v3019_v33  ;;  %v3029_v12 = vunpack.i.h.bf16 %v5287_v2  ;;  %v3270_v2 = vpack.i.bf16 %v5353_v49, %v5336_v29  ;;  %vm5745_vm7 = vmmov %vm5680_vm0 }
 0x538   :  { %3221 = vrot.lane.b32.xlu2 %v3220_v27, %s3327_s25  ;;  %v2433_v23 = vsel %vm1375_vm1, %v2417_v57, %v3023_v35  ;;  %v2434_v47 = vsel %vm1375_vm1, %v2418_v60, %v3024_v22  ;;  %v3044_v35 = vunpack.i.h.bf16 %v5306_v52  ;;  %vm5746_vm11 = vmmov %vm5680_vm0 }
 0x539   :  { %3226 = vrot.lane.b32.xlu0 %v3225_v10, %s3317_s18  ;;  %v2449_v31 = vsel %vm1409_vm8, %v2433_v23, %v3028_v11  ;;  %v2450_v10 = vsel %vm1409_vm8, %v2434_v47, %v3029_v12 }
 0x53a   :  { %v5319_v4 = vpop.permute.xlu2 %3056 }
 0x53b   :  { %v3059_v6 = vunpack.i.h.bf16 %v5319_v4 }
 0x53f   :  { %3246 = vrot.lane.b32.xlu1 %v3245_v18, %s3325_s3 }
 0x540   :  { %3236 = vrot.lane.b32.xlu2 %v3235_v20, %s3320_s23 }
 0x541   :  { %3241 = vrot.lane.b32.xlu0 %v3240_v21, %s3319_s20  ;;  %v3037_v48 = vpop.permute.xlu1 %3036 }
 0x542   :  { %v5333_v62 = vpop.permute.xlu2 %3071  ;;  %v3038_v61 = vunpack.i.l.bf16 %v3037_v48  ;;  %v3039_v38 = vunpack.i.h.bf16 %v3037_v48  ;;  %v3058_v48 = vunpack.i.l.bf16 %v5319_v4 }
 0x543   :  { %v3032_v59 = vpop.permute.xlu0 %3031  ;;  %v3074_v47 = vunpack.i.h.bf16 %v5333_v62 }
 0x544   :  { %v3033_v41 = vunpack.i.l.bf16 %v3032_v59  ;;  %v3034_v39 = vunpack.i.h.bf16 %v3032_v59 }
 0x546   :  { %v2465_v7 = vsel %vm1443_vm10, %v2449_v31, %v3033_v41  ;;  %v2466_v30 = vsel %vm1443_vm10, %v2450_v10, %v3034_v39 }
 0x547   :  { %3261 = vrot.lane.b32.xlu1 %v3260_v16, %s3317_s18  ;;  %v2482_v3 = vsel %vm2481_vm9, %v2465_v7, %v3038_v61  ;;  %v2483_v18 = vsel %vm2481_vm9, %v2466_v30, %v3039_v38  ;;  %v3073_v16 = vunpack.i.l.bf16 %v5333_v62 }
 0x548   :  { %3251 = vrot.lane.b32.xlu2 %v3250_v14, %s3326_s24  ;;  %v2499_v27 = vsel %vm2498_vm3, %v2482_v3, %v3043_v8  ;;  %v2500_v59 = vsel %vm2498_vm3, %v2483_v18, %v3044_v35 }
 0x549   :  { %3256 = vrot.lane.b32.xlu0 %v3255_v1, %s3327_s25  ;;  %v3052_v51 = vpop.permute.xlu1 %3051 }
 0x54a   :  { %v5347_v43 = vpop.permute.xlu2 %3086  ;;  %v3053_v46 = vunpack.i.l.bf16 %v3052_v51  ;;  %v3054_v32 = vunpack.i.h.bf16 %v3052_v51 }
 0x54b   :  { %v3047_v56 = vpop.permute.xlu0 %3046  ;;  %v3089_v39 = vunpack.i.h.bf16 %v5347_v43 }
 0x54c   :  { %v3048_v26 = vunpack.i.l.bf16 %v3047_v56  ;;  %v3049_v55 = vunpack.i.h.bf16 %v3047_v56  ;;  %v2419_v21 = vsel %vm5738_vm13, %v5155_v0, %v3053_v46  ;;  %v2420_v0 = vsel %vm5739_vm14, %v5163_v45, %v3054_v32  ;;  %vm5747_vm13 = vmmov %vm5680_vm0 }
 0x54d   :  { %v2435_v11 = vsel %vm1375_vm1, %v2419_v21, %v3058_v48  ;;  %v3088_v56 = vunpack.i.l.bf16 %v5347_v43  ;;  %vm5748_vm14 = vmmov %vm5680_vm0 }
 0x54e   :  { %v2516_v24 = vsel %vm2515_vm12, %v2499_v27, %v3048_v26  ;;  %v2517_v33 = vsel %vm2515_vm12, %v2500_v59, %v3049_v55 }
 0x54f   :  { %2614 = vmatmul.f32.vlgmr.msra.gmra.mxu1 %v2516_v24  ;;  %3276 = vrot.lane.b32.xlu1 %v3275_v34, %s3319_s20  ;;  %v2421_v24 = vsel %vm5741_vm6, %v5171_v15, %v3088_v56  ;;  %vm5750_vm6 = vmmov %vm5680_vm0 }
 0x550   :  { %3266 = vrot.lane.b32.xlu2 %v3265_v9, %s3322_s30 }
 0x551   :  { %3271 = vrot.lane.b32.xlu0 %v3270_v2, %s3320_s23  ;;  %v3067_v20 = vpop.permute.xlu1 %3066 }
 0x552   :  { %v5366_v17 = vpop.permute.xlu2 %3101  ;;  %v3068_v5 = vunpack.i.l.bf16 %v3067_v20  ;;  %v3069_v7 = vunpack.i.h.bf16 %v3067_v20 }
 0x553   :  { %v3062_v57 = vpop.permute.xlu0 %3061  ;;  %v3104_v35 = vunpack.i.h.bf16 %v5366_v17 }
 0x554   :  { %v3063_v23 = vunpack.i.l.bf16 %v3062_v57  ;;  %v3064_v52 = vunpack.i.h.bf16 %v3062_v57 }
 0x556   :  { %v2451_v41 = vsel %vm1409_vm8, %v2435_v11, %v3063_v23 }
 0x557   :  { %2617 = vmatmul.f32.gmra.mxu1 %v2517_v33  ;;  %2387 = vrot.lane.b32.xlu1 %v5187_v54, %s3327_s25  ;;  %v2467_v31 = vsel %vm1443_vm10, %v2451_v41, %v3068_v5  ;;  %v2436_v54 = vsel %vm1375_vm1, %v2420_v0, %v3059_v6 }
 0x558   :  { %2259 = vrot.lane.b32.xlu2 %v5229_v25, %s3325_s3  ;;  %v2452_v45 = vsel %vm1409_vm8, %v2436_v54, %v3064_v52  ;;  %v2484_v60 = vsel %vm2481_vm9, %v2467_v31, %v3073_v16 }
 0x559   :  { %2323 = vrot.lane.b32.xlu0 %v5353_v49, %s3326_s24  ;;  %v3082_v61 = vpop.permute.xlu1 %3081  ;;  %v2468_v8 = vsel %vm1443_vm10, %v2452_v45, %v3069_v7 }
 0x55a   :  { %v3117_v14 = vpop.permute.xlu2 %3116  ;;  %v3083_v22 = vunpack.i.l.bf16 %v3082_v61  ;;  %v3084_v26 = vunpack.i.h.bf16 %v3082_v61 }
 0x55b   :  { %v3077_v25 = vpop.permute.xlu0 %3076  ;;  %v3119_v5 = vunpack.i.h.bf16 %v3117_v14  ;;  %v3118_v11 = vunpack.i.l.bf16 %v3117_v14 }
 0x55c   :  { %v3078_v1 = vunpack.i.l.bf16 %v3077_v25  ;;  %v3079_v3 = vunpack.i.h.bf16 %v3077_v25 }
 0x55e   :  { %v2501_v51 = vsel %vm2498_vm3, %v2484_v60, %v3078_v1 }
 0x55f   :  { %v2518_v4 = vsel %vm2515_vm12, %v2501_v51, %v3083_v22  ;;  %2389 = vrot.lane.b32.xlu1 %v5201_v40, %s3327_s25  ;;  %v2428_v40 = vsel %vm5740_vm15, %v5353_v49, %v3089_v39  ;;  %v3103_v49 = vunpack.i.l.bf16 %v5366_v17  ;;  %vm5749_vm15 = vmmov %vm5680_vm0  ;;  %s3329_s25 = smov 128  }
 0x560   :  { %2261 = vrot.lane.b32.xlu2 %v5191_v53, %s3325_s3  ;;  %2620 = vmatmul.f32.gmra.mxu1 %v2518_v4  ;;  %v2485_v53 = vsel %vm2481_vm9, %v2468_v8, %v3074_v47 }
 0x561   :  { %2325 = vrot.lane.b32.xlu0 %v5189_v42, %s3326_s24  ;;  %v3097_v12 = vpop.permute.xlu1 %3096  ;;  %v2502_v62 = vsel %vm2498_vm3, %v2485_v53, %v3079_v3  ;;  %s2924_s24 = sshll.u32 %s5661_s7, 4  ;;  %s2925_s24 = int_to_ptr.hbm [resolvable:$true] %s2924_s24 }
 0x562   :  { %v3132_v27 = vpop.permute.xlu2 %3131  ;;  %v3099_v34 = vunpack.i.h.bf16 %v3097_v12  ;;  %v3098_v30 = vunpack.i.l.bf16 %v3097_v12  ;;  %v2519_v2 = vsel %vm2515_vm12, %v2502_v62, %v3084_v26 }
 0x563   :  { %v3092_v9 = vpop.permute.xlu0 %3091  ;;  %v3134_v8 = vunpack.i.h.bf16 %v3132_v27  ;;  %v3133_v47 = vunpack.i.l.bf16 %v3132_v27 }
 0x564   :  { %v3094_v38 = vunpack.i.h.bf16 %v3092_v9  ;;  %v3093_v10 = vunpack.i.l.bf16 %v3092_v9 }
 0x566   :  { %v2444_v43 = vsel %vm1375_vm1, %v2428_v40, %v3094_v38  ;;  %v2437_v46 = vsel %vm1375_vm1, %v2421_v24, %v3093_v10 }
 0x567   :  { %v2460_v55 = vsel %vm1409_vm8, %v2444_v43, %v3099_v34  ;;  %v2453_v20 = vsel %vm1409_vm8, %v2437_v46, %v3098_v30 }
 0x568   :  { %2623 = vmatmul.f32.gmra.mxu1 %v2519_v2  ;;  %v2469_v32 = vsel %vm1443_vm10, %v2453_v20, %v3103_v49  ;;  %v2476_v59 = vsel %vm1443_vm10, %v2460_v55, %v3104_v35 }
 0x569   :  { %v3112_v18 = vpop.permute.xlu1 %3111 }
 0x56a   :  { %v3114_v21 = vunpack.i.h.bf16 %v3112_v18  ;;  %v3113_v15 = vunpack.i.l.bf16 %v3112_v18  ;;  %v3147_v33 = vpop.permute.xlu2 %3146 }
 0x56b   :  { %v3107_v57 = vpop.permute.xlu0 %3106  ;;  %v3149_v24 = vunpack.i.h.bf16 %v3147_v33  ;;  %v3148_v27 = vunpack.i.l.bf16 %v3147_v33 }
 0x56c   :  { %v3109_v48 = vunpack.i.h.bf16 %v3107_v57  ;;  %v3108_v23 = vunpack.i.l.bf16 %v3107_v57 }
 0x56e   :  { %v2486_v41 = vsel %vm2481_vm9, %v2469_v32, %v3108_v23  ;;  %v2493_v0 = vsel %vm2481_vm9, %v2476_v59, %v3109_v48 }
 0x56f   :  { %v2503_v52 = vsel %vm2498_vm3, %v2486_v41, %v3113_v15  ;;  %v2510_v17 = vsel %vm2498_vm3, %v2493_v0, %v3114_v21 }
 0x570   :  { %v2520_v6 = vsel %vm2515_vm12, %v2503_v52, %v3118_v11  ;;  %v2527_v61 = vsel %vm2515_vm12, %v2510_v17, %v3119_v5 }
 0x571   :  { %2626 = vmatmul.f32.gmra.mxu1 %v2520_v6  ;;  %2647 = vmatmul.f32.vlgmr.msrb.gmra.mxu3 %v2527_v61  ;;  %v3127_v31 = vpop.permute.xlu1 %3126 }
 0x572   :  { %v3129_v14 = vunpack.i.h.bf16 %v3127_v31  ;;  %v3128_v7 = vunpack.i.l.bf16 %v3127_v31  ;;  %v3162_v54 = vpop.permute.xlu2 %3161 }
 0x573   :  { %v3122_v16 = vpop.permute.xlu0 %3121  ;;  %v3164_v48 = vunpack.i.h.bf16 %v3162_v54  ;;  %v3163_v23 = vunpack.i.l.bf16 %v3162_v54 }
 0x574   :  { %v3124_v22 = vunpack.i.h.bf16 %v3122_v16  ;;  %v3123_v25 = vunpack.i.l.bf16 %v3122_v16 }
 0x576   :  { %v2429_v1 = vsel %vm5742_vm2, %v5189_v42, %v3124_v22  ;;  %v2422_v45 = vsel %vm5743_vm5, %v5179_v13, %v3123_v25  ;;  %vm5751_vm2 = vmmov %vm5680_vm0 }
 0x577   :  { %v2445_v51 = vsel %vm1375_vm1, %v2429_v1, %v3129_v14  ;;  %v2438_v4 = vsel %vm1375_vm1, %v2422_v45, %v3128_v7  ;;  %vm5752_vm5 = vmmov %vm5680_vm0 }
 0x578   :  { %v2454_v9 = vsel %vm1409_vm8, %v2438_v4, %v3133_v47  ;;  %v2461_v53 = vsel %vm1409_vm8, %v2445_v51, %v3134_v8 }
 0x579   :  { %v3142_v60 = vpop.permute.xlu1 %3141 }
 0x57a   :  { %v3144_v12 = vunpack.i.h.bf16 %v3142_v60  ;;  %v3143_v26 = vunpack.i.l.bf16 %v3142_v60  ;;  %v3177_v38 = vpop.permute.xlu2 %3176 }
 0x57b   :  { %v3137_v3 = vpop.permute.xlu0 %3136  ;;  %v3179_v61 = vunpack.i.h.bf16 %v3177_v38  ;;  %v3178_v31 = vunpack.i.l.bf16 %v3177_v38 }
 0x57c   :  { %v3139_v39 = vunpack.i.h.bf16 %v3137_v3  ;;  %v3138_v56 = vunpack.i.l.bf16 %v3137_v3 }
 0x57e   :  { %v2470_v42 = vsel %vm1443_vm10, %v2454_v9, %v3138_v56  ;;  %v2477_v13 = vsel %vm1443_vm10, %v2461_v53, %v3139_v39 }
 0x57f   :  { %v2487_v62 = vsel %vm2481_vm9, %v2470_v42, %v3143_v26  ;;  %v2494_v40 = vsel %vm2481_vm9, %v2477_v13, %v3144_v12 }
 0x580   :  { %v2504_v46 = vsel %vm2498_vm3, %v2487_v62, %v3148_v27  ;;  %v2511_v2 = vsel %vm2498_vm3, %v2494_v40, %v3149_v24 }
 0x581   :  { %v3157_v10 = vpop.permute.xlu1 %3156 }
 0x582   :  { %v3159_v18 = vunpack.i.h.bf16 %v3157_v10  ;;  %v3158_v35 = vunpack.i.l.bf16 %v3157_v10  ;;  %v3192_v32 = vpop.permute.xlu2 %3191 }
 0x583   :  { %v3152_v34 = vpop.permute.xlu0 %3151  ;;  %v3194_v8 = vunpack.i.h.bf16 %v3192_v32  ;;  %v3193_v47 = vunpack.i.l.bf16 %v3192_v32 }
 0x584   :  { %v3154_v30 = vunpack.i.h.bf16 %v3152_v34  ;;  %v3153_v43 = vunpack.i.l.bf16 %v3152_v34  ;;  %v2430_v21 = vsel %vm5744_vm4, %v5205_v63, %v3159_v18  ;;  %v2423_v15 = vsel %vm5680_vm0, %v5203_v37, %v3158_v35  ;;  %vm5759_vm4 = vmmov %vm5680_vm0 }
 0x585   :  { %v2439_v41 = vsel %vm1375_vm1, %v2423_v15, %v3163_v23  ;;  %v2446_v0 = vsel %vm1375_vm1, %v2430_v21, %v3164_v48  ;;  %v2431_v9 = vsel %vm5745_vm7, %v5227_v19, %v3194_v8  ;;  %v2424_v53 = vsel %vm5746_vm11, %v5225_v44, %v3193_v47  ;;  %vm5760_vm7 = vmmov %vm5680_vm0 }
 0x586   :  { %v2521_v55 = vsel %vm2515_vm12, %v2504_v46, %v3153_v43  ;;  %v2528_v20 = vsel %vm2515_vm12, %v2511_v2, %v3154_v30  ;;  %vm5761_vm11 = vmmov %vm5680_vm0 }
 0x587   :  { %2629 = vmatmul.f32.gmra.mxu1 %v2521_v55  ;;  %2650 = vmatmul.f32.gmra.mxu3 %v2528_v20 }
 0x589   :  { %v3172_v49 = vpop.permute.xlu1 %3171 }
 0x58a   :  { %v3174_v11 = vunpack.i.h.bf16 %v3172_v49  ;;  %v3173_v33 = vunpack.i.l.bf16 %v3172_v49  ;;  %v3207_v45 = vpop.permute.xlu2 %3206 }
 0x58b   :  { %v3167_v57 = vpop.permute.xlu0 %3166  ;;  %v3209_v34 = vunpack.i.h.bf16 %v3207_v45  ;;  %v3208_v30 = vunpack.i.l.bf16 %v3207_v45 }
 0x58c   :  { %v3169_v59 = vunpack.i.h.bf16 %v3167_v57  ;;  %v3168_v5 = vunpack.i.l.bf16 %v3167_v57 }
 0x58e   :  { %v2462_v52 = vsel %vm1409_vm8, %v2446_v0, %v3169_v59  ;;  %v2455_v17 = vsel %vm1409_vm8, %v2439_v41, %v3168_v5  ;;  %v1832_v41 = vld [vmem:[#allocation3 + $0xa0] sm:$0xff] }
 0x58f   :  { %v2471_v6 = vsel %vm1443_vm10, %v2455_v17, %v3173_v33  ;;  %v2478_v37 = vsel %vm1443_vm10, %v2462_v52, %v3174_v11 }
 0x590   :  { %v2488_v54 = vsel %vm2481_vm9, %v2471_v6, %v3178_v31  ;;  %v2495_v1 = vsel %vm2481_vm9, %v2478_v37, %v3179_v61 }
 0x591   :  { %v3187_v63 = vpop.permute.xlu1 %3186 }
 0x592   :  { %v3189_v16 = vunpack.i.h.bf16 %v3187_v63  ;;  %v3188_v22 = vunpack.i.l.bf16 %v3187_v63  ;;  %v3222_v62 = vpop.permute.xlu2 %3221 }
 0x593   :  { %v3182_v25 = vpop.permute.xlu0 %3181  ;;  %v3224_v18 = vunpack.i.h.bf16 %v3222_v62  ;;  %v3223_v35 = vunpack.i.l.bf16 %v3222_v62 }
 0x594   :  { %v3184_v14 = vunpack.i.h.bf16 %v3182_v25  ;;  %v3183_v7 = vunpack.i.l.bf16 %v3182_v25 }
 0x596   :  { %v2505_v60 = vsel %vm2498_vm3, %v2488_v54, %v3183_v7  ;;  %v2512_v51 = vsel %vm2498_vm3, %v2495_v1, %v3184_v14 }
 0x597   :  { %v2522_v4 = vsel %vm2515_vm12, %v2505_v60, %v3188_v22  ;;  %v2529_v3 = vsel %vm2515_vm12, %v2512_v51, %v3189_v16 }
 0x598   :  { %2632 = vmatmul.f32.gmra.mxu1 %v2522_v4  ;;  %2653 = vmatmul.f32.gmra.mxu3 %v2529_v3 }
 0x599   :  { %v3202_v39 = vpop.permute.xlu1 %3201 }
 0x59a   :  { %v3204_v42 = vunpack.i.h.bf16 %v3202_v39  ;;  %v3203_v13 = vunpack.i.l.bf16 %v3202_v39  ;;  %v3237_v32 = vpop.permute.xlu2 %3236 }
 0x59b   :  { %v3197_v56 = vpop.permute.xlu0 %3196  ;;  %v3239_v16 = vunpack.i.h.bf16 %v3237_v32  ;;  %v3238_v22 = vunpack.i.l.bf16 %v3237_v32 }
 0x59c   :  { %v3199_v12 = vunpack.i.h.bf16 %v3197_v56  ;;  %v3198_v26 = vunpack.i.l.bf16 %v3197_v56 }
 0x59e   :  { %v2447_v38 = vsel %vm1375_vm1, %v2431_v9, %v3199_v12  ;;  %v2440_v10 = vsel %vm1375_vm1, %v2424_v53, %v3198_v26 }
 0x59f   :  { %v2463_v40 = vsel %vm1409_vm8, %v2447_v38, %v3204_v42  ;;  %v2456_v24 = vsel %vm1409_vm8, %v2440_v10, %v3203_v13 }
 0x5a0   :  { %v2472_v44 = vsel %vm1443_vm10, %v2456_v24, %v3208_v30  ;;  %v2479_v20 = vsel %vm1443_vm10, %v2463_v40, %v3209_v34 }
 0x5a1   :  { %v3217_v27 = vpop.permute.xlu1 %3216 }
 0x5a2   :  { %v3219_v43 = vunpack.i.h.bf16 %v3217_v27  ;;  %v3218_v46 = vunpack.i.l.bf16 %v3217_v27  ;;  %v3252_v25 = vpop.permute.xlu2 %3251 }
 0x5a3   :  { %v3212_v19 = vpop.permute.xlu0 %3211  ;;  %v3254_v47 = vunpack.i.h.bf16 %v3252_v25  ;;  %v3253_v39 = vunpack.i.l.bf16 %v3252_v25 }
 0x5a4   :  { %v3214_v2 = vunpack.i.h.bf16 %v3212_v19  ;;  %v3213_v55 = vunpack.i.l.bf16 %v3212_v19 }
 0x5a6   :  { %v2489_v49 = vsel %vm2481_vm9, %v2472_v44, %v3213_v55  ;;  %v2496_v21 = vsel %vm2481_vm9, %v2479_v20, %v3214_v2 }
 0x5a7   :  { %v2506_v15 = vsel %vm2498_vm3, %v2489_v49, %v3218_v46  ;;  %v2513_v57 = vsel %vm2498_vm3, %v2496_v21, %v3219_v43 }
 0x5a8   :  { %v2523_v48 = vsel %vm2515_vm12, %v2506_v15, %v3223_v35  ;;  %v2530_v23 = vsel %vm2515_vm12, %v2513_v57, %v3224_v18 }
 0x5a9   :  { %2635 = vmatmul.f32.gmra.mxu1 %v2523_v48  ;;  %2656 = vmatmul.f32.gmra.mxu3 %v2530_v23  ;;  %v3232_v59 = vpop.permute.xlu1 %3231  ;;  %v1968_v48 = vld [vmem:[#allocation3 + $0x132] sm:$0xff] }
 0x5aa   :  { %v3234_v0 = vunpack.i.h.bf16 %v3232_v59  ;;  %v3233_v52 = vunpack.i.l.bf16 %v3232_v59  ;;  %v3267_v42 = vpop.permute.xlu2 %3266 }
 0x5ab   :  { %v3227_v5 = vpop.permute.xlu0 %3226  ;;  %v3268_v24 = vunpack.i.l.bf16 %v3267_v42  ;;  %v3269_v20 = vunpack.i.h.bf16 %v3267_v42 }
 0x5ac   :  { %v3229_v11 = vunpack.i.h.bf16 %v3227_v5  ;;  %v3228_v33 = vunpack.i.l.bf16 %v3227_v5 }
 0x5ae   :  { %v2432_v17 = vsel %vm5747_vm13, %v5257_v58, %v3229_v11  ;;  %v2425_v63 = vsel %vm5748_vm14, %v1832_v41, %v3228_v33  ;;  %v2680_v41 = vpop.f32.mrf.mxu2  ;;  %vm5762_vm13 = vmmov %vm5680_vm0 }
 0x5af   :  { %v2448_v37 = vsel %vm1375_vm1, %v2432_v17, %v3234_v0  ;;  %v2441_v61 = vsel %vm1375_vm1, %v2425_v63, %v3233_v52  ;;  %vm5763_vm14 = vmmov %vm5680_vm0 }
 0x5b0   :  { %v2457_v45 = vsel %vm1409_vm8, %v2441_v61, %v3238_v22  ;;  %v2464_v60 = vsel %vm1409_vm8, %v2448_v37, %v3239_v16 }
 0x5b1   :  { %v3247_v6 = vpop.permute.xlu1 %3246 }
 0x5b2   :  { %v3249_v54 = vunpack.i.h.bf16 %v3247_v6  ;;  %v3248_v1 = vunpack.i.l.bf16 %v3247_v6  ;;  %v2260_v2 = vpop.permute.xlu2 %2259 }
 0x5b3   :  { %v3242_v31 = vpop.permute.xlu0 %3241 }
 0x5b4   :  { %v3244_v14 = vunpack.i.h.bf16 %v3242_v31  ;;  %v3243_v7 = vunpack.i.l.bf16 %v3242_v31 }
 0x5b6   :  { %v2473_v58 = vsel %vm1443_vm10, %v2457_v45, %v3243_v7  ;;  %v2480_v51 = vsel %vm1443_vm10, %v2464_v60, %v3244_v14  ;;  %v2683_v52 = vpop.f32.mrf.mxu2 }
 0x5b7   :  { %v2490_v3 = vsel %vm2481_vm9, %v2473_v58, %v3248_v1  ;;  %v2497_v8 = vsel %vm2481_vm9, %v2480_v51, %v3249_v54 }
 0x5b8   :  { %v2507_v9 = vsel %vm2498_vm3, %v2490_v3, %v3253_v39  ;;  %v2514_v53 = vsel %vm2498_vm3, %v2497_v8, %v3254_v47 }
 0x5b9   :  { %v3262_v4 = vpop.permute.xlu1 %3261 }
 0x5ba   :  { %v3263_v13 = vunpack.i.l.bf16 %v3262_v4  ;;  %v3264_v43 = vunpack.i.h.bf16 %v3262_v4  ;;  %v2262_v32 = vpop.permute.xlu2 %2261 }
 0x5bb   :  { %v3257_v56 = vpop.permute.xlu0 %3256 }
 0x5bc   :  { %v3259_v12 = vunpack.i.h.bf16 %v3257_v56  ;;  %v3258_v26 = vunpack.i.l.bf16 %v3257_v56  ;;  %v2426_v62 = vsel %vm5749_vm15, %v5321_v36, %v3263_v13  ;;  %v2427_v44 = vsel %vm5751_vm2, %v5336_v29, %v3264_v43  ;;  %vm5764_vm15 = vmmov %vm5680_vm0 }
 0x5bd   :  { %v2442_v46 = vsel %vm1375_vm1, %v2426_v62, %v3268_v24  ;;  %v2443_v15 = vsel %vm1375_vm1, %v2427_v44, %v3269_v20  ;;  %vm5753_vm1 = vmmov %vm5680_vm0 }
 0x5be   :  { %v2524_v38 = vsel %vm2515_vm12, %v2507_v9, %v3258_v26  ;;  %v2531_v10 = vsel %vm2515_vm12, %v2514_v53, %v3259_v12  ;;  %v2686_v17 = vpop.f32.mrf.mxu2  ;;  %vm5766_vm2 = vmmov %vm5680_vm0 }
 0x5bf   :  { %2638 = vmatmul.f32.gmra.mxu1 %v2524_v38  ;;  %2659 = vmatmul.f32.gmra.mxu3 %v2531_v10 }
 0x5c1   :  { %v3277_v40 = vpop.permute.xlu1 %3276 }
 0x5c2   :  { %v3278_v34 = vunpack.i.l.bf16 %v3277_v40  ;;  %v3279_v21 = vunpack.i.h.bf16 %v3277_v40 }
 0x5c3   :  { %v3272_v27 = vpop.permute.xlu0 %3271 }
 0x5c4   :  { %v3273_v30 = vunpack.i.l.bf16 %v3272_v27  ;;  %v3274_v36 = vunpack.i.h.bf16 %v3272_v27 }
 0x5c6   :  { %v2458_v19 = vsel %vm1409_vm8, %v2442_v46, %v3273_v30  ;;  %v2689_v63 = vpop.f32.mrf.mxu2 }
 0x5c7   :  { %2970 = vmatmul.msk.f32.vlgmr.msra.gmra.mxu3 %vm5750_vm6, %v5323_v28  ;;  %v2474_v55 = vsel %vm1443_vm10, %v2458_v19, %v3278_v34  ;;  %v2459_v28 = vsel %vm1409_vm8, %v2443_v15, %v3274_v36  ;;  %vm5754_vm8 = vmmov %vm5680_vm0 }
 0x5c8   :  { %v2491_v49 = vsel %vm2481_vm9, %v2474_v55, %v2260_v2  ;;  %v2475_v29 = vsel %vm1443_vm10, %v2459_v28, %v3279_v21  ;;  %vm5755_vm10 = vmmov %vm5680_vm0 }
 0x5c9   :  { %v2388_v18 = vpop.permute.xlu1 %2387  ;;  %v2492_v11 = vsel %vm2481_vm9, %v2475_v29, %v2262_v32  ;;  %vm5756_vm9 = vmmov %vm5680_vm0 }
 0x5ca   :  { %vm5765_vm6 = vmmov %vm5680_vm0 }
 0x5cb   :  { %v2324_v35 = vpop.permute.xlu0 %2323 }
 0x5cc   :  { %v2508_v57 = vsel %vm2498_vm3, %v2491_v49, %v2324_v35  ;;  %v2615_v6 = vpop.f32.mrf.mxu1 }
 0x5cd   :  { %v2525_v23 = vsel %vm2515_vm12, %v2508_v57, %v2388_v18  ;;  %v2681_v56 = vadd.f32 %v2680_v41, %v2615_v6 }
 0x5ce   :  { %2641 = vmatmul.f32.gmra.mxu1 %v2525_v23  ;;  %v2692_v37 = vpop.f32.mrf.mxu2 }
 0x5cf   :  { %2971 = vmatmul.msk.f32.gmra.mxu3 %vm5752_vm5, %v1968_v48  ;;  %v2728_v13 = vsel %vm5754_vm8, %v2681_v56, 0.0  ;;  %vm5767_vm5 = vmmov %vm5680_vm0 }
 0x5d0   :  { %vm5769_vm8 = vmmov %vm5680_vm0 }
 0x5d1   :  { %v2390_v59 = vpop.permute.xlu1 %2389 }
 0x5d3   :  { %v2326_v5 = vpop.permute.xlu0 %2325 }
 0x5d4   :  { %v2509_v33 = vsel %vm2498_vm3, %v2492_v11, %v2326_v5  ;;  %v2618_v61 = vpop.f32.mrf.mxu1  ;;  %vm5757_vm3 = vmmov %vm5680_vm0 }
 0x5d5   :  { %v2526_v0 = vsel %vm2515_vm12, %v2509_v33, %v2390_v59  ;;  %v5506_v39 = vadd.f32 %v2683_v52, %v2618_v61  ;;  %vm5758_vm12 = vmmov %vm5680_vm0 }
 0x5d6   :  { %2644 = vmatmul.f32.gmra.mxu1 %v2526_v0  ;;  %v2695_v31 = vpop.f32.mrf.mxu2 }
 0x5d7   :  { %v2729_v26 = vsel %vm5753_vm1, %v5506_v39, 0.0  ;;  %vm5768_vm1 = vmmov %vm5680_vm0 }
 0x5d8   :  { %v2730_v62 = vadd.f32 %v2729_v26, %v2728_v13 }
 0x5dd   :  { %v2621_v16 = vpop.f32.mrf.mxu1 }
 0x5de   :  { %v2698_v22 = vpop.f32.mrf.mxu2  ;;  %v5508_v12 = vadd.f32 %v2686_v17, %v2621_v16 }
 0x5e0   :  { %v2731_v38 = vsel %vm5755_vm10, %v5508_v12, 0.0  ;;  %vm5770_vm10 = vmmov %vm5680_vm0 }
 0x5e1   :  { %v2732_v34 = vadd.f32 %v2731_v38, %v2730_v62 }
 0x5e5   :  { %v2624_v25 = vpop.f32.mrf.mxu1 }
 0x5e6   :  { %v2701_v14 = vpop.f32.mrf.mxu2  ;;  %v2690_v9 = vadd.f32 %v2689_v63, %v2624_v25 }
 0x5e8   :  { %v2733_v24 = vsel %vm5756_vm9, %v2690_v9, 0.0  ;;  %vm5771_vm9 = vmmov %vm5680_vm0 }
 0x5e9   :  { %v2734_v46 = vadd.f32 %v2733_v24, %v2732_v34 }
 0x5ee   :  { %v2627_v7 = vpop.f32.mrf.mxu1  ;;  %v2704_v54 = vpop.f32.mrf.mxu2 }
 0x5ef   :  { %v2693_v10 = vadd.f32 %v2692_v37, %v2627_v7 }
 0x5f1   :  { %v2735_v30 = vsel %vm5757_vm3, %v2693_v10, 0.0  ;;  %vm5772_vm3 = vmmov %vm5680_vm0 }
 0x5f2   :  { %v2736_v55 = vadd.f32 %v2735_v30, %v2734_v46 }
 0x5f4   :  { %v2648_v1 = vpop.f32.mrf.mxu3 }
 0x5f6   :  { %v2707_v58 = vpop.f32.mrf.mxu2 }
 0x5fe   :  { %v2710_v3 = vpop.f32.mrf.mxu2 }
 0x604   :  { %v2630_v45 = vpop.f32.mrf.mxu1 }
 0x605   :  { %v2696_v27 = vadd.f32 %v2695_v31, %v2630_v45 }
 0x606   :  { %v2713_v53 = vpop.f32.mrf.mxu2 }
 0x607   :  { %v2737_v19 = vsel %vm5758_vm12, %v2696_v27, 0.0  ;;  %v2714_v59 = vadd.f32 %v2713_v53, %v2648_v1  ;;  %vm5773_vm12 = vmmov %vm5680_vm0 }
 0x608   :  { %v2738_v35 = vadd.f32 %v2737_v19, %v2736_v55 }
 0x609   :  { %v2749_v17 = vsel %vm5763_vm14, %v2714_v59, 0.0  ;;  %vm5778_vm14 = vmmov %vm5680_vm0 }
 0x60a   :  { %v2651_v60 = vpop.f32.mrf.mxu3 }
 0x60e   :  { %v2716_v18 = vpop.f32.mrf.mxu2 }
 0x60f   :  { %v2717_v33 = vadd.f32 %v2716_v18, %v2651_v60 }
 0x611   :  { %v2751_v61 = vsel %vm5764_vm15, %v2717_v33, 0.0  ;;  %vm5779_vm15 = vmmov %vm5680_vm0 }
 0x615   :  { %v2633_v51 = vpop.f32.mrf.mxu1 }
 0x616   :  { %v2699_v43 = vadd.f32 %v2698_v22, %v2633_v51  ;;  %v2719_v0 = vpop.f32.mrf.mxu2 }
 0x618   :  { %v2739_v36 = vsel %vm5759_vm4, %v2699_v43, 0.0  ;;  %vm5774_vm4 = vmmov %vm5680_vm0 }
 0x619   :  { %v2740_v15 = vadd.f32 %v2739_v36, %v2738_v35 }
 0x61b   :  { %v2654_v4 = vpop.f32.mrf.mxu3 }
 0x61c   :  { %v2720_v63 = vadd.f32 %v2719_v0, %v2654_v4 }
 0x61e   :  { %v2753_v22 = vsel %vm5765_vm6, %v2720_v63, 0.0  ;;  %vm5780_vm6 = vmmov %vm5680_vm0 }
 0x626   :  { %v2636_v8 = vpop.f32.mrf.mxu1 }
 0x627   :  { %v2702_v2 = vadd.f32 %v2701_v14, %v2636_v8 }
 0x629   :  { %v2741_v49 = vsel %vm5680_vm0, %v2702_v2, 0.0 }
 0x62a   :  { %v2742_v28 = vadd.f32 %v2741_v49, %v2740_v15 }
 0x62c   :  { %v2657_v47 = vpop.f32.mrf.mxu3 }
 0x63c   :  { %v2639_v42 = vpop.f32.mrf.mxu1 }
 0x63d   :  { %v2705_v20 = vadd.f32 %v2704_v54, %v2639_v42 }
 0x63f   :  { %v2743_v48 = vsel %vm5760_vm7, %v2705_v20, 0.0  ;;  %vm5775_vm7 = vmmov %vm5680_vm0 }
 0x640   :  { %v2744_v29 = vadd.f32 %v2743_v48, %v2742_v28 }
 0x642   :  { %v2660_v40 = vpop.f32.mrf.mxu3 }
 0x64a   :  { %v2722_v57 = vpop.f32.mrf.mxu3 }
 0x64b   :  { %v2642_v44 = vpop.f32.mrf.mxu1  ;;  %v2723_v31 = vadd.f32 %v2722_v57, %v2657_v47 }
 0x64c   :  { %v2708_v21 = vadd.f32 %v2707_v58, %v2642_v44 }
 0x64d   :  { %v2755_v7 = vsel %vm5766_vm2, %v2723_v31, 0.0  ;;  %vm5781_vm2 = vmmov %vm5680_vm0 }
 0x64e   :  { %v2745_v23 = vsel %vm5761_vm11, %v2708_v21, 0.0  ;;  %vm5776_vm11 = vmmov %vm5680_vm0 }
 0x64f   :  { %v2746_v11 = vadd.f32 %v2745_v23, %v2744_v29 }
 0x652   :  { %v2725_v6 = vpop.f32.mrf.mxu3 }
 0x653   :  { %v2645_v32 = vpop.f32.mrf.mxu1  ;;  %v2726_v25 = vadd.f32 %v2725_v6, %v2660_v40 }
 0x654   :  { %v2711_v5 = vadd.f32 %v2710_v3, %v2645_v32 }
 0x655   :  { %v2757_v1 = vsel %vm5767_vm5, %v2726_v25, 0.0  ;;  %vm5782_vm5 = vmmov %vm5680_vm0 }
 0x656   :  { %v2747_v41 = vsel %vm5762_vm13, %v2711_v5, 0.0  ;;  %vm5777_vm13 = vmmov %vm5680_vm0 }
 0x657   :  { %v2748_v52 = vadd.f32 %v2747_v41, %v2746_v11 }
 0x659   :  { %v2750_v37 = vadd.f32 %v2749_v17, %v2748_v52 }
 0x65b   :  { %v2752_v16 = vadd.f32 %v2751_v61, %v2750_v37 }
 0x65d   :  { %v2754_v14 = vadd.f32 %v2753_v22, %v2752_v16 }
 0x65f   :  { %v2756_v54 = vadd.f32 %v2755_v7, %v2754_v14 }
 0x661   :  { %v2758_v45 = vadd.f32 %v2757_v1, %v2756_v54 }
 0x663   :  { %v2759_v60 = vrot.slane %v2758_v45, 4 }
 0x665   :  { %v2760_v58 = vadd.f32 %v2759_v60, %v2758_v45 }
 0x667   :  { %v2761_v51 = vrot.slane %v2760_v58, 2 }
 0x669   :  { %v2762_v4 = vadd.f32 %v2761_v51, %v2760_v58 }
 0x66b   :  { %v2763_v3 = vrot.slane %v2762_v4, 1 }
 0x66d   :  { %v2764_v8 = vadd.f32 %v2763_v3, %v2762_v4 }
 0x66f   :  { %v2765_v26 = vmul.f32 %v2764_v8, %v4962_v50 }
 0x671   :  { %v5529_v47 = vsub.f32 %v2681_v56, %v2765_v26  ;;  %v5532_v53 = vsub.f32 %v5506_v39, %v2765_v26  ;;  %v5535_v42 = vsub.f32 %v5508_v12, %v2765_v26  ;;  %v5537_v13 = vsub.f32 %v2690_v9, %v2765_v26 }
 0x672   :  { %v5543_v40 = vsub.f32 %v2693_v10, %v2765_v26  ;;  %v5547_v24 = vsub.f32 %v2696_v27, %v2765_v26  ;;  %v5553_v30 = vsub.f32 %v2699_v43, %v2765_v26  ;;  %v5558_v55 = vsub.f32 %v2702_v2, %v2765_v26 }
 0x673   :  { %v2782_v38 = vmul.f32 %v5529_v47, %v5529_v47  ;;  %v2783_v62 = vmul.f32 %v5532_v53, %v5532_v53  ;;  %v2784_v56 = vmul.f32 %v5535_v42, %v5535_v42  ;;  %v2785_v39 = vmul.f32 %v5537_v13, %v5537_v13 }
 0x674   :  { %v2786_v46 = vmul.f32 %v5543_v40, %v5543_v40  ;;  %v2787_v27 = vmul.f32 %v5547_v24, %v5547_v24  ;;  %v5563_v18 = vsub.f32 %v2705_v20, %v2765_v26  ;;  %v2788_v43 = vmul.f32 %v5553_v30, %v5553_v30 }
 0x675   :  { %v2798_v12 = vsel %vm5768_vm1, %v2782_v38, 0.0  ;;  %v2799_v9 = vsel %vm5769_vm8, %v2783_v62, 0.0  ;;  %v2801_v10 = vsel %vm5770_vm10, %v2784_v56, 0.0  ;;  %v2803_v44 = vsel %vm5771_vm9, %v2785_v39, 0.0  ;;  %vm5783_vm9 = vmmov %vm5680_vm0 }
 0x676   :  { %v2800_v34 = vadd.f32 %v2799_v9, %v2798_v12  ;;  %v2805_v35 = vsel %vm5772_vm3, %v2786_v46, 0.0  ;;  %v5568_v15 = vsub.f32 %v2708_v21, %v2765_v26  ;;  %v2789_v2 = vmul.f32 %v5558_v55, %v5558_v55  ;;  %vm5784_vm3 = vmmov %vm5680_vm0 }
 0x677   :  { %v2807_v57 = vsel %vm5773_vm12, %v2787_v27, 0.0  ;;  %v5573_v28 = vsub.f32 %v2711_v5, %v2765_v26  ;;  %v2790_v20 = vmul.f32 %v5563_v18, %v5563_v18  ;;  %v2809_v23 = vsel %vm5774_vm4, %v2788_v43, 0.0  ;;  %v1822_v43 = vld [vmem:[%s5659_s5] sm:$0x1]  ;;  %vm5785_vm12 = vmmov %vm5680_vm0  ;;  %s3328_s5 = smov [#allocation4]  }
 0x678   :  { %v2802_v19 = vadd.f32 %v2801_v10, %v2800_v34  ;;  %v5578_v32 = vsub.f32 %v2714_v59, %v2765_v26  ;;  %v2791_v21 = vmul.f32 %v5568_v15, %v5568_v15  ;;  %v2811_v11 = vsel %vm5680_vm0, %v2789_v2, 0.0  ;;  %vm5786_vm4 = vmmov %vm5680_vm0 }
 0x679   :  { %v5583_v0 = vsub.f32 %v2717_v33, %v2765_v26  ;;  %v2792_v5 = vmul.f32 %v5573_v28, %v5573_v28  ;;  %v2813_v52 = vsel %vm5775_vm7, %v2790_v20, 0.0  ;;  %v5588_v6 = vsub.f32 %v2720_v63, %v2765_v26  ;;  %vm5787_vm7 = vmmov %vm5680_vm0 }
 0x67a   :  { %v2804_v36 = vadd.f32 %v2803_v44, %v2802_v19  ;;  %v2793_v59 = vmul.f32 %v5578_v32, %v5578_v32  ;;  %v2815_v37 = vsel %vm5776_vm11, %v2791_v21, 0.0  ;;  %v5593_v16 = vsub.f32 %v2723_v31, %v2765_v26  ;;  %vm5788_vm11 = vmmov %vm5680_vm0 }
 0x67b   :  { %v2794_v33 = vmul.f32 %v5583_v0, %v5583_v0  ;;  %v2817_v22 = vsel %vm5777_vm13, %v2792_v5, 0.0  ;;  %v5598_v7 = vsub.f32 %v2726_v25, %v2765_v26  ;;  %v2795_v63 = vmul.f32 %v5588_v6, %v5588_v6  ;;  %vm5789_vm13 = vmmov %vm5680_vm0 }
 0x67c   :  { %v2806_v49 = vadd.f32 %v2805_v35, %v2804_v36  ;;  %v2819_v54 = vsel %vm5778_vm14, %v2793_v59, 0.0  ;;  %v2796_v45 = vmul.f32 %v5593_v16, %v5593_v16  ;;  %vm5790_vm14 = vmmov %vm5680_vm0 }
 0x67d   :  { %v2821_v31 = vsel %vm5779_vm15, %v2794_v33, 0.0  ;;  %v2797_v58 = vmul.f32 %v5598_v7, %v5598_v7  ;;  %v2823_v51 = vsel %vm5780_vm6, %v2795_v63, 0.0  ;;  %vm5791_vm15 = vmmov %vm5680_vm0 }
 0x67e   :  { %v2808_v48 = vadd.f32 %v2807_v57, %v2806_v49  ;;  %v2825_v25 = vsel %vm5781_vm2, %v2796_v45, 0.0  ;;  %vm5792_vm6 = vmmov %vm5680_vm0 }
 0x67f   :  { %v2827_v8 = vsel %vm5782_vm5, %v2797_v58, 0.0  ;;  %vm5793_vm2 = vmmov %vm5680_vm0 }
 0x680   :  { %v2810_v29 = vadd.f32 %v2809_v23, %v2808_v48  ;;  %v3281_v23 = vld [vmem:[%s5660_s6] ss:$0 sm:$0xff]  ;;  %s2922_s6 = sshll.u32 %s3328_s5, 4  ;;  %vm5794_vm5 = vmmov %vm5680_vm0  ;;  %s2923_s6 = int_to_ptr.vmem [resolvable:$true] %s2922_s6 }
 0x682   :  { %v2812_v41 = vadd.f32 %v2811_v11, %v2810_v29 }
 0x684   :  { %v2814_v17 = vadd.f32 %v2813_v52, %v2812_v41 }
 0x686   :  { %v2816_v61 = vadd.f32 %v2815_v37, %v2814_v17 }
 0x688   :  { %v2818_v14 = vadd.f32 %v2817_v22, %v2816_v61 }
 0x68a   :  { %v2820_v1 = vadd.f32 %v2819_v54, %v2818_v14 }
 0x68c   :  { %v2822_v60 = vadd.f32 %v2821_v31, %v2820_v1 }
 0x68e   :  { %v2824_v4 = vadd.f32 %v2823_v51, %v2822_v60 }
 0x690   :  { %v2826_v3 = vadd.f32 %v2825_v25, %v2824_v4 }
 0x692   :  { %v2828_v26 = vadd.f32 %v2827_v8, %v2826_v3 }
 0x694   :  { %v2829_v38 = vrot.slane %v2828_v26, 4 }
 0x696   :  { %v2830_v62 = vadd.f32 %v2829_v38, %v2828_v26 }
 0x698   :  { %v2831_v56 = vrot.slane %v2830_v62, 2 }
 0x69a   :  { %v2832_v39 = vadd.f32 %v2831_v56, %v2830_v62 }
 0x69c   :  { %v2833_v12 = vrot.slane %v2832_v39, 1 }
 0x69e   :  { %v2834_v9 = vadd.f32 %v2833_v12, %v2832_v39 }
 0x6a0   :  { %v2835_v34 = vmul.f32 %v2834_v9, %v4962_v50 }
 0x6a2   :  { %v2836_v46 = vadd.f32 1e-05, %v2835_v34 }
 0x6a4   :  { %3286 = vrsqrt.f32 %v2836_v46  ;;  %vm2843_vm8 = vweird.f32 %v2836_v46 }
 0x6aa   :  { %v3287_v10 = vpop.eup %3286 }
 0x6ab   :  { %v2838_v19 = vmul.f32 %v3287_v10, %v2836_v46  ;;  %vm2844_vm1 = vweird.f32 %v3287_v10 }
 0x6ac   :  { %vm2845_vm10 = vmor %vm2843_vm8, %vm2844_vm1 }
 0x6ad   :  { %v2839_v27 = vmul.f32 %v3287_v10, %v2838_v19  ;;  %vm5795_vm1 = vmmov %vm5680_vm0 }
 0x6ae   :  { %vm5796_vm8 = vmmov %vm5680_vm0 }
 0x6af   :  { %v2840_v44 = vmul.f32 0.5, %v2839_v27 }
 0x6b1   :  { %v2841_v36 = vsub.f32 1.5, %v2840_v44 }
 0x6b3   :  { %v2842_v35 = vmul.f32 %v3287_v10, %v2841_v36 }
 0x6b5   :  { %v2846_v49 = vsel %vm2845_vm10, %v3287_v10, %v2842_v35  ;;  %vm5797_vm10 = vmmov %vm5680_vm0 }
 0x6b6   :  { %v2847_v2 = vmul.f32 %v2846_v49, %v1822_v43 }
 0x6b8   :  { %v2849_v57 = vperm.slane %v2847_v2, 0 }
 0x6ba   :  { %v2851_v50 = vmul.f32 %v2849_v57, %v5529_v47  ;;  %v2852_v48 = vmul.f32 %v2849_v57, %v5532_v53  ;;  %v2853_v20 = vmul.f32 %v2849_v57, %v5535_v42  ;;  %v2854_v29 = vmul.f32 %v2849_v57, %v5537_v13 }
 0x6bb   :  { %v2855_v21 = vmul.f32 %v2849_v57, %v5543_v40  ;;  %v2860_v11 = vmul.f32 %v2849_v57, %v5568_v15  ;;  %v2861_v41 = vmul.f32 %v2849_v57, %v5573_v28  ;;  %v2856_v5 = vmul.f32 %v2849_v57, %v5547_v24 }
 0x6bc   :  { %v2857_v47 = vmul.f32 %v2849_v57, %v5553_v30  ;;  %v2870_v52 = vadd.f32 %v3281_v23, %v2851_v50  ;;  %v2871_v53 = vadd.f32 %v3281_v23, %v2852_v48  ;;  %v2872_v17 = vadd.f32 %v3281_v23, %v2853_v20 }
 0x6bd   :  { %v2858_v42 = vmul.f32 %v2849_v57, %v5558_v55  ;;  %v2873_v59 = vadd.f32 %v3281_v23, %v2854_v29  ;;  %v2859_v37 = vmul.f32 %v2849_v57, %v5563_v18  ;;  %v2874_v61 = vadd.f32 %v3281_v23, %v2855_v21 }
 0x6be   :  { %v2875_v13 = vadd.f32 %v3281_v23, %v2856_v5  ;;  %v2876_v33 = vadd.f32 %v3281_v23, %v2857_v47  ;;  %v2886_v40 = vmax.f32 %v2870_v52, 0.0  ;;  %v2887_v22 = vmax.f32 %v2871_v53, 0.0 }
 0x6bf   :  { %v2888_v15 = vmax.f32 %v2872_v17, 0.0  ;;  %v2862_v28 = vmul.f32 %v2849_v57, %v5578_v32  ;;  %v2877_v14 = vadd.f32 %v3281_v23, %v2858_v42  ;;  %v2889_v24 = vmax.f32 %v2873_v59, 0.0 }
 0x6c0   :  { %v2863_v30 = vmul.f32 %v2849_v57, %v5583_v0  ;;  %v2878_v63 = vadd.f32 %v3281_v23, %v2859_v37  ;;  %v2890_v54 = vmax.f32 %v2874_v61, 0.0  ;;  %2902 = vst.msk [vmem:[#allocation4] sm:$0xff] %vm5783_vm9, %v2886_v40  ;;  %v2864_v55 = vmul.f32 %v2849_v57, %v5588_v6 }
 0x6c1   :  { %v2879_v1 = vadd.f32 %v3281_v23, %v2860_v11  ;;  %v2891_v18 = vmax.f32 %v2875_v13, 0.0  ;;  %2903 = vst.msk [vmem:[#allocation4 + $0x8] sm:$0xff] %vm5784_vm3, %v2887_v22  ;;  %v2865_v45 = vmul.f32 %v2849_v57, %v5593_v16  ;;  %v2880_v31 = vadd.f32 %v3281_v23, %v2861_v41 }
 0x6c2   :  { %v2892_v60 = vmax.f32 %v2876_v33, 0.0  ;;  %2904 = vst.msk [vmem:[#allocation4 + $0x10] sm:$0xff] %vm5785_vm12, %v2888_v15  ;;  %v2866_v32 = vmul.f32 %v2849_v57, %v5598_v7  ;;  %v2881_v58 = vadd.f32 %v3281_v23, %v2862_v28  ;;  %v2893_v0 = vmax.f32 %v2877_v14, 0.0 }
 0x6c3   :  { %2905 = vst.msk [vmem:[#allocation4 + $0x18] sm:$0xff] %vm5786_vm4, %v2889_v24  ;;  %v2882_v51 = vadd.f32 %v3281_v23, %v2863_v30  ;;  %v2894_v4 = vmax.f32 %v2878_v63, 0.0  ;;  %v2883_v6 = vadd.f32 %v3281_v23, %v2864_v55  ;;  %v2895_v25 = vmax.f32 %v2879_v1, 0.0 }
 0x6c4   :  { %2906 = vst.msk [vmem:[#allocation4 + $0x20] sm:$0xff] %vm5680_vm0, %v2890_v54  ;;  %v2884_v3 = vadd.f32 %v3281_v23, %v2865_v45  ;;  %v2896_v16 = vmax.f32 %v2880_v31, 0.0  ;;  %v2885_v8 = vadd.f32 %v3281_v23, %v2866_v32  ;;  %v2897_v26 = vmax.f32 %v2881_v58, 0.0 }
 0x6c5   :  { %2907 = vst.msk [vmem:[#allocation4 + $0x28] sm:$0xff] %vm5787_vm7, %v2891_v18  ;;  %v2898_v7 = vmax.f32 %v2882_v51, 0.0  ;;  %v2899_v38 = vmax.f32 %v2883_v6, 0.0 }
 0x6c6   :  { %2908 = vst.msk [vmem:[#allocation4 + $0x30] sm:$0xff] %vm5788_vm11, %v2892_v60  ;;  %v2900_v62 = vmax.f32 %v2884_v3, 0.0  ;;  %v2901_v56 = vmax.f32 %v2885_v8, 0.0 }
 0x6c7   :  { %2909 = vst.msk [vmem:[#allocation4 + $0x38] sm:$0xff] %vm5789_vm13, %v2893_v0 }
 0x6c8   :  { %2910 = vst.msk [vmem:[#allocation4 + $0x40] sm:$0xff] %vm5790_vm14, %v2894_v4 }
 0x6c9   :  { %2911 = vst.msk [vmem:[#allocation4 + $0x48] sm:$0xff] %vm5791_vm15, %v2895_v25 }
 0x6ca   :  { %2912 = vst.msk [vmem:[#allocation4 + $0x50] sm:$0xff] %vm5792_vm6, %v2896_v16 }
 0x6cb   :  { %2913 = vst.msk [vmem:[#allocation4 + $0x58] sm:$0xff] %vm5793_vm2, %v2897_v26 }
 0x6cc   :  { %2914 = vst.msk [vmem:[#allocation4 + $0x60] sm:$0xff] %vm5794_vm5, %v2898_v7 }
 0x6cd   :  { %2915 = vst.msk [vmem:[#allocation4 + $0x68] sm:$0xff] %vm5795_vm1, %v2899_v38 }
 0x6ce   :  { %2916 = vst.msk [vmem:[#allocation4 + $0x70] sm:$0xff] %vm5796_vm8, %v2900_v62 }
 0x6cf   :  { %2917 = vst.msk [vmem:[#allocation4 + $0x78] sm:$0xff] %vm5797_vm10, %v2901_v56 }
 0x6d0   :  { %2930 = dma.vmem_to_hbm [thread:$0]  %s2923_s6, 2048, %s2925_s24, [#allocation5], %s3329_s25, %s3329_s25, %s3314_s9  }
 0x6d1   :  { %3312 = dma.done.wait [#allocation5], 2048  }
 0x6d2   :  { %3313 = vsyncadd [#allocation5], 4294965248 }
 0x6d3   :  { %2939 = vsyncpa [#allocation5], 1 }

</bundles_post_ra>
